<compile_context>
chip_gen: v7x
topology: tpu7x:2x2x1
jax: 0.10.0
libtpu: 0.0.40
codegen_flags: <defaults>
</compile_context>

<pallas_src>
import functools

import jax
import jax.numpy as jnp
from jax import lax
from jax.experimental import pallas as pl
from jax.experimental.pallas import tpu as pltpu


def _param_offsets(C, K):
    C2 = C // 2
    sizes = {
        "w1a": C2 * C * K, "b1a": C2, "w1b": C2 * K, "b1b": 1,
        "w2a": C2 * C * K, "b2a": C2, "w2b": C2 * K, "b2b": 1,
    }
    offs, cur = {}, 0
    for name, n in sizes.items():
        offs[name] = cur
        cur += n
    return offs, cur


def _pick_batch_block(n, max_nb):
    nb = min(n, max_nb)
    while n % nb:
        nb -= 1
    return nb


def ffam_kernel(params_ref, wmask_ref, low_ref, out_ref, pad_ref, ypad_ref,
                *, NB, C, K, PAD, H, W, LPAD, offs):
    """One batch block.

    params_ref : flat f32 parameter vector in SMEM (scalar-prefetched).
    wmask_ref  : (K, 1, H*W) f32 wrap-kill masks for W-direction taps (grid-invariant).
    low_ref    : (NB, C, H*W) f32, lane-dense.
    out_ref    : (NB, C, H*W) f32, lane-dense.
    pad_ref    : (NB, C, LPAD + H*W + LPAD) VMEM scratch — flat zero-padded input.
    ypad_ref   : (NB,    LPAD + H*W + LPAD) VMEM scratch — flat zero-padded intermediate.
    """
    f32 = jnp.float32
    HW = H * W
    C2 = C // 2

    def p(name, i=0):                                   # scalar weight from SMEM
        return params_ref[offs[name] + i]

    low = low_ref[...]                                  # (NB, C, HW) lane-dense load
    wm = wmask_ref[...]                                 # (K, 1, HW)  loaded once / step

    # Zero pad bands + copy interior (the padded copy is built in VMEM, not shipped).
    pad_ref[:, :, :LPAD] = jnp.zeros((NB, C, LPAD), f32)
    pad_ref[:, :, LPAD + HW:] = jnp.zeros((NB, C, LPAD), f32)
    pad_ref[:, :, LPAD:LPAD + HW] = low
    ypad_ref[:, :LPAD] = jnp.zeros((NB, LPAD), f32)
    ypad_ref[:, LPAD + HW:] = jnp.zeros((NB, LPAD), f32)

    # ---- first convs of both branches (C -> C//2), stacked lane-dense accumulators.
    #      A W-shift by d=t-PAD is a flat shift by d with a wrap-kill mask; an
    #      H-shift is a flat shift by d*W (the zero bands supply the H padding).
    # TODO(synk): move to an im2col MXU matmul for realistic channel counts.
    y1 = [jnp.full((NB, HW), p("b1a", co), f32) for co in range(C2)]   # (1,K) conv
    y2 = [jnp.full((NB, HW), p("b2a", co), f32) for co in range(C2)]   # (K,1) conv
    for t in range(K):
        d = t - PAD
        offw = LPAD + d                                  # shift along W (needs mask)
        offh = LPAD + d * W                              # shift along H (no mask)
        m = None if d == 0 else wm[t]                    # (1, HW)
        for ci in range(C):
            sw = pad_ref[:, ci, offw:offw + HW]          # (NB, HW)
            if m is not None:
                sw = sw * m
            sh = pad_ref[:, ci, offh:offh + HW]
            for co in range(C2):
                y1[co] = y1[co] + p("w1a", (co * C + ci) * K + t) * sw
                y2[co] = y2[co] + p("w2a", (co * C + ci) * K + t) * sh

    # ---- second convs (C//2 -> 1).  PyTorch zero-pads the first conv's output;
    #      the zero bands of ypad_ref reproduce that exactly.
    x1 = jnp.full((NB, HW), p("b1b"), f32)
    x2 = jnp.full((NB, HW), p("b2b"), f32)
    for co in range(C2):
        ypad_ref[:, LPAD:LPAD + HW] = y1[co]             # branch 1: (K,1) conv (H-shift)
        for t in range(K):
            off = LPAD + (t - PAD) * W
            x1 = x1 + p("w1b", co * K + t) * ypad_ref[:, off:off + HW]
        ypad_ref[:, LPAD:LPAD + HW] = y2[co]             # branch 2: (1,K) conv (W-shift)
        for t in range(K):
            off = LPAD + (t - PAD)
            slab = ypad_ref[:, off:off + HW]
            if t != PAD:
                slab = slab * wm[t]
            x2 = x2 + p("w2b", co * K + t) * slab

    s = x1 + x2                                          # (NB, HW): conv1(low)+conv2(low)

    # ---- GMP + channel-vectorized sigmoid gate + multiply; single lane-dense store.
    #      sigmoid(s + gmp) = 1 / (1 + exp(-s)*exp(-gmp)): one EUP exp over HW per
    #      batch element (instead of one per channel) + a tiny (NB, C) exp.
    gmp = jnp.max(low, axis=2)                           # (NB, C)  AdaptiveMaxPool2d((1,1))
    e = jnp.exp(-s)[:, None, :]                          # (NB, 1, HW)
    eg = jnp.exp(-gmp)[:, :, None]                       # (NB, C, 1)
    # Exact reciprocal kept for tight f32 parity with the reference; pl.reciprocal(
    # denom, approx=True) would push the divide onto the otherwise-idle EUP if the
    # accuracy budget allows.
    gate = 1.0 / (1.0 + eg * e)                          # (NB, C, HW)
    out_ref[...] = low * gate                            # lane-dense store


def ffam_forward(low, params, *, C, K, H, W, max_batch_block=8):
    """up = low * sigmoid(conv1(low) + conv2(low) + GMP(low))  (high=None path)."""
    PAD = C // 2
    if K != 2 * PAD + 1:
        raise ValueError(
            "FFAM requires kernel_size == 2*(low_channels//2) + 1 so that "
            "`low * up` is shape-compatible (got K=%d, C=%d)" % (K, C))
    N = low.shape[0]
    assert low.shape == (N, C, H, W)
    HW = H * W
    LPAD = ((PAD * W + 127) // 128) * 128                # zero band >= PAD*W, lane-aligned

    offs, n_params = _param_offsets(C, K)
    assert params.shape == (n_params,), (params.shape, n_params)

    # Batch block per grid step (amortizes per-step pipeline overhead).  Re-derive
    # against VMEM if C/H/W grow (v7x has half the VMEM of v5e/v6e); tiny here.
    NB = _pick_batch_block(N, max_batch_block)

    # Lane-dense views (free, contiguous reshapes in the wrapper).
    low_flat = low.reshape(N, C, HW).astype(jnp.float32)

    # Wrap-kill masks for W-direction taps: a flat shift by d = t-PAD mixes adjacent
    # rows; the mask zeroes the wrapped lane positions.
    col = jnp.arange(HW, dtype=jnp.int32) % W
    wmask = jnp.stack(
        [((col + (t - PAD) >= 0) & (col + (t - PAD) < W)).astype(jnp.float32)
         for t in range(K)], axis=0).reshape(K, 1, HW)

    kernel = functools.partial(ffam_kernel, NB=NB, C=C, K=K, PAD=PAD, H=H, W=W,
                               LPAD=LPAD, offs=offs)

    grid_spec = pltpu.PrefetchScalarGridSpec(
        num_scalar_prefetch=1,                           # params -> SMEM
        grid=(N // NB,),
        in_specs=[
            pl.BlockSpec((K, 1, HW), lambda n, p: (0, 0, 0)),    # masks (grid-invariant)
            pl.BlockSpec((NB, C, HW), lambda n, p: (n, 0, 0)),   # NB batch elems / step
        ],
        out_specs=pl.BlockSpec((NB, C, HW), lambda n, p: (n, 0, 0)),
        scratch_shapes=[
            pltpu.VMEM((NB, C, LPAD + HW + LPAD), jnp.float32),  # padded input
            pltpu.VMEM((NB, LPAD + HW + LPAD), jnp.float32),     # padded intermediate
        ],
    )

    out_flat = pl.pallas_call(
        kernel,
        out_shape=jax.ShapeDtypeStruct((N, C, HW), jnp.float32),
        grid_spec=grid_spec,
        compiler_params=pltpu.CompilerParams(
            dimension_semantics=("parallel",)),          # batch axis across TCs on v7x
    )(params, wmask, low_flat)
    return out_flat.reshape(N, C, H, W)


def ffam_reference(low, w1a, b1a, w1b, b1b, w2a, b2a, w2b, b2b, PAD):
    dn = ("NCHW", "OIHW", "NCHW")

    def conv(x, w, b, pad_hw):
        y = lax.conv_general_dilated(
            x, w, (1, 1),
            [(pad_hw[0], pad_hw[0]), (pad_hw[1], pad_hw[1])],
            dimension_numbers=dn)
        return y + b.reshape(1, -1, 1, 1)

    x1 = conv(conv(low, w1a, b1a, (0, PAD)), w1b, b1b, (PAD, 0))
    x2 = conv(conv(low, w2a, b2a, (PAD, 0)), w2b, b2b, (0, PAD))
    x = x1 + x2
    gmp = jnp.max(low, axis=(2, 3), keepdims=True)
    up = jax.nn.sigmoid(x + gmp)
    return low * up


if __name__ == "__main__":
    N, C, H, W = 2, 4, 16, 16          # low: (batch, low_channels, H, W)
    K = C + 1                          # kernel_size = 5 -> pad = C//2 = 2 keeps spatial size
    PAD = C // 2
    C2 = C // 2

    key = jax.random.PRNGKey(0)
    ks = jax.random.split(key, 10)
    w1a = jax.random.normal(ks[0], (C2, C, 1, K), jnp.float32) * 0.1
    b1a = jax.random.normal(ks[1], (C2,), jnp.float32) * 0.1
    w1b = jax.random.normal(ks[2], (1, C2, K, 1), jnp.float32) * 0.1
    b1b = jax.random.normal(ks[3], (1,), jnp.float32) * 0.1
    w2a = jax.random.normal(ks[4], (C2, C, K, 1), jnp.float32) * 0.1
    b2a = jax.random.normal(ks[5], (C2,), jnp.float32) * 0.1
    w2b = jax.random.normal(ks[6], (1, C2, 1, K), jnp.float32) * 0.1
    b2b = jax.random.normal(ks[7], (1,), jnp.float32) * 0.1
    low = jax.random.normal(ks[8], (N, C, H, W), jnp.float32)

    params = jnp.concatenate([
        w1a.ravel(), b1a, w1b.ravel(), b1b,
        w2a.ravel(), b2a, w2b.ravel(), b2b,
    ]).astype(jnp.float32)

    out = ffam_forward(low, params, C=C, K=K, H=H, W=W)
    out = jax.block_until_ready(out)

    ref = ffam_reference(low, w1a, b1a, w1b, b1b, w2a, b2a, w2b, b2b, PAD)
    assert out.shape == (N, C, H, W)
    err = float(jnp.max(jnp.abs(out - ref)))
    assert err < 2e-4, err

    print("KERNEL_OK")
</pallas_src>

<mosaic_0001>
module attributes {stable_mosaic.version = 11 : i64} {
  func.func @ffam_kernel(%arg0: i32, %arg1: memref<106xf32, #tpu.memory_space<smem>>, %arg2: memref<5x1x256xf32, #tpu.memory_space<vmem>>, %arg3: memref<2x4x256xf32, #tpu.memory_space<vmem>>, %arg4: memref<2x4x256xf32, #tpu.memory_space<vmem>>, %arg5: memref<2x4x512xf32, #tpu.memory_space<vmem>>, %arg6: memref<2x512xf32, #tpu.memory_space<vmem>>) attributes {dimension_semantics = [#tpu.dimension_semantics<parallel>], iteration_bounds = array<i64: 1>, scalar_prefetch = 1 : i64, scratch_operands = 2 : i64, tpu.core_type = #tpu.core_type<tc>, window_params = [{pipeline_mode = #tpu.pipeline_mode<synchronous>, transform_indices = @transform_0, window_bounds = array<i64: 5, 1, 256>}, {transform_indices = @transform_1, window_bounds = array<i64: 2, 4, 256>}, {transform_indices = @transform_2, window_bounds = array<i64: 2, 4, 256>}]} {
    %c0 = arith.constant 0 : index
    %c0_0 = arith.constant 0 : index
    %c0_1 = arith.constant 0 : index
    %0 = vector.load %arg3[%c0, %c0_0, %c0_1] : memref<2x4x256xf32, #tpu.memory_space<vmem>>, vector<2x4x256xf32>
    %c0_2 = arith.constant 0 : index
    %c0_3 = arith.constant 0 : index
    %c0_4 = arith.constant 0 : index
    %1 = vector.load %arg2[%c0_2, %c0_3, %c0_4] : memref<5x1x256xf32, #tpu.memory_space<vmem>>, vector<5x1x256xf32>
    %cst = arith.constant 0.000000e+00 : f32
    %2 = vector.broadcast %cst : f32 to vector<2x4x128xf32>
    %c0_5 = arith.constant 0 : index
    %c0_6 = arith.constant 0 : index
    %c0_7 = arith.constant 0 : index
    %3 = vector.load %arg5[%c0_5, %c0_6, %c0_7] : memref<2x4x512xf32, #tpu.memory_space<vmem>>, vector<2x4x128xf32>
    tpu.vector_store %arg5[%c0_5, %c0_6, %c0_7], %2 {strides = array<i32>} : memref<2x4x512xf32, #tpu.memory_space<vmem>>, vector<2x4x128xf32>,
    %cst_8 = arith.constant 0.000000e+00 : f32
    %4 = vector.broadcast %cst_8 : f32 to vector<2x4x128xf32>
    %c0_9 = arith.constant 0 : index
    %c0_10 = arith.constant 0 : index
    %c384 = arith.constant 384 : index
    %5 = vector.load %arg5[%c0_9, %c0_10, %c384] : memref<2x4x512xf32, #tpu.memory_space<vmem>>, vector<2x4x128xf32>
    tpu.vector_store %arg5[%c0_9, %c0_10, %c384], %4 {strides = array<i32>} : memref<2x4x512xf32, #tpu.memory_space<vmem>>, vector<2x4x128xf32>,
    %c0_11 = arith.constant 0 : index
    %c0_12 = arith.constant 0 : index
    %c128 = arith.constant 128 : index
    %6 = vector.load %arg5[%c0_11, %c0_12, %c128] : memref<2x4x512xf32, #tpu.memory_space<vmem>>, vector<2x4x256xf32>
    tpu.vector_store %arg5[%c0_11, %c0_12, %c128], %0 {strides = array<i32>} : memref<2x4x512xf32, #tpu.memory_space<vmem>>, vector<2x4x256xf32>,
    %cst_13 = arith.constant 0.000000e+00 : f32
    %7 = vector.broadcast %cst_13 : f32 to vector<2x128xf32>
    %c0_14 = arith.constant 0 : index
    %c0_15 = arith.constant 0 : index
    %8 = vector.load %arg6[%c0_14, %c0_15] : memref<2x512xf32, #tpu.memory_space<vmem>>, vector<2x128xf32>
    tpu.vector_store %arg6[%c0_14, %c0_15], %7 {strides = array<i32>} : memref<2x512xf32, #tpu.memory_space<vmem>>, vector<2x128xf32>,
    %cst_16 = arith.constant 0.000000e+00 : f32
    %9 = vector.broadcast %cst_16 : f32 to vector<2x128xf32>
    %c0_17 = arith.constant 0 : index
    %c384_18 = arith.constant 384 : index
    %10 = vector.load %arg6[%c0_17, %c384_18] : memref<2x512xf32, #tpu.memory_space<vmem>>, vector<2x128xf32>
    tpu.vector_store %arg6[%c0_17, %c384_18], %9 {strides = array<i32>} : memref<2x512xf32, #tpu.memory_space<vmem>>, vector<2x128xf32>,
    %c40 = arith.constant 40 : index
    %11 = memref.load %arg1[%c40] : memref<106xf32, #tpu.memory_space<smem>>
    %12 = vector.broadcast %11 : f32 to vector<2x256xf32>
    %c41 = arith.constant 41 : index
    %13 = memref.load %arg1[%c41] : memref<106xf32, #tpu.memory_space<smem>>
    %14 = vector.broadcast %13 : f32 to vector<2x256xf32>
    %c93 = arith.constant 93 : index
    %15 = memref.load %arg1[%c93] : memref<106xf32, #tpu.memory_space<smem>>
    %16 = vector.broadcast %15 : f32 to vector<2x256xf32>
    %c94 = arith.constant 94 : index
    %17 = memref.load %arg1[%c94] : memref<106xf32, #tpu.memory_space<smem>>
    %18 = vector.broadcast %17 : f32 to vector<2x256xf32>
    %19 = vector.extract_strided_slice %1 {offsets = [0, 0, 0], sizes = [1, 1, 256], strides = [1, 1, 1]} : vector<5x1x256xf32> to vector<1x1x256xf32>
    %20 = vector.shape_cast %19 : vector<1x1x256xf32> to vector<1x256xf32>
    %c0_19 = arith.constant 0 : index
    %c0_20 = arith.constant 0 : index
    %c126 = arith.constant 126 : index
    %21 = vector.load %arg5[%c0_19, %c0_20, %c126] : memref<2x4x512xf32, #tpu.memory_space<vmem>>, vector<2x1x256xf32>
    %22 = vector.shape_cast %21 : vector<2x1x256xf32> to vector<2x256xf32>
    %23 = vector.broadcast %20 : vector<1x256xf32> to vector<2x256xf32>
    %24 = arith.mulf %22, %23 : vector<2x256xf32>
    %c0_21 = arith.constant 0 : index
    %c0_22 = arith.constant 0 : index
    %c96 = arith.constant 96 : index
    %25 = vector.load %arg5[%c0_21, %c0_22, %c96] : memref<2x4x512xf32, #tpu.memory_space<vmem>>, vector<2x1x256xf32>
    %26 = vector.shape_cast %25 : vector<2x1x256xf32> to vector<2x256xf32>
    %c0_23 = arith.constant 0 : index
    %27 = memref.load %arg1[%c0_23] : memref<106xf32, #tpu.memory_space<smem>>
    %28 = vector.broadcast %27 : f32 to vector<2x256xf32>
    %29 = arith.mulf %28, %24 : vector<2x256xf32>
    %30 = arith.addf %12, %29 : vector<2x256xf32>
    %c53 = arith.constant 53 : index
    %31 = memref.load %arg1[%c53] : memref<106xf32, #tpu.memory_space<smem>>
    %32 = vector.broadcast %31 : f32 to vector<2x256xf32>
    %33 = arith.mulf %32, %26 : vector<2x256xf32>
    %34 = arith.addf %16, %33 : vector<2x256xf32>
    %c20 = arith.constant 20 : index
    %35 = memref.load %arg1[%c20] : memref<106xf32, #tpu.memory_space<smem>>
    %36 = vector.broadcast %35 : f32 to vector<2x256xf32>
    %37 = arith.mulf %36, %24 : vector<2x256xf32>
    %38 = arith.addf %14, %37 : vector<2x256xf32>
    %c73 = arith.constant 73 : index
    %39 = memref.load %arg1[%c73] : memref<106xf32, #tpu.memory_space<smem>>
    %40 = vector.broadcast %39 : f32 to vector<2x256xf32>
    %41 = arith.mulf %40, %26 : vector<2x256xf32>
    %42 = arith.addf %18, %41 : vector<2x256xf32>
    %c0_24 = arith.constant 0 : index
    %c1 = arith.constant 1 : index
    %c126_25 = arith.constant 126 : index
    %43 = vector.load %arg5[%c0_24, %c1, %c126_25] : memref<2x4x512xf32, #tpu.memory_space<vmem>>, vector<2x1x256xf32>
    %44 = vector.shape_cast %43 : vector<2x1x256xf32> to vector<2x256xf32>
    %45 = vector.broadcast %20 : vector<1x256xf32> to vector<2x256xf32>
    %46 = arith.mulf %44, %45 : vector<2x256xf32>
    %c0_26 = arith.constant 0 : index
    %c1_27 = arith.constant 1 : index
    %c96_28 = arith.constant 96 : index
    %47 = vector.load %arg5[%c0_26, %c1_27, %c96_28] : memref<2x4x512xf32, #tpu.memory_space<vmem>>, vector<2x1x256xf32>
    %48 = vector.shape_cast %47 : vector<2x1x256xf32> to vector<2x256xf32>
    %c5 = arith.constant 5 : index
    %49 = memref.load %arg1[%c5] : memref<106xf32, #tpu.memory_space<smem>>
    %50 = vector.broadcast %49 : f32 to vector<2x256xf32>
    %51 = arith.mulf %50, %46 : vector<2x256xf32>
    %52 = arith.addf %30, %51 : vector<2x256xf32>
    %c58 = arith.constant 58 : index
    %53 = memref.load %arg1[%c58] : memref<106xf32, #tpu.memory_space<smem>>
    %54 = vector.broadcast %53 : f32 to vector<2x256xf32>
    %55 = arith.mulf %54, %48 : vector<2x256xf32>
    %56 = arith.addf %34, %55 : vector<2x256xf32>
    %c25 = arith.constant 25 : index
    %57 = memref.load %arg1[%c25] : memref<106xf32, #tpu.memory_space<smem>>
    %58 = vector.broadcast %57 : f32 to vector<2x256xf32>
    %59 = arith.mulf %58, %46 : vector<2x256xf32>
    %60 = arith.addf %38, %59 : vector<2x256xf32>
    %c78 = arith.constant 78 : index
    %61 = memref.load %arg1[%c78] : memref<106xf32, #tpu.memory_space<smem>>
    %62 = vector.broadcast %61 : f32 to vector<2x256xf32>
    %63 = arith.mulf %62, %48 : vector<2x256xf32>
    %64 = arith.addf %42, %63 : vector<2x256xf32>
    %c0_29 = arith.constant 0 : index
    %c2 = arith.constant 2 : index
    %c126_30 = arith.constant 126 : index
    %65 = vector.load %arg5[%c0_29, %c2, %c126_30] : memref<2x4x512xf32, #tpu.memory_space<vmem>>, vector<2x1x256xf32>
    %66 = vector.shape_cast %65 : vector<2x1x256xf32> to vector<2x256xf32>
    %67 = vector.broadcast %20 : vector<1x256xf32> to vector<2x256xf32>
    %68 = arith.mulf %66, %67 : vector<2x256xf32>
    %c0_31 = arith.constant 0 : index
    %c2_32 = arith.constant 2 : index
    %c96_33 = arith.constant 96 : index
    %69 = vector.load %arg5[%c0_31, %c2_32, %c96_33] : memref<2x4x512xf32, #tpu.memory_space<vmem>>, vector<2x1x256xf32>
    %70 = vector.shape_cast %69 : vector<2x1x256xf32> to vector<2x256xf32>
    %c10 = arith.constant 10 : index
    %71 = memref.load %arg1[%c10] : memref<106xf32, #tpu.memory_space<smem>>
    %72 = vector.broadcast %71 : f32 to vector<2x256xf32>
    %73 = arith.mulf %72, %68 : vector<2x256xf32>
    %74 = arith.addf %52, %73 : vector<2x256xf32>
    %c63 = arith.constant 63 : index
    %75 = memref.load %arg1[%c63] : memref<106xf32, #tpu.memory_space<smem>>
    %76 = vector.broadcast %75 : f32 to vector<2x256xf32>
    %77 = arith.mulf %76, %70 : vector<2x256xf32>
    %78 = arith.addf %56, %77 : vector<2x256xf32>
    %c30 = arith.constant 30 : index
    %79 = memref.load %arg1[%c30] : memref<106xf32, #tpu.memory_space<smem>>
    %80 = vector.broadcast %79 : f32 to vector<2x256xf32>
    %81 = arith.mulf %80, %68 : vector<2x256xf32>
    %82 = arith.addf %60, %81 : vector<2x256xf32>
    %c83 = arith.constant 83 : index
    %83 = memref.load %arg1[%c83] : memref<106xf32, #tpu.memory_space<smem>>
    %84 = vector.broadcast %83 : f32 to vector<2x256xf32>
    %85 = arith.mulf %84, %70 : vector<2x256xf32>
    %86 = arith.addf %64, %85 : vector<2x256xf32>
    %c0_34 = arith.constant 0 : index
    %c3 = arith.constant 3 : index
    %c126_35 = arith.constant 126 : index
    %87 = vector.load %arg5[%c0_34, %c3, %c126_35] : memref<2x4x512xf32, #tpu.memory_space<vmem>>, vector<2x1x256xf32>
    %88 = vector.shape_cast %87 : vector<2x1x256xf32> to vector<2x256xf32>
    %89 = vector.broadcast %20 : vector<1x256xf32> to vector<2x256xf32>
    %90 = arith.mulf %88, %89 : vector<2x256xf32>
    %c0_36 = arith.constant 0 : index
    %c3_37 = arith.constant 3 : index
    %c96_38 = arith.constant 96 : index
    %91 = vector.load %arg5[%c0_36, %c3_37, %c96_38] : memref<2x4x512xf32, #tpu.memory_space<vmem>>, vector<2x1x256xf32>
    %92 = vector.shape_cast %91 : vector<2x1x256xf32> to vector<2x256xf32>
    %c15 = arith.constant 15 : index
    %93 = memref.load %arg1[%c15] : memref<106xf32, #tpu.memory_space<smem>>
    %94 = vector.broadcast %93 : f32 to vector<2x256xf32>
    %95 = arith.mulf %94, %90 : vector<2x256xf32>
    %96 = arith.addf %74, %95 : vector<2x256xf32>
    %c68 = arith.constant 68 : index
    %97 = memref.load %arg1[%c68] : memref<106xf32, #tpu.memory_space<smem>>
    %98 = vector.broadcast %97 : f32 to vector<2x256xf32>
    %99 = arith.mulf %98, %92 : vector<2x256xf32>
    %100 = arith.addf %78, %99 : vector<2x256xf32>
    %c35 = arith.constant 35 : index
    %101 = memref.load %arg1[%c35] : memref<106xf32, #tpu.memory_space<smem>>
    %102 = vector.broadcast %101 : f32 to vector<2x256xf32>
    %103 = arith.mulf %102, %90 : vector<2x256xf32>
    %104 = arith.addf %82, %103 : vector<2x256xf32>
    %c88 = arith.constant 88 : index
    %105 = memref.load %arg1[%c88] : memref<106xf32, #tpu.memory_space<smem>>
    %106 = vector.broadcast %105 : f32 to vector<2x256xf32>
    %107 = arith.mulf %106, %92 : vector<2x256xf32>
    %108 = arith.addf %86, %107 : vector<2x256xf32>
    %109 = vector.extract_strided_slice %1 {offsets = [1, 0, 0], sizes = [1, 1, 256], strides = [1, 1, 1]} : vector<5x1x256xf32> to vector<1x1x256xf32>
    %110 = vector.shape_cast %109 : vector<1x1x256xf32> to vector<1x256xf32>
    %c0_39 = arith.constant 0 : index
    %c0_40 = arith.constant 0 : index
    %c127 = arith.constant 127 : index
    %111 = vector.load %arg5[%c0_39, %c0_40, %c127] : memref<2x4x512xf32, #tpu.memory_space<vmem>>, vector<2x1x256xf32>
    %112 = vector.shape_cast %111 : vector<2x1x256xf32> to vector<2x256xf32>
    %113 = vector.broadcast %110 : vector<1x256xf32> to vector<2x256xf32>
    %114 = arith.mulf %112, %113 : vector<2x256xf32>
    %c0_41 = arith.constant 0 : index
    %c0_42 = arith.constant 0 : index
    %c112 = arith.constant 112 : index
    %115 = vector.load %arg5[%c0_41, %c0_42, %c112] : memref<2x4x512xf32, #tpu.memory_space<vmem>>, vector<2x1x256xf32>
    %116 = vector.shape_cast %115 : vector<2x1x256xf32> to vector<2x256xf32>
    %c1_43 = arith.constant 1 : index
    %117 = memref.load %arg1[%c1_43] : memref<106xf32, #tpu.memory_space<smem>>
    %118 = vector.broadcast %117 : f32 to vector<2x256xf32>
    %119 = arith.mulf %118, %114 : vector<2x256xf32>
    %120 = arith.addf %96, %119 : vector<2x256xf32>
    %c54 = arith.constant 54 : index
    %121 = memref.load %arg1[%c54] : memref<106xf32, #tpu.memory_space<smem>>
    %122 = vector.broadcast %121 : f32 to vector<2x256xf32>
    %123 = arith.mulf %122, %116 : vector<2x256xf32>
    %124 = arith.addf %100, %123 : vector<2x256xf32>
    %c21 = arith.constant 21 : index
    %125 = memref.load %arg1[%c21] : memref<106xf32, #tpu.memory_space<smem>>
    %126 = vector.broadcast %125 : f32 to vector<2x256xf32>
    %127 = arith.mulf %126, %114 : vector<2x256xf32>
    %128 = arith.addf %104, %127 : vector<2x256xf32>
    %c74 = arith.constant 74 : index
    %129 = memref.load %arg1[%c74] : memref<106xf32, #tpu.memory_space<smem>>
    %130 = vector.broadcast %129 : f32 to vector<2x256xf32>
    %131 = arith.mulf %130, %116 : vector<2x256xf32>
    %132 = arith.addf %108, %131 : vector<2x256xf32>
    %c0_44 = arith.constant 0 : index
    %c1_45 = arith.constant 1 : index
    %c127_46 = arith.constant 127 : index
    %133 = vector.load %arg5[%c0_44, %c1_45, %c127_46] : memref<2x4x512xf32, #tpu.memory_space<vmem>>, vector<2x1x256xf32>
    %134 = vector.shape_cast %133 : vector<2x1x256xf32> to vector<2x256xf32>
    %135 = vector.broadcast %110 : vector<1x256xf32> to vector<2x256xf32>
    %136 = arith.mulf %134, %135 : vector<2x256xf32>
    %c0_47 = arith.constant 0 : index
    %c1_48 = arith.constant 1 : index
    %c112_49 = arith.constant 112 : index
    %137 = vector.load %arg5[%c0_47, %c1_48, %c112_49] : memref<2x4x512xf32, #tpu.memory_space<vmem>>, vector<2x1x256xf32>
    %138 = vector.shape_cast %137 : vector<2x1x256xf32> to vector<2x256xf32>
    %c6 = arith.constant 6 : index
    %139 = memref.load %arg1[%c6] : memref<106xf32, #tpu.memory_space<smem>>
    %140 = vector.broadcast %139 : f32 to vector<2x256xf32>
    %141 = arith.mulf %140, %136 : vector<2x256xf32>
    %142 = arith.addf %120, %141 : vector<2x256xf32>
    %c59 = arith.constant 59 : index
    %143 = memref.load %arg1[%c59] : memref<106xf32, #tpu.memory_space<smem>>
    %144 = vector.broadcast %143 : f32 to vector<2x256xf32>
    %145 = arith.mulf %144, %138 : vector<2x256xf32>
    %146 = arith.addf %124, %145 : vector<2x256xf32>
    %c26 = arith.constant 26 : index
    %147 = memref.load %arg1[%c26] : memref<106xf32, #tpu.memory_space<smem>>
    %148 = vector.broadcast %147 : f32 to vector<2x256xf32>
    %149 = arith.mulf %148, %136 : vector<2x256xf32>
    %150 = arith.addf %128, %149 : vector<2x256xf32>
    %c79 = arith.constant 79 : index
    %151 = memref.load %arg1[%c79] : memref<106xf32, #tpu.memory_space<smem>>
    %152 = vector.broadcast %151 : f32 to vector<2x256xf32>
    %153 = arith.mulf %152, %138 : vector<2x256xf32>
    %154 = arith.addf %132, %153 : vector<2x256xf32>
    %c0_50 = arith.constant 0 : index
    %c2_51 = arith.constant 2 : index
    %c127_52 = arith.constant 127 : index
    %155 = vector.load %arg5[%c0_50, %c2_51, %c127_52] : memref<2x4x512xf32, #tpu.memory_space<vmem>>, vector<2x1x256xf32>
    %156 = vector.shape_cast %155 : vector<2x1x256xf32> to vector<2x256xf32>
    %157 = vector.broadcast %110 : vector<1x256xf32> to vector<2x256xf32>
    %158 = arith.mulf %156, %157 : vector<2x256xf32>
    %c0_53 = arith.constant 0 : index
    %c2_54 = arith.constant 2 : index
    %c112_55 = arith.constant 112 : index
    %159 = vector.load %arg5[%c0_53, %c2_54, %c112_55] : memref<2x4x512xf32, #tpu.memory_space<vmem>>, vector<2x1x256xf32>
    %160 = vector.shape_cast %159 : vector<2x1x256xf32> to vector<2x256xf32>
    %c11 = arith.constant 11 : index
    %161 = memref.load %arg1[%c11] : memref<106xf32, #tpu.memory_space<smem>>
    %162 = vector.broadcast %161 : f32 to vector<2x256xf32>
    %163 = arith.mulf %162, %158 : vector<2x256xf32>
    %164 = arith.addf %142, %163 : vector<2x256xf32>
    %c64 = arith.constant 64 : index
    %165 = memref.load %arg1[%c64] : memref<106xf32, #tpu.memory_space<smem>>
    %166 = vector.broadcast %165 : f32 to vector<2x256xf32>
    %167 = arith.mulf %166, %160 : vector<2x256xf32>
    %168 = arith.addf %146, %167 : vector<2x256xf32>
    %c31 = arith.constant 31 : index
    %169 = memref.load %arg1[%c31] : memref<106xf32, #tpu.memory_space<smem>>
    %170 = vector.broadcast %169 : f32 to vector<2x256xf32>
    %171 = arith.mulf %170, %158 : vector<2x256xf32>
    %172 = arith.addf %150, %171 : vector<2x256xf32>
    %c84 = arith.constant 84 : index
    %173 = memref.load %arg1[%c84] : memref<106xf32, #tpu.memory_space<smem>>
    %174 = vector.broadcast %173 : f32 to vector<2x256xf32>
    %175 = arith.mulf %174, %160 : vector<2x256xf32>
    %176 = arith.addf %154, %175 : vector<2x256xf32>
    %c0_56 = arith.constant 0 : index
    %c3_57 = arith.constant 3 : index
    %c127_58 = arith.constant 127 : index
    %177 = vector.load %arg5[%c0_56, %c3_57, %c127_58] : memref<2x4x512xf32, #tpu.memory_space<vmem>>, vector<2x1x256xf32>
    %178 = vector.shape_cast %177 : vector<2x1x256xf32> to vector<2x256xf32>
    %179 = vector.broadcast %110 : vector<1x256xf32> to vector<2x256xf32>
    %180 = arith.mulf %178, %179 : vector<2x256xf32>
    %c0_59 = arith.constant 0 : index
    %c3_60 = arith.constant 3 : index
    %c112_61 = arith.constant 112 : index
    %181 = vector.load %arg5[%c0_59, %c3_60, %c112_61] : memref<2x4x512xf32, #tpu.memory_space<vmem>>, vector<2x1x256xf32>
    %182 = vector.shape_cast %181 : vector<2x1x256xf32> to vector<2x256xf32>
    %c16 = arith.constant 16 : index
    %183 = memref.load %arg1[%c16] : memref<106xf32, #tpu.memory_space<smem>>
    %184 = vector.broadcast %183 : f32 to vector<2x256xf32>
    %185 = arith.mulf %184, %180 : vector<2x256xf32>
    %186 = arith.addf %164, %185 : vector<2x256xf32>
    %c69 = arith.constant 69 : index
    %187 = memref.load %arg1[%c69] : memref<106xf32, #tpu.memory_space<smem>>
    %188 = vector.broadcast %187 : f32 to vector<2x256xf32>
    %189 = arith.mulf %188, %182 : vector<2x256xf32>
    %190 = arith.addf %168, %189 : vector<2x256xf32>
    %c36 = arith.constant 36 : index
    %191 = memref.load %arg1[%c36] : memref<106xf32, #tpu.memory_space<smem>>
    %192 = vector.broadcast %191 : f32 to vector<2x256xf32>
    %193 = arith.mulf %192, %180 : vector<2x256xf32>
    %194 = arith.addf %172, %193 : vector<2x256xf32>
    %c89 = arith.constant 89 : index
    %195 = memref.load %arg1[%c89] : memref<106xf32, #tpu.memory_space<smem>>
    %196 = vector.broadcast %195 : f32 to vector<2x256xf32>
    %197 = arith.mulf %196, %182 : vector<2x256xf32>
    %198 = arith.addf %176, %197 : vector<2x256xf32>
    %c0_62 = arith.constant 0 : index
    %c0_63 = arith.constant 0 : index
    %c128_64 = arith.constant 128 : index
    %199 = vector.load %arg5[%c0_62, %c0_63, %c128_64] : memref<2x4x512xf32, #tpu.memory_space<vmem>>, vector<2x1x256xf32>
    %200 = vector.shape_cast %199 : vector<2x1x256xf32> to vector<2x256xf32>
    %c0_65 = arith.constant 0 : index
    %c0_66 = arith.constant 0 : index
    %c128_67 = arith.constant 128 : index
    %201 = vector.load %arg5[%c0_65, %c0_66, %c128_67] : memref<2x4x512xf32, #tpu.memory_space<vmem>>, vector<2x1x256xf32>
    %202 = vector.shape_cast %201 : vector<2x1x256xf32> to vector<2x256xf32>
    %c2_68 = arith.constant 2 : index
    %203 = memref.load %arg1[%c2_68] : memref<106xf32, #tpu.memory_space<smem>>
    %204 = vector.broadcast %203 : f32 to vector<2x256xf32>
    %205 = arith.mulf %204, %200 : vector<2x256xf32>
    %206 = arith.addf %186, %205 : vector<2x256xf32>
    %c55 = arith.constant 55 : index
    %207 = memref.load %arg1[%c55] : memref<106xf32, #tpu.memory_space<smem>>
    %208 = vector.broadcast %207 : f32 to vector<2x256xf32>
    %209 = arith.mulf %208, %202 : vector<2x256xf32>
    %210 = arith.addf %190, %209 : vector<2x256xf32>
    %c22 = arith.constant 22 : index
    %211 = memref.load %arg1[%c22] : memref<106xf32, #tpu.memory_space<smem>>
    %212 = vector.broadcast %211 : f32 to vector<2x256xf32>
    %213 = arith.mulf %212, %200 : vector<2x256xf32>
    %214 = arith.addf %194, %213 : vector<2x256xf32>
    %c75 = arith.constant 75 : index
    %215 = memref.load %arg1[%c75] : memref<106xf32, #tpu.memory_space<smem>>
    %216 = vector.broadcast %215 : f32 to vector<2x256xf32>
    %217 = arith.mulf %216, %202 : vector<2x256xf32>
    %218 = arith.addf %198, %217 : vector<2x256xf32>
    %c0_69 = arith.constant 0 : index
    %c1_70 = arith.constant 1 : index
    %c128_71 = arith.constant 128 : index
    %219 = vector.load %arg5[%c0_69, %c1_70, %c128_71] : memref<2x4x512xf32, #tpu.memory_space<vmem>>, vector<2x1x256xf32>
    %220 = vector.shape_cast %219 : vector<2x1x256xf32> to vector<2x256xf32>
    %c0_72 = arith.constant 0 : index
    %c1_73 = arith.constant 1 : index
    %c128_74 = arith.constant 128 : index
    %221 = vector.load %arg5[%c0_72, %c1_73, %c128_74] : memref<2x4x512xf32, #tpu.memory_space<vmem>>, vector<2x1x256xf32>
    %222 = vector.shape_cast %221 : vector<2x1x256xf32> to vector<2x256xf32>
    %c7 = arith.constant 7 : index
    %223 = memref.load %arg1[%c7] : memref<106xf32, #tpu.memory_space<smem>>
    %224 = vector.broadcast %223 : f32 to vector<2x256xf32>
    %225 = arith.mulf %224, %220 : vector<2x256xf32>
    %226 = arith.addf %206, %225 : vector<2x256xf32>
    %c60 = arith.constant 60 : index
    %227 = memref.load %arg1[%c60] : memref<106xf32, #tpu.memory_space<smem>>
    %228 = vector.broadcast %227 : f32 to vector<2x256xf32>
    %229 = arith.mulf %228, %222 : vector<2x256xf32>
    %230 = arith.addf %210, %229 : vector<2x256xf32>
    %c27 = arith.constant 27 : index
    %231 = memref.load %arg1[%c27] : memref<106xf32, #tpu.memory_space<smem>>
    %232 = vector.broadcast %231 : f32 to vector<2x256xf32>
    %233 = arith.mulf %232, %220 : vector<2x256xf32>
    %234 = arith.addf %214, %233 : vector<2x256xf32>
    %c80 = arith.constant 80 : index
    %235 = memref.load %arg1[%c80] : memref<106xf32, #tpu.memory_space<smem>>
    %236 = vector.broadcast %235 : f32 to vector<2x256xf32>
    %237 = arith.mulf %236, %222 : vector<2x256xf32>
    %238 = arith.addf %218, %237 : vector<2x256xf32>
    %c0_75 = arith.constant 0 : index
    %c2_76 = arith.constant 2 : index
    %c128_77 = arith.constant 128 : index
    %239 = vector.load %arg5[%c0_75, %c2_76, %c128_77] : memref<2x4x512xf32, #tpu.memory_space<vmem>>, vector<2x1x256xf32>
    %240 = vector.shape_cast %239 : vector<2x1x256xf32> to vector<2x256xf32>
    %c0_78 = arith.constant 0 : index
    %c2_79 = arith.constant 2 : index
    %c128_80 = arith.constant 128 : index
    %241 = vector.load %arg5[%c0_78, %c2_79, %c128_80] : memref<2x4x512xf32, #tpu.memory_space<vmem>>, vector<2x1x256xf32>
    %242 = vector.shape_cast %241 : vector<2x1x256xf32> to vector<2x256xf32>
    %c12 = arith.constant 12 : index
    %243 = memref.load %arg1[%c12] : memref<106xf32, #tpu.memory_space<smem>>
    %244 = vector.broadcast %243 : f32 to vector<2x256xf32>
    %245 = arith.mulf %244, %240 : vector<2x256xf32>
    %246 = arith.addf %226, %245 : vector<2x256xf32>
    %c65 = arith.constant 65 : index
    %247 = memref.load %arg1[%c65] : memref<106xf32, #tpu.memory_space<smem>>
    %248 = vector.broadcast %247 : f32 to vector<2x256xf32>
    %249 = arith.mulf %248, %242 : vector<2x256xf32>
    %250 = arith.addf %230, %249 : vector<2x256xf32>
    %c32 = arith.constant 32 : index
    %251 = memref.load %arg1[%c32] : memref<106xf32, #tpu.memory_space<smem>>
    %252 = vector.broadcast %251 : f32 to vector<2x256xf32>
    %253 = arith.mulf %252, %240 : vector<2x256xf32>
    %254 = arith.addf %234, %253 : vector<2x256xf32>
    %c85 = arith.constant 85 : index
    %255 = memref.load %arg1[%c85] : memref<106xf32, #tpu.memory_space<smem>>
    %256 = vector.broadcast %255 : f32 to vector<2x256xf32>
    %257 = arith.mulf %256, %242 : vector<2x256xf32>
    %258 = arith.addf %238, %257 : vector<2x256xf32>
    %c0_81 = arith.constant 0 : index
    %c3_82 = arith.constant 3 : index
    %c128_83 = arith.constant 128 : index
    %259 = vector.load %arg5[%c0_81, %c3_82, %c128_83] : memref<2x4x512xf32, #tpu.memory_space<vmem>>, vector<2x1x256xf32>
    %260 = vector.shape_cast %259 : vector<2x1x256xf32> to vector<2x256xf32>
    %c0_84 = arith.constant 0 : index
    %c3_85 = arith.constant 3 : index
    %c128_86 = arith.constant 128 : index
    %261 = vector.load %arg5[%c0_84, %c3_85, %c128_86] : memref<2x4x512xf32, #tpu.memory_space<vmem>>, vector<2x1x256xf32>
    %262 = vector.shape_cast %261 : vector<2x1x256xf32> to vector<2x256xf32>
    %c17 = arith.constant 17 : index
    %263 = memref.load %arg1[%c17] : memref<106xf32, #tpu.memory_space<smem>>
    %264 = vector.broadcast %263 : f32 to vector<2x256xf32>
    %265 = arith.mulf %264, %260 : vector<2x256xf32>
    %266 = arith.addf %246, %265 : vector<2x256xf32>
    %c70 = arith.constant 70 : index
    %267 = memref.load %arg1[%c70] : memref<106xf32, #tpu.memory_space<smem>>
    %268 = vector.broadcast %267 : f32 to vector<2x256xf32>
    %269 = arith.mulf %268, %262 : vector<2x256xf32>
    %270 = arith.addf %250, %269 : vector<2x256xf32>
    %c37 = arith.constant 37 : index
    %271 = memref.load %arg1[%c37] : memref<106xf32, #tpu.memory_space<smem>>
    %272 = vector.broadcast %271 : f32 to vector<2x256xf32>
    %273 = arith.mulf %272, %260 : vector<2x256xf32>
    %274 = arith.addf %254, %273 : vector<2x256xf32>
    %c90 = arith.constant 90 : index
    %275 = memref.load %arg1[%c90] : memref<106xf32, #tpu.memory_space<smem>>
    %276 = vector.broadcast %275 : f32 to vector<2x256xf32>
    %277 = arith.mulf %276, %262 : vector<2x256xf32>
    %278 = arith.addf %258, %277 : vector<2x256xf32>
    %279 = vector.extract_strided_slice %1 {offsets = [3, 0, 0], sizes = [1, 1, 256], strides = [1, 1, 1]} : vector<5x1x256xf32> to vector<1x1x256xf32>
    %280 = vector.shape_cast %279 : vector<1x1x256xf32> to vector<1x256xf32>
    %c0_87 = arith.constant 0 : index
    %c0_88 = arith.constant 0 : index
    %c129 = arith.constant 129 : index
    %281 = vector.load %arg5[%c0_87, %c0_88, %c129] : memref<2x4x512xf32, #tpu.memory_space<vmem>>, vector<2x1x256xf32>
    %282 = vector.shape_cast %281 : vector<2x1x256xf32> to vector<2x256xf32>
    %283 = vector.broadcast %280 : vector<1x256xf32> to vector<2x256xf32>
    %284 = arith.mulf %282, %283 : vector<2x256xf32>
    %c0_89 = arith.constant 0 : index
    %c0_90 = arith.constant 0 : index
    %c144 = arith.constant 144 : index
    %285 = vector.load %arg5[%c0_89, %c0_90, %c144] : memref<2x4x512xf32, #tpu.memory_space<vmem>>, vector<2x1x256xf32>
    %286 = vector.shape_cast %285 : vector<2x1x256xf32> to vector<2x256xf32>
    %c3_91 = arith.constant 3 : index
    %287 = memref.load %arg1[%c3_91] : memref<106xf32, #tpu.memory_space<smem>>
    %288 = vector.broadcast %287 : f32 to vector<2x256xf32>
    %289 = arith.mulf %288, %284 : vector<2x256xf32>
    %290 = arith.addf %266, %289 : vector<2x256xf32>
    %c56 = arith.constant 56 : index
    %291 = memref.load %arg1[%c56] : memref<106xf32, #tpu.memory_space<smem>>
    %292 = vector.broadcast %291 : f32 to vector<2x256xf32>
    %293 = arith.mulf %292, %286 : vector<2x256xf32>
    %294 = arith.addf %270, %293 : vector<2x256xf32>
    %c23 = arith.constant 23 : index
    %295 = memref.load %arg1[%c23] : memref<106xf32, #tpu.memory_space<smem>>
    %296 = vector.broadcast %295 : f32 to vector<2x256xf32>
    %297 = arith.mulf %296, %284 : vector<2x256xf32>
    %298 = arith.addf %274, %297 : vector<2x256xf32>
    %c76 = arith.constant 76 : index
    %299 = memref.load %arg1[%c76] : memref<106xf32, #tpu.memory_space<smem>>
    %300 = vector.broadcast %299 : f32 to vector<2x256xf32>
    %301 = arith.mulf %300, %286 : vector<2x256xf32>
    %302 = arith.addf %278, %301 : vector<2x256xf32>
    %c0_92 = arith.constant 0 : index
    %c1_93 = arith.constant 1 : index
    %c129_94 = arith.constant 129 : index
    %303 = vector.load %arg5[%c0_92, %c1_93, %c129_94] : memref<2x4x512xf32, #tpu.memory_space<vmem>>, vector<2x1x256xf32>
    %304 = vector.shape_cast %303 : vector<2x1x256xf32> to vector<2x256xf32>
    %305 = vector.broadcast %280 : vector<1x256xf32> to vector<2x256xf32>
    %306 = arith.mulf %304, %305 : vector<2x256xf32>
    %c0_95 = arith.constant 0 : index
    %c1_96 = arith.constant 1 : index
    %c144_97 = arith.constant 144 : index
    %307 = vector.load %arg5[%c0_95, %c1_96, %c144_97] : memref<2x4x512xf32, #tpu.memory_space<vmem>>, vector<2x1x256xf32>
    %308 = vector.shape_cast %307 : vector<2x1x256xf32> to vector<2x256xf32>
    %c8 = arith.constant 8 : index
    %309 = memref.load %arg1[%c8] : memref<106xf32, #tpu.memory_space<smem>>
    %310 = vector.broadcast %309 : f32 to vector<2x256xf32>
    %311 = arith.mulf %310, %306 : vector<2x256xf32>
    %312 = arith.addf %290, %311 : vector<2x256xf32>
    %c61 = arith.constant 61 : index
    %313 = memref.load %arg1[%c61] : memref<106xf32, #tpu.memory_space<smem>>
    %314 = vector.broadcast %313 : f32 to vector<2x256xf32>
    %315 = arith.mulf %314, %308 : vector<2x256xf32>
    %316 = arith.addf %294, %315 : vector<2x256xf32>
    %c28 = arith.constant 28 : index
    %317 = memref.load %arg1[%c28] : memref<106xf32, #tpu.memory_space<smem>>
    %318 = vector.broadcast %317 : f32 to vector<2x256xf32>
    %319 = arith.mulf %318, %306 : vector<2x256xf32>
    %320 = arith.addf %298, %319 : vector<2x256xf32>
    %c81 = arith.constant 81 : index
    %321 = memref.load %arg1[%c81] : memref<106xf32, #tpu.memory_space<smem>>
    %322 = vector.broadcast %321 : f32 to vector<2x256xf32>
    %323 = arith.mulf %322, %308 : vector<2x256xf32>
    %324 = arith.addf %302, %323 : vector<2x256xf32>
    %c0_98 = arith.constant 0 : index
    %c2_99 = arith.constant 2 : index
    %c129_100 = arith.constant 129 : index
    %325 = vector.load %arg5[%c0_98, %c2_99, %c129_100] : memref<2x4x512xf32, #tpu.memory_space<vmem>>, vector<2x1x256xf32>
    %326 = vector.shape_cast %325 : vector<2x1x256xf32> to vector<2x256xf32>
    %327 = vector.broadcast %280 : vector<1x256xf32> to vector<2x256xf32>
    %328 = arith.mulf %326, %327 : vector<2x256xf32>
    %c0_101 = arith.constant 0 : index
    %c2_102 = arith.constant 2 : index
    %c144_103 = arith.constant 144 : index
    %329 = vector.load %arg5[%c0_101, %c2_102, %c144_103] : memref<2x4x512xf32, #tpu.memory_space<vmem>>, vector<2x1x256xf32>
    %330 = vector.shape_cast %329 : vector<2x1x256xf32> to vector<2x256xf32>
    %c13 = arith.constant 13 : index
    %331 = memref.load %arg1[%c13] : memref<106xf32, #tpu.memory_space<smem>>
    %332 = vector.broadcast %331 : f32 to vector<2x256xf32>
    %333 = arith.mulf %332, %328 : vector<2x256xf32>
    %334 = arith.addf %312, %333 : vector<2x256xf32>
    %c66 = arith.constant 66 : index
    %335 = memref.load %arg1[%c66] : memref<106xf32, #tpu.memory_space<smem>>
    %336 = vector.broadcast %335 : f32 to vector<2x256xf32>
    %337 = arith.mulf %336, %330 : vector<2x256xf32>
    %338 = arith.addf %316, %337 : vector<2x256xf32>
    %c33 = arith.constant 33 : index
    %339 = memref.load %arg1[%c33] : memref<106xf32, #tpu.memory_space<smem>>
    %340 = vector.broadcast %339 : f32 to vector<2x256xf32>
    %341 = arith.mulf %340, %328 : vector<2x256xf32>
    %342 = arith.addf %320, %341 : vector<2x256xf32>
    %c86 = arith.constant 86 : index
    %343 = memref.load %arg1[%c86] : memref<106xf32, #tpu.memory_space<smem>>
    %344 = vector.broadcast %343 : f32 to vector<2x256xf32>
    %345 = arith.mulf %344, %330 : vector<2x256xf32>
    %346 = arith.addf %324, %345 : vector<2x256xf32>
    %c0_104 = arith.constant 0 : index
    %c3_105 = arith.constant 3 : index
    %c129_106 = arith.constant 129 : index
    %347 = vector.load %arg5[%c0_104, %c3_105, %c129_106] : memref<2x4x512xf32, #tpu.memory_space<vmem>>, vector<2x1x256xf32>
    %348 = vector.shape_cast %347 : vector<2x1x256xf32> to vector<2x256xf32>
    %349 = vector.broadcast %280 : vector<1x256xf32> to vector<2x256xf32>
    %350 = arith.mulf %348, %349 : vector<2x256xf32>
    %c0_107 = arith.constant 0 : index
    %c3_108 = arith.constant 3 : index
    %c144_109 = arith.constant 144 : index
    %351 = vector.load %arg5[%c0_107, %c3_108, %c144_109] : memref<2x4x512xf32, #tpu.memory_space<vmem>>, vector<2x1x256xf32>
    %352 = vector.shape_cast %351 : vector<2x1x256xf32> to vector<2x256xf32>
    %c18 = arith.constant 18 : index
    %353 = memref.load %arg1[%c18] : memref<106xf32, #tpu.memory_space<smem>>
    %354 = vector.broadcast %353 : f32 to vector<2x256xf32>
    %355 = arith.mulf %354, %350 : vector<2x256xf32>
    %356 = arith.addf %334, %355 : vector<2x256xf32>
    %c71 = arith.constant 71 : index
    %357 = memref.load %arg1[%c71] : memref<106xf32, #tpu.memory_space<smem>>
    %358 = vector.broadcast %357 : f32 to vector<2x256xf32>
    %359 = arith.mulf %358, %352 : vector<2x256xf32>
    %360 = arith.addf %338, %359 : vector<2x256xf32>
    %c38 = arith.constant 38 : index
    %361 = memref.load %arg1[%c38] : memref<106xf32, #tpu.memory_space<smem>>
    %362 = vector.broadcast %361 : f32 to vector<2x256xf32>
    %363 = arith.mulf %362, %350 : vector<2x256xf32>
    %364 = arith.addf %342, %363 : vector<2x256xf32>
    %c91 = arith.constant 91 : index
    %365 = memref.load %arg1[%c91] : memref<106xf32, #tpu.memory_space<smem>>
    %366 = vector.broadcast %365 : f32 to vector<2x256xf32>
    %367 = arith.mulf %366, %352 : vector<2x256xf32>
    %368 = arith.addf %346, %367 : vector<2x256xf32>
    %369 = vector.extract_strided_slice %1 {offsets = [4, 0, 0], sizes = [1, 1, 256], strides = [1, 1, 1]} : vector<5x1x256xf32> to vector<1x1x256xf32>
    %370 = vector.shape_cast %369 : vector<1x1x256xf32> to vector<1x256xf32>
    %c0_110 = arith.constant 0 : index
    %c0_111 = arith.constant 0 : index
    %c130 = arith.constant 130 : index
    %371 = vector.load %arg5[%c0_110, %c0_111, %c130] : memref<2x4x512xf32, #tpu.memory_space<vmem>>, vector<2x1x256xf32>
    %372 = vector.shape_cast %371 : vector<2x1x256xf32> to vector<2x256xf32>
    %373 = vector.broadcast %370 : vector<1x256xf32> to vector<2x256xf32>
    %374 = arith.mulf %372, %373 : vector<2x256xf32>
    %c0_112 = arith.constant 0 : index
    %c0_113 = arith.constant 0 : index
    %c160 = arith.constant 160 : index
    %375 = vector.load %arg5[%c0_112, %c0_113, %c160] : memref<2x4x512xf32, #tpu.memory_space<vmem>>, vector<2x1x256xf32>
    %376 = vector.shape_cast %375 : vector<2x1x256xf32> to vector<2x256xf32>
    %c4 = arith.constant 4 : index
    %377 = memref.load %arg1[%c4] : memref<106xf32, #tpu.memory_space<smem>>
    %378 = vector.broadcast %377 : f32 to vector<2x256xf32>
    %379 = arith.mulf %378, %374 : vector<2x256xf32>
    %380 = arith.addf %356, %379 : vector<2x256xf32>
    %c57 = arith.constant 57 : index
    %381 = memref.load %arg1[%c57] : memref<106xf32, #tpu.memory_space<smem>>
    %382 = vector.broadcast %381 : f32 to vector<2x256xf32>
    %383 = arith.mulf %382, %376 : vector<2x256xf32>
    %384 = arith.addf %360, %383 : vector<2x256xf32>
    %c24 = arith.constant 24 : index
    %385 = memref.load %arg1[%c24] : memref<106xf32, #tpu.memory_space<smem>>
    %386 = vector.broadcast %385 : f32 to vector<2x256xf32>
    %387 = arith.mulf %386, %374 : vector<2x256xf32>
    %388 = arith.addf %364, %387 : vector<2x256xf32>
    %c77 = arith.constant 77 : index
    %389 = memref.load %arg1[%c77] : memref<106xf32, #tpu.memory_space<smem>>
    %390 = vector.broadcast %389 : f32 to vector<2x256xf32>
    %391 = arith.mulf %390, %376 : vector<2x256xf32>
    %392 = arith.addf %368, %391 : vector<2x256xf32>
    %c0_114 = arith.constant 0 : index
    %c1_115 = arith.constant 1 : index
    %c130_116 = arith.constant 130 : index
    %393 = vector.load %arg5[%c0_114, %c1_115, %c130_116] : memref<2x4x512xf32, #tpu.memory_space<vmem>>, vector<2x1x256xf32>
    %394 = vector.shape_cast %393 : vector<2x1x256xf32> to vector<2x256xf32>
    %395 = vector.broadcast %370 : vector<1x256xf32> to vector<2x256xf32>
    %396 = arith.mulf %394, %395 : vector<2x256xf32>
    %c0_117 = arith.constant 0 : index
    %c1_118 = arith.constant 1 : index
    %c160_119 = arith.constant 160 : index
    %397 = vector.load %arg5[%c0_117, %c1_118, %c160_119] : memref<2x4x512xf32, #tpu.memory_space<vmem>>, vector<2x1x256xf32>
    %398 = vector.shape_cast %397 : vector<2x1x256xf32> to vector<2x256xf32>
    %c9 = arith.constant 9 : index
    %399 = memref.load %arg1[%c9] : memref<106xf32, #tpu.memory_space<smem>>
    %400 = vector.broadcast %399 : f32 to vector<2x256xf32>
    %401 = arith.mulf %400, %396 : vector<2x256xf32>
    %402 = arith.addf %380, %401 : vector<2x256xf32>
    %c62 = arith.constant 62 : index
    %403 = memref.load %arg1[%c62] : memref<106xf32, #tpu.memory_space<smem>>
    %404 = vector.broadcast %403 : f32 to vector<2x256xf32>
    %405 = arith.mulf %404, %398 : vector<2x256xf32>
    %406 = arith.addf %384, %405 : vector<2x256xf32>
    %c29 = arith.constant 29 : index
    %407 = memref.load %arg1[%c29] : memref<106xf32, #tpu.memory_space<smem>>
    %408 = vector.broadcast %407 : f32 to vector<2x256xf32>
    %409 = arith.mulf %408, %396 : vector<2x256xf32>
    %410 = arith.addf %388, %409 : vector<2x256xf32>
    %c82 = arith.constant 82 : index
    %411 = memref.load %arg1[%c82] : memref<106xf32, #tpu.memory_space<smem>>
    %412 = vector.broadcast %411 : f32 to vector<2x256xf32>
    %413 = arith.mulf %412, %398 : vector<2x256xf32>
    %414 = arith.addf %392, %413 : vector<2x256xf32>
    %c0_120 = arith.constant 0 : index
    %c2_121 = arith.constant 2 : index
    %c130_122 = arith.constant 130 : index
    %415 = vector.load %arg5[%c0_120, %c2_121, %c130_122] : memref<2x4x512xf32, #tpu.memory_space<vmem>>, vector<2x1x256xf32>
    %416 = vector.shape_cast %415 : vector<2x1x256xf32> to vector<2x256xf32>
    %417 = vector.broadcast %370 : vector<1x256xf32> to vector<2x256xf32>
    %418 = arith.mulf %416, %417 : vector<2x256xf32>
    %c0_123 = arith.constant 0 : index
    %c2_124 = arith.constant 2 : index
    %c160_125 = arith.constant 160 : index
    %419 = vector.load %arg5[%c0_123, %c2_124, %c160_125] : memref<2x4x512xf32, #tpu.memory_space<vmem>>, vector<2x1x256xf32>
    %420 = vector.shape_cast %419 : vector<2x1x256xf32> to vector<2x256xf32>
    %c14 = arith.constant 14 : index
    %421 = memref.load %arg1[%c14] : memref<106xf32, #tpu.memory_space<smem>>
    %422 = vector.broadcast %421 : f32 to vector<2x256xf32>
    %423 = arith.mulf %422, %418 : vector<2x256xf32>
    %424 = arith.addf %402, %423 : vector<2x256xf32>
    %c67 = arith.constant 67 : index
    %425 = memref.load %arg1[%c67] : memref<106xf32, #tpu.memory_space<smem>>
    %426 = vector.broadcast %425 : f32 to vector<2x256xf32>
    %427 = arith.mulf %426, %420 : vector<2x256xf32>
    %428 = arith.addf %406, %427 : vector<2x256xf32>
    %c34 = arith.constant 34 : index
    %429 = memref.load %arg1[%c34] : memref<106xf32, #tpu.memory_space<smem>>
    %430 = vector.broadcast %429 : f32 to vector<2x256xf32>
    %431 = arith.mulf %430, %418 : vector<2x256xf32>
    %432 = arith.addf %410, %431 : vector<2x256xf32>
    %c87 = arith.constant 87 : index
    %433 = memref.load %arg1[%c87] : memref<106xf32, #tpu.memory_space<smem>>
    %434 = vector.broadcast %433 : f32 to vector<2x256xf32>
    %435 = arith.mulf %434, %420 : vector<2x256xf32>
    %436 = arith.addf %414, %435 : vector<2x256xf32>
    %c0_126 = arith.constant 0 : index
    %c3_127 = arith.constant 3 : index
    %c130_128 = arith.constant 130 : index
    %437 = vector.load %arg5[%c0_126, %c3_127, %c130_128] : memref<2x4x512xf32, #tpu.memory_space<vmem>>, vector<2x1x256xf32>
    %438 = vector.shape_cast %437 : vector<2x1x256xf32> to vector<2x256xf32>
    %439 = vector.broadcast %370 : vector<1x256xf32> to vector<2x256xf32>
    %440 = arith.mulf %438, %439 : vector<2x256xf32>
    %c0_129 = arith.constant 0 : index
    %c3_130 = arith.constant 3 : index
    %c160_131 = arith.constant 160 : index
    %441 = vector.load %arg5[%c0_129, %c3_130, %c160_131] : memref<2x4x512xf32, #tpu.memory_space<vmem>>, vector<2x1x256xf32>
    %442 = vector.shape_cast %441 : vector<2x1x256xf32> to vector<2x256xf32>
    %c19 = arith.constant 19 : index
    %443 = memref.load %arg1[%c19] : memref<106xf32, #tpu.memory_space<smem>>
    %444 = vector.broadcast %443 : f32 to vector<2x256xf32>
    %445 = arith.mulf %444, %440 : vector<2x256xf32>
    %446 = arith.addf %424, %445 : vector<2x256xf32>
    %c72 = arith.constant 72 : index
    %447 = memref.load %arg1[%c72] : memref<106xf32, #tpu.memory_space<smem>>
    %448 = vector.broadcast %447 : f32 to vector<2x256xf32>
    %449 = arith.mulf %448, %442 : vector<2x256xf32>
    %450 = arith.addf %428, %449 : vector<2x256xf32>
    %c39 = arith.constant 39 : index
    %451 = memref.load %arg1[%c39] : memref<106xf32, #tpu.memory_space<smem>>
    %452 = vector.broadcast %451 : f32 to vector<2x256xf32>
    %453 = arith.mulf %452, %440 : vector<2x256xf32>
    %454 = arith.addf %432, %453 : vector<2x256xf32>
    %c92 = arith.constant 92 : index
    %455 = memref.load %arg1[%c92] : memref<106xf32, #tpu.memory_space<smem>>
    %456 = vector.broadcast %455 : f32 to vector<2x256xf32>
    %457 = arith.mulf %456, %442 : vector<2x256xf32>
    %458 = arith.addf %436, %457 : vector<2x256xf32>
    %c52 = arith.constant 52 : index
    %459 = memref.load %arg1[%c52] : memref<106xf32, #tpu.memory_space<smem>>
    %460 = vector.broadcast %459 : f32 to vector<2x256xf32>
    %c105 = arith.constant 105 : index
    %461 = memref.load %arg1[%c105] : memref<106xf32, #tpu.memory_space<smem>>
    %462 = vector.broadcast %461 : f32 to vector<2x256xf32>
    %c0_132 = arith.constant 0 : index
    %c128_133 = arith.constant 128 : index
    %463 = vector.load %arg6[%c0_132, %c128_133] : memref<2x512xf32, #tpu.memory_space<vmem>>, vector<2x256xf32>
    tpu.vector_store %arg6[%c0_132, %c128_133], %446 {strides = array<i32>} : memref<2x512xf32, #tpu.memory_space<vmem>>, vector<2x256xf32>,
    %c42 = arith.constant 42 : index
    %464 = memref.load %arg1[%c42] : memref<106xf32, #tpu.memory_space<smem>>
    %c0_134 = arith.constant 0 : index
    %c96_135 = arith.constant 96 : index
    %465 = vector.load %arg6[%c0_134, %c96_135] : memref<2x512xf32, #tpu.memory_space<vmem>>, vector<2x256xf32>
    %466 = vector.broadcast %464 : f32 to vector<2x256xf32>
    %467 = arith.mulf %466, %465 : vector<2x256xf32>
    %468 = arith.addf %460, %467 : vector<2x256xf32>
    %c43 = arith.constant 43 : index
    %469 = memref.load %arg1[%c43] : memref<106xf32, #tpu.memory_space<smem>>
    %c0_136 = arith.constant 0 : index
    %c112_137 = arith.constant 112 : index
    %470 = vector.load %arg6[%c0_136, %c112_137] : memref<2x512xf32, #tpu.memory_space<vmem>>, vector<2x256xf32>
    %471 = vector.broadcast %469 : f32 to vector<2x256xf32>
    %472 = arith.mulf %471, %470 : vector<2x256xf32>
    %473 = arith.addf %468, %472 : vector<2x256xf32>
    %c44 = arith.constant 44 : index
    %474 = memref.load %arg1[%c44] : memref<106xf32, #tpu.memory_space<smem>>
    %c0_138 = arith.constant 0 : index
    %c128_139 = arith.constant 128 : index
    %475 = vector.load %arg6[%c0_138, %c128_139] : memref<2x512xf32, #tpu.memory_space<vmem>>, vector<2x256xf32>
    %476 = vector.broadcast %474 : f32 to vector<2x256xf32>
    %477 = arith.mulf %476, %475 : vector<2x256xf32>
    %478 = arith.addf %473, %477 : vector<2x256xf32>
    %c45 = arith.constant 45 : index
    %479 = memref.load %arg1[%c45] : memref<106xf32, #tpu.memory_space<smem>>
    %c0_140 = arith.constant 0 : index
    %c144_141 = arith.constant 144 : index
    %480 = vector.load %arg6[%c0_140, %c144_141] : memref<2x512xf32, #tpu.memory_space<vmem>>, vector<2x256xf32>
    %481 = vector.broadcast %479 : f32 to vector<2x256xf32>
    %482 = arith.mulf %481, %480 : vector<2x256xf32>
    %483 = arith.addf %478, %482 : vector<2x256xf32>
    %c46 = arith.constant 46 : index
    %484 = memref.load %arg1[%c46] : memref<106xf32, #tpu.memory_space<smem>>
    %c0_142 = arith.constant 0 : index
    %c160_143 = arith.constant 160 : index
    %485 = vector.load %arg6[%c0_142, %c160_143] : memref<2x512xf32, #tpu.memory_space<vmem>>, vector<2x256xf32>
    %486 = vector.broadcast %484 : f32 to vector<2x256xf32>
    %487 = arith.mulf %486, %485 : vector<2x256xf32>
    %488 = arith.addf %483, %487 : vector<2x256xf32>
    %c0_144 = arith.constant 0 : index
    %c128_145 = arith.constant 128 : index
    %489 = vector.load %arg6[%c0_144, %c128_145] : memref<2x512xf32, #tpu.memory_space<vmem>>, vector<2x256xf32>
    tpu.vector_store %arg6[%c0_144, %c128_145], %450 {strides = array<i32>} : memref<2x512xf32, #tpu.memory_space<vmem>>, vector<2x256xf32>,
    %c0_146 = arith.constant 0 : index
    %c126_147 = arith.constant 126 : index
    %490 = vector.load %arg6[%c0_146, %c126_147] : memref<2x512xf32, #tpu.memory_space<vmem>>, vector<2x256xf32>
    %491 = vector.extract_strided_slice %1 {offsets = [0, 0, 0], sizes = [1, 1, 256], strides = [1, 1, 1]} : vector<5x1x256xf32> to vector<1x1x256xf32>
    %492 = vector.shape_cast %491 : vector<1x1x256xf32> to vector<1x256xf32>
    %493 = vector.broadcast %492 : vector<1x256xf32> to vector<2x256xf32>
    %494 = arith.mulf %490, %493 : vector<2x256xf32>
    %c95 = arith.constant 95 : index
    %495 = memref.load %arg1[%c95] : memref<106xf32, #tpu.memory_space<smem>>
    %496 = vector.broadcast %495 : f32 to vector<2x256xf32>
    %497 = arith.mulf %496, %494 : vector<2x256xf32>
    %498 = arith.addf %462, %497 : vector<2x256xf32>
    %c0_148 = arith.constant 0 : index
    %c127_149 = arith.constant 127 : index
    %499 = vector.load %arg6[%c0_148, %c127_149] : memref<2x512xf32, #tpu.memory_space<vmem>>, vector<2x256xf32>
    %500 = vector.extract_strided_slice %1 {offsets = [1, 0, 0], sizes = [1, 1, 256], strides = [1, 1, 1]} : vector<5x1x256xf32> to vector<1x1x256xf32>
    %501 = vector.shape_cast %500 : vector<1x1x256xf32> to vector<1x256xf32>
    %502 = vector.broadcast %501 : vector<1x256xf32> to vector<2x256xf32>
    %503 = arith.mulf %499, %502 : vector<2x256xf32>
    %c96_150 = arith.constant 96 : index
    %504 = memref.load %arg1[%c96_150] : memref<106xf32, #tpu.memory_space<smem>>
    %505 = vector.broadcast %504 : f32 to vector<2x256xf32>
    %506 = arith.mulf %505, %503 : vector<2x256xf32>
    %507 = arith.addf %498, %506 : vector<2x256xf32>
    %c0_151 = arith.constant 0 : index
    %c128_152 = arith.constant 128 : index
    %508 = vector.load %arg6[%c0_151, %c128_152] : memref<2x512xf32, #tpu.memory_space<vmem>>, vector<2x256xf32>
    %c97 = arith.constant 97 : index
    %509 = memref.load %arg1[%c97] : memref<106xf32, #tpu.memory_space<smem>>
    %510 = vector.broadcast %509 : f32 to vector<2x256xf32>
    %511 = arith.mulf %510, %508 : vector<2x256xf32>
    %512 = arith.addf %507, %511 : vector<2x256xf32>
    %c0_153 = arith.constant 0 : index
    %c129_154 = arith.constant 129 : index
    %513 = vector.load %arg6[%c0_153, %c129_154] : memref<2x512xf32, #tpu.memory_space<vmem>>, vector<2x256xf32>
    %514 = vector.extract_strided_slice %1 {offsets = [3, 0, 0], sizes = [1, 1, 256], strides = [1, 1, 1]} : vector<5x1x256xf32> to vector<1x1x256xf32>
    %515 = vector.shape_cast %514 : vector<1x1x256xf32> to vector<1x256xf32>
    %516 = vector.broadcast %515 : vector<1x256xf32> to vector<2x256xf32>
    %517 = arith.mulf %513, %516 : vector<2x256xf32>
    %c98 = arith.constant 98 : index
    %518 = memref.load %arg1[%c98] : memref<106xf32, #tpu.memory_space<smem>>
    %519 = vector.broadcast %518 : f32 to vector<2x256xf32>
    %520 = arith.mulf %519, %517 : vector<2x256xf32>
    %521 = arith.addf %512, %520 : vector<2x256xf32>
    %c0_155 = arith.constant 0 : index
    %c130_156 = arith.constant 130 : index
    %522 = vector.load %arg6[%c0_155, %c130_156] : memref<2x512xf32, #tpu.memory_space<vmem>>, vector<2x256xf32>
    %523 = vector.extract_strided_slice %1 {offsets = [4, 0, 0], sizes = [1, 1, 256], strides = [1, 1, 1]} : vector<5x1x256xf32> to vector<1x1x256xf32>
    %524 = vector.shape_cast %523 : vector<1x1x256xf32> to vector<1x256xf32>
    %525 = vector.broadcast %524 : vector<1x256xf32> to vector<2x256xf32>
    %526 = arith.mulf %522, %525 : vector<2x256xf32>
    %c99 = arith.constant 99 : index
    %527 = memref.load %arg1[%c99] : memref<106xf32, #tpu.memory_space<smem>>
    %528 = vector.broadcast %527 : f32 to vector<2x256xf32>
    %529 = arith.mulf %528, %526 : vector<2x256xf32>
    %530 = arith.addf %521, %529 : vector<2x256xf32>
    %c0_157 = arith.constant 0 : index
    %c128_158 = arith.constant 128 : index
    %531 = vector.load %arg6[%c0_157, %c128_158] : memref<2x512xf32, #tpu.memory_space<vmem>>, vector<2x256xf32>
    tpu.vector_store %arg6[%c0_157, %c128_158], %454 {strides = array<i32>} : memref<2x512xf32, #tpu.memory_space<vmem>>, vector<2x256xf32>,
    %c47 = arith.constant 47 : index
    %532 = memref.load %arg1[%c47] : memref<106xf32, #tpu.memory_space<smem>>
    %c0_159 = arith.constant 0 : index
    %c96_160 = arith.constant 96 : index
    %533 = vector.load %arg6[%c0_159, %c96_160] : memref<2x512xf32, #tpu.memory_space<vmem>>, vector<2x256xf32>
    %534 = vector.broadcast %532 : f32 to vector<2x256xf32>
    %535 = arith.mulf %534, %533 : vector<2x256xf32>
    %536 = arith.addf %488, %535 : vector<2x256xf32>
    %c48 = arith.constant 48 : index
    %537 = memref.load %arg1[%c48] : memref<106xf32, #tpu.memory_space<smem>>
    %c0_161 = arith.constant 0 : index
    %c112_162 = arith.constant 112 : index
    %538 = vector.load %arg6[%c0_161, %c112_162] : memref<2x512xf32, #tpu.memory_space<vmem>>, vector<2x256xf32>
    %539 = vector.broadcast %537 : f32 to vector<2x256xf32>
    %540 = arith.mulf %539, %538 : vector<2x256xf32>
    %541 = arith.addf %536, %540 : vector<2x256xf32>
    %c49 = arith.constant 49 : index
    %542 = memref.load %arg1[%c49] : memref<106xf32, #tpu.memory_space<smem>>
    %c0_163 = arith.constant 0 : index
    %c128_164 = arith.constant 128 : index
    %543 = vector.load %arg6[%c0_163, %c128_164] : memref<2x512xf32, #tpu.memory_space<vmem>>, vector<2x256xf32>
    %544 = vector.broadcast %542 : f32 to vector<2x256xf32>
    %545 = arith.mulf %544, %543 : vector<2x256xf32>
    %546 = arith.addf %541, %545 : vector<2x256xf32>
    %c50 = arith.constant 50 : index
    %547 = memref.load %arg1[%c50] : memref<106xf32, #tpu.memory_space<smem>>
    %c0_165 = arith.constant 0 : index
    %c144_166 = arith.constant 144 : index
    %548 = vector.load %arg6[%c0_165, %c144_166] : memref<2x512xf32, #tpu.memory_space<vmem>>, vector<2x256xf32>
    %549 = vector.broadcast %547 : f32 to vector<2x256xf32>
    %550 = arith.mulf %549, %548 : vector<2x256xf32>
    %551 = arith.addf %546, %550 : vector<2x256xf32>
    %c51 = arith.constant 51 : index
    %552 = memref.load %arg1[%c51] : memref<106xf32, #tpu.memory_space<smem>>
    %c0_167 = arith.constant 0 : index
    %c160_168 = arith.constant 160 : index
    %553 = vector.load %arg6[%c0_167, %c160_168] : memref<2x512xf32, #tpu.memory_space<vmem>>, vector<2x256xf32>
    %554 = vector.broadcast %552 : f32 to vector<2x256xf32>
    %555 = arith.mulf %554, %553 : vector<2x256xf32>
    %556 = arith.addf %551, %555 : vector<2x256xf32>
    %c0_169 = arith.constant 0 : index
    %c128_170 = arith.constant 128 : index
    %557 = vector.load %arg6[%c0_169, %c128_170] : memref<2x512xf32, #tpu.memory_space<vmem>>, vector<2x256xf32>
    tpu.vector_store %arg6[%c0_169, %c128_170], %458 {strides = array<i32>} : memref<2x512xf32, #tpu.memory_space<vmem>>, vector<2x256xf32>,
    %c0_171 = arith.constant 0 : index
    %c126_172 = arith.constant 126 : index
    %558 = vector.load %arg6[%c0_171, %c126_172] : memref<2x512xf32, #tpu.memory_space<vmem>>, vector<2x256xf32>
    %559 = vector.extract_strided_slice %1 {offsets = [0, 0, 0], sizes = [1, 1, 256], strides = [1, 1, 1]} : vector<5x1x256xf32> to vector<1x1x256xf32>
    %560 = vector.shape_cast %559 : vector<1x1x256xf32> to vector<1x256xf32>
    %561 = vector.broadcast %560 : vector<1x256xf32> to vector<2x256xf32>
    %562 = arith.mulf %558, %561 : vector<2x256xf32>
    %c100 = arith.constant 100 : index
    %563 = memref.load %arg1[%c100] : memref<106xf32, #tpu.memory_space<smem>>
    %564 = vector.broadcast %563 : f32 to vector<2x256xf32>
    %565 = arith.mulf %564, %562 : vector<2x256xf32>
    %566 = arith.addf %530, %565 : vector<2x256xf32>
    %c0_173 = arith.constant 0 : index
    %c127_174 = arith.constant 127 : index
    %567 = vector.load %arg6[%c0_173, %c127_174] : memref<2x512xf32, #tpu.memory_space<vmem>>, vector<2x256xf32>
    %568 = vector.extract_strided_slice %1 {offsets = [1, 0, 0], sizes = [1, 1, 256], strides = [1, 1, 1]} : vector<5x1x256xf32> to vector<1x1x256xf32>
    %569 = vector.shape_cast %568 : vector<1x1x256xf32> to vector<1x256xf32>
    %570 = vector.broadcast %569 : vector<1x256xf32> to vector<2x256xf32>
    %571 = arith.mulf %567, %570 : vector<2x256xf32>
    %c101 = arith.constant 101 : index
    %572 = memref.load %arg1[%c101] : memref<106xf32, #tpu.memory_space<smem>>
    %573 = vector.broadcast %572 : f32 to vector<2x256xf32>
    %574 = arith.mulf %573, %571 : vector<2x256xf32>
    %575 = arith.addf %566, %574 : vector<2x256xf32>
    %c0_175 = arith.constant 0 : index
    %c128_176 = arith.constant 128 : index
    %576 = vector.load %arg6[%c0_175, %c128_176] : memref<2x512xf32, #tpu.memory_space<vmem>>, vector<2x256xf32>
    %c102 = arith.constant 102 : index
    %577 = memref.load %arg1[%c102] : memref<106xf32, #tpu.memory_space<smem>>
    %578 = vector.broadcast %577 : f32 to vector<2x256xf32>
    %579 = arith.mulf %578, %576 : vector<2x256xf32>
    %580 = arith.addf %575, %579 : vector<2x256xf32>
    %c0_177 = arith.constant 0 : index
    %c129_178 = arith.constant 129 : index
    %581 = vector.load %arg6[%c0_177, %c129_178] : memref<2x512xf32, #tpu.memory_space<vmem>>, vector<2x256xf32>
    %582 = vector.extract_strided_slice %1 {offsets = [3, 0, 0], sizes = [1, 1, 256], strides = [1, 1, 1]} : vector<5x1x256xf32> to vector<1x1x256xf32>
    %583 = vector.shape_cast %582 : vector<1x1x256xf32> to vector<1x256xf32>
    %584 = vector.broadcast %583 : vector<1x256xf32> to vector<2x256xf32>
    %585 = arith.mulf %581, %584 : vector<2x256xf32>
    %c103 = arith.constant 103 : index
    %586 = memref.load %arg1[%c103] : memref<106xf32, #tpu.memory_space<smem>>
    %587 = vector.broadcast %586 : f32 to vector<2x256xf32>
    %588 = arith.mulf %587, %585 : vector<2x256xf32>
    %589 = arith.addf %580, %588 : vector<2x256xf32>
    %c0_179 = arith.constant 0 : index
    %c130_180 = arith.constant 130 : index
    %590 = vector.load %arg6[%c0_179, %c130_180] : memref<2x512xf32, #tpu.memory_space<vmem>>, vector<2x256xf32>
    %591 = vector.extract_strided_slice %1 {offsets = [4, 0, 0], sizes = [1, 1, 256], strides = [1, 1, 1]} : vector<5x1x256xf32> to vector<1x1x256xf32>
    %592 = vector.shape_cast %591 : vector<1x1x256xf32> to vector<1x256xf32>
    %593 = vector.broadcast %592 : vector<1x256xf32> to vector<2x256xf32>
    %594 = arith.mulf %590, %593 : vector<2x256xf32>
    %c104 = arith.constant 104 : index
    %595 = memref.load %arg1[%c104] : memref<106xf32, #tpu.memory_space<smem>>
    %596 = vector.broadcast %595 : f32 to vector<2x256xf32>
    %597 = arith.mulf %596, %594 : vector<2x256xf32>
    %598 = arith.addf %589, %597 : vector<2x256xf32>
    %599 = arith.addf %556, %598 : vector<2x256xf32>
    %cst_181 = arith.constant dense<0xFF800000> : vector<2x4xf32>
    %600 = vector.multi_reduction <maximumf>, %0, %cst_181 [2] : vector<2x4x256xf32> to vector<2x4xf32>
    %cst_182 = arith.constant 0.000000e+00 : f32
    %601 = vector.broadcast %cst_182 : f32 to vector<2x256xf32>
    %602 = arith.subf %601, %599 : vector<2x256xf32>
    %603 = math.exp %602 : vector<2x256xf32>
    %604 = vector.shape_cast %603 : vector<2x256xf32> to vector<2x1x256xf32>
    %cst_183 = arith.constant 0.000000e+00 : f32
    %605 = vector.broadcast %cst_183 : f32 to vector<2x4xf32>
    %606 = arith.subf %605, %600 : vector<2x4xf32>
    %607 = math.exp %606 : vector<2x4xf32>
    %608 = vector.shape_cast %607 : vector<2x4xf32> to vector<2x4x1xf32>
    %609 = vector.broadcast %608 : vector<2x4x1xf32> to vector<2x4x256xf32>
    %610 = vector.broadcast %604 : vector<2x1x256xf32> to vector<2x4x256xf32>
    %611 = arith.mulf %609, %610 : vector<2x4x256xf32>
    %cst_184 = arith.constant 1.000000e+00 : f32
    %612 = vector.broadcast %cst_184 : f32 to vector<2x4x256xf32>
    %613 = arith.addf %612, %611 : vector<2x4x256xf32>
    %cst_185 = arith.constant 1.000000e+00 : f32
    %614 = vector.broadcast %cst_185 : f32 to vector<2x4x256xf32>
    %615 = arith.divf %614, %613 : vector<2x4x256xf32>
    %616 = arith.mulf %0, %615 : vector<2x4x256xf32>
    %c0_186 = arith.constant 0 : index
    %c0_187 = arith.constant 0 : index
    %c0_188 = arith.constant 0 : index
    %617 = vector.load %arg4[%c0_186, %c0_187, %c0_188] : memref<2x4x256xf32, #tpu.memory_space<vmem>>, vector<2x4x256xf32>
    tpu.vector_store %arg4[%c0_186, %c0_187, %c0_188], %616 {strides = array<i32>} : memref<2x4x256xf32, #tpu.memory_space<vmem>>, vector<2x4x256xf32>,
    return
  }
  func.func @transform_0(%arg0: i32, %arg1: memref<106xf32, #tpu.memory_space<smem>>) -> (i32, i32, i32) {
    %c0_i32 = arith.constant 0 : i32
    %c0_i32_0 = arith.constant 0 : i32
    %c0_i32_1 = arith.constant 0 : i32
    %c0_i32_2 = arith.constant 0 : i32
    return %c0_i32, %c0_i32_0, %c0_i32_1 : i32, i32, i32
  }
  func.func @transform_1(%arg0: i32, %arg1: memref<106xf32, #tpu.memory_space<smem>>) -> (i32, i32, i32) {
    %c0_i32 = arith.constant 0 : i32
    %c0_i32_0 = arith.constant 0 : i32
    %c0_i32_1 = arith.constant 0 : i32
    return %arg0, %c0_i32, %c0_i32_0 : i32, i32, i32
  }
  func.func @transform_2(%arg0: i32, %arg1: memref<106xf32, #tpu.memory_space<smem>>) -> (i32, i32, i32) {
    %c0_i32 = arith.constant 0 : i32
    %c0_i32_0 = arith.constant 0 : i32
    %c0_i32_1 = arith.constant 0 : i32
    return %arg0, %c0_i32, %c0_i32_0 : i32, i32, i32
  }
}

</mosaic_0001>

<bundles_post_ra>
// kernel: tpu_custom_call.1
= control target key start
LH: loop header
LB: loop body
LE: loop exit
PB: predicated region body
PF: predicated region fallthrough
CT: control target
= control target key end

     0   :  { %s3937_s0 = inlined_call_operand.hbm [shape: f32[106], index: 0, kind: input, shape index: {}]   ;;  %s3938_s1 = inlined_call_operand.hbm [shape: f32[5,1,256], index: 1, kind: input, shape index: {}]   ;;  %s3939_s2 = inlined_call_operand.hbm [shape: f32[2,4,256], index: 2, kind: input, shape index: {}]   ;;  %s3940_s3 = inlined_call_operand.hbm [shape: f32[2,4,256], index: 3, kind: output, shape index: {}]  }
   0x1   :  { %s2204_s14 = scalar_lea.hbm %s3937_s0, 16 }
   0x2   :  { %p2205_p0 = scmp.ne.s32.totalorder %s3937_s0, %s2204_s14  ;;  %p2208_p1 = scmp.lt.u32.totalorder %s2204_s14, %s3937_s0 }
   0x4   :  { %p2210_p2 = pnand %p2208_p1, %p2205_p0 }
   0x6   :  { %2213 = shalt.err (!%p2210_p2)  }
   0x7   :  { %s2288_s19 = smov [#allocation5]  }
   0x8   :  { %9 = dma.hbm_to_smem %s3937_s0, 16, %s2288_s19, [#allocation4] }
   0x9   :  { %2280 = dma.done.wait [#allocation4], 16 }
   0xa   :  { %2281 = vsyncadd [#allocation4], 4294967280 }
   0xb   :  { %11 = sfence }
   0xc   :  { %12 = vsyncpa [#allocation7], 0 }
   0xd   :  { %13 = vsyncpa [#allocation10], 0 }
   0xe   :  { %14 = vsyncpa [#allocation8], 0  ;;  %s2289_s22 = smov [#allocation6]   ;;  %s2214_s26 = scalar_lea.hbm %s3938_s1, 160 }
   0xf   :  { %s20_s23 = sshll.u32 %s2289_s22, 4  ;;  %p2215_p3 = scmp.ne.s32.totalorder %s3938_s1, %s2214_s26  ;;  %s21_s23 = int_to_ptr.vmem [resolvable:$true] %s20_s23 }
  0x10   :  { %p2218_p4 = scmp.lt.u32.totalorder %s2214_s26, %s3938_s1 }
  0x12   :  { %p2220_p5 = pnand %p2218_p4, %p2215_p3 }
  0x14   :  { %2223 = shalt.err (!%p2220_p5)
}
  0x15   :  { %s2224_s0 = scalar_lea.vmem %s21_s23, 160  ;;  %p2229_p7 = scmp.lt.s32.totalorder %s21_s23, %s21_s23 }
  0x16   :  { %p2225_p6 = scmp.ne.s32.totalorder %s21_s23, %s2224_s0  ;;  %p2230_p8 = scmp.lt.s32.totalorder %s2224_s0, %s2224_s0 }
  0x18   :  { %p2231_p9 = por %p2230_p8, %p2229_p7 }
  0x1a   :  { %p2232_p10 = pnand %p2231_p9, %p2225_p6 }
  0x1c   :  { %2235 = shalt.err (!%p2232_p10)
}
  0x1d   :  { %s2290_s4 = smov 32   ;;  %s2291_s5 = smov 2  }
  0x1e   :  { %26 = dma.hbm_to_vmem [thread:$0]  %s3938_s1, 160, %s21_s23, [#allocation7], %s2290_s4, %s2290_s4, %s2291_s5  }
  0x1f   :  { %s2292_s8 = smov [#allocation9]   ;;  %s2236_s12 = scalar_lea.hbm %s3939_s2, 256 }
  0x20   :  { %s32_s9 = sshll.u32 %s2292_s8, 4  ;;  %p2237_p11 = scmp.ne.s32.totalorder %s3939_s2, %s2236_s12  ;;  %s33_s9 = int_to_ptr.vmem [resolvable:$true] %s32_s9 }
  0x21   :  { %p2240_p12 = scmp.lt.u32.totalorder %s2236_s12, %s3939_s2 }
  0x23   :  { %p2242_p13 = pnand %p2240_p12, %p2237_p11 }
  0x25   :  { %2245 = shalt.err (!%p2242_p13)
}
  0x26   :  { %s2246_s17 = scalar_lea.vmem %s33_s9, 256  ;;  %p2251_p1 = scmp.lt.s32.totalorder %s33_s9, %s33_s9 }
  0x27   :  { %p2247_p0 = scmp.ne.s32.totalorder %s33_s9, %s2246_s17  ;;  %p2252_p2 = scmp.lt.s32.totalorder %s2246_s17, %s2246_s17 }
  0x29   :  { %p2253_p3 = por %p2252_p2, %p2251_p1 }
  0x2b   :  { %p2254_p4 = pnand %p2253_p3, %p2247_p0 }
  0x2d   :  { %2257 = shalt.err (!%p2254_p4)
}
  0x2e   :  { %s3992_s1 = smov 128   ;;  %s3993_s18 = smov 8  }
  0x2f   :  { %38 = dma.hbm_to_vmem [thread:$0]  %s3939_s2, 256, %s33_s9, [#allocation10], %s3992_s1, %s3992_s1, %s3993_s18  }
  0x30   :  { %2282 = dma.done.wait [#allocation7], 160  }
  0x31   :  { %2283 = vsyncadd [#allocation7], 4294967136 }
  0x32   :  { %2284 = dma.done.wait [#allocation10], 256  }
  0x33   :  { %2285 = vsyncadd [#allocation10], 4294967040  ;;  %v71_v0 = vlaneseq  ;;  %v2295_v1 = vmov 1966171168   ;;  %v2296_v4 = vmov 0.0   ;;  %v46_v17 = vld [vmem:[#allocation9 + $0x8] sm:$0xff] }
  0x34   :  { %v81_v2 = vunpack.c.l.s4 %v2295_v1  ;;  %52 = vst [vmem:[#allocation2 + $0x10] sm:$0xf] %v2296_v4  ;;  %51 = vst [vmem:[#allocation2] sm:$0xf] %v2296_v4  ;;  %v49_v8 = vld [vmem:[#allocation6 + $0x6] sm:$0x3] }
  0x35   :  { %v2372_v3 = vshrl.u32 %v71_v0, 7  ;;  %53 = vst [vmem:[#allocation2 + $0xc] sm:$0xf] %v2296_v4  ;;  %54 = vst [vmem:[#allocation2 + $0x1c] sm:$0xf] %v2296_v4  ;;  %v45_v18 = vld [vmem:[#allocation9] sm:$0xff] }
  0x36   :  { %57 = vst [vmem:[#allocation3] sm:$0x3] %v2296_v4  ;;  %58 = vst [vmem:[#allocation3 + $0x6] sm:$0x3] %v2296_v4  ;;  %v82_v5 = vunpack.c.0.s8 %v81_v2  ;;  %v48_v10 = vld [vmem:[#allocation6 + $0x2] sm:$0x3] }
  0x37   :  { %4010 = vst [vmem:[#allocation16_spill] sm:$0xff] %v2372_v3  ;;  %v2375_v6 = vsub.s32 0, %v2372_v3  ;;  %v2378_v7 = vsub.s32 1, %v2372_v3  ;;  %v50_v11 = vld [vmem:[#allocation6 + $0x8] sm:$0x3]  ;;  %56 = vst [vmem:[#allocation2 + $0x14] sm:$0xff] %v46_v17 }
  0x38   :  { %v2381_v9 = vsub.s32 %v82_v5, %v2372_v3  ;;  %v47_v16 = vld [vmem:[#allocation6] sm:$0x3]  ;;  %55 = vst [vmem:[#allocation2 + $0x4] sm:$0xff] %v45_v18  ;;  %s2297_s2 = smov 1   ;;  %s2298_s21 = smov 127   ;;  %vm269_vm0 = vcmask 1039360  }
  0x39   :  { %4011 = vst [vmem:[#allocation17_spill] sm:$0xff] %v2375_v6  ;;  %4012 = vst [vmem:[#allocation18_spill] sm:$0xff] %v2378_v7  ;;  %v890_v12 = vrot.slane %v49_v8, %v2375_v6  ;;  %v894_v13 = vrot.slane %v49_v8, %v2378_v7  ;;  %v235_v14 = vrot.slane %v48_v10, %v2375_v6  ;;  %s2070_s22 = sld [smem:[#allocation5 + $0x36]]  ;;  %s2085_s23 = sld [smem:[#allocation5 + $0x2]]  ;;  %vm924_vm1 = vcmask 7168  }
  0x3a   :  { %4013 = vst [vmem:[#allocation19_spill] sm:$0xff] %v2381_v9  ;;  %v239_v15 = vrot.slane %v48_v10, %v2378_v7  ;;  %v1245_v19 = vrot.slane %v50_v11, %v2375_v6  ;;  %v1249_v20 = vrot.slane %v50_v11, %v2378_v7  ;;  %v74_v21 = vrot.slane %v47_v16, %v2375_v6  ;;  %s2299_s24 = smov 126   ;;  %s2074_s25 = sld [smem:[#allocation5 + $0x3b]] }
  0x3b   :  { %v78_v22 = vrot.slane %v47_v16, %v2378_v7  ;;  %v2391_v23 = vcombine.low %v890_v12, %v894_v13  ;;  %s2089_s26 = sld [smem:[#allocation5 + $0x7]]  ;;  %s2300_s27 = smov 112   ;;  %vm108_vm2 = vcmask 1031168   ;;  %vm1279_vm3 = vcmask 15360  }
  0x3c   :  { %v2393_v24 = vcombine.low %v235_v14, %v239_v15  ;;  %v2395_v25 = vcombine.low %v1245_v19, %v1249_v20  ;;  %s2078_s28 = sld [smem:[#allocation5 + $0x40]]  ;;  %s2093_s29 = sld [smem:[#allocation5 + $0xc]]  ;;  %vm306_vm4 = vcmask 916480   ;;  %vm943_vm5 = vcmask 1022976  }
  0x3d   :  { %4014 = vst [vmem:[#allocation20_spill] sm:$0xff] %v2391_v23  ;;  %v2397_v26 = vcombine.low %v74_v21, %v78_v22  ;;  %v902_v27 = vrot.slane %v2391_v23, %v2381_v9  ;;  %s2082_s30 = sld [smem:[#allocation5 + $0x45]]  ;;  %s2097_s0 = sld [smem:[#allocation5 + $0x11]]  ;;  %vm611_vm6 = vcmask 785408   ;;  %vm1298_vm7 = vcmask 1014784  }
  0x3e   :  { %4015 = vst [vmem:[#allocation21_spill] sm:$0xff] %v2393_v24  ;;  %4016 = vst [vmem:[#allocation22_spill] sm:$0xff] %v2395_v25  ;;  %v247_v28 = vrot.slane %v2393_v24, %v2381_v9  ;;  %v1257_v29 = vrot.slane %v2395_v25, %v2381_v9  ;;  %v2421_v43 = vld [vmem:[#allocation2 + $0x10] ss:$4 sm:$0x7]  ;;  %s2086_s6 = sld [smem:[#allocation5 + $0x37]] }
  0x3f   :  { %4017 = vst [vmem:[#allocation23_spill] sm:$0xff] %v2397_v26  ;;  %v910_v30 = vrot.slane %v902_v27, %v2381_v9  ;;  %v903_v31 = vcombine.high %v902_v27, %v902_v27  ;;  %v86_v33 = vrot.slane %v2397_v26, %v2381_v9  ;;  %v295_v44 = vstv %s2070_s22  ;;  %v2423_v45 = vld [vmem:[#allocation2] ss:$4 sm:$0x7]  ;;  %s2090_s7 = sld [smem:[#allocation5 + $0x3c]]  ;;  %s2094_s8 = sld [smem:[#allocation5 + $0x41]] }
  0x40   :  { %v255_v32 = vrot.slane %v247_v28, %v2381_v9  ;;  %v1265_v35 = vrot.slane %v1257_v29, %v2381_v9  ;;  %v1258_v36 = vcombine.high %v1257_v29, %v1257_v29  ;;  %v248_v37 = vcombine.high %v247_v28, %v247_v28  ;;  %v2429_v48 = vld [vmem:[#allocation2 + $0x14] ss:$4 sm:$0x3]  ;;  %v2431_v50 = vld [vmem:[#allocation2 + $0x4] ss:$4 sm:$0x3] }
  0x41   :  { %918 = vrot.lane.b32.xlu1 %v910_v30, %s2297_s2  ;;  %v917_v34 = vrot.slane %v903_v31, %v2381_v9  ;;  %v94_v39 = vrot.slane %v86_v33, %v2381_v9  ;;  %v87_v40 = vcombine.high %v86_v33, %v86_v33  ;;  %v297_v46 = vmul.f32 %v295_v44, %v2421_v43  ;;  %v2437_v53 = vld [vmem:[#allocation2 + $0x11] ss:$4 sm:$0x7]  ;;  %v2439_v55 = vld [vmem:[#allocation2 + $0x1] ss:$4 sm:$0x7] }
  0x42   :  { %263 = vrot.lane.b32.xlu0 %v255_v32, %s2298_s21  ;;  %v1272_v38 = vrot.slane %v1258_v36, %v2381_v9  ;;  %v262_v41 = vrot.slane %v248_v37, %v2381_v9  ;;  %v296_v47 = vmul.f32 %v295_v44, %v2423_v45  ;;  %v582_v49 = vstv %s2085_s23  ;;  %v2445_v58 = vld [vmem:[#allocation2 + $0x15] ss:$4 sm:$0x3]  ;;  %v2447_v60 = vld [vmem:[#allocation2 + $0x5] ss:$4 sm:$0x3] }
  0x43   :  { %v101_v42 = vrot.slane %v87_v40, %v2381_v9  ;;  %v584_v51 = vmul.f32 %v582_v49, %v2429_v48  ;;  %v583_v52 = vmul.f32 %v582_v49, %v2431_v50  ;;  %v372_v54 = vstv %s2074_s25  ;;  %v2453_v63 = vld [vmem:[#allocation2 + $0x12] ss:$4 sm:$0x7]  ;;  %v2455_v1 = vld [vmem:[#allocation2 + $0x2] ss:$4 sm:$0x7] }
  0x44   :  { %v374_v56 = vmul.f32 %v372_v54, %v2437_v53  ;;  %v373_v57 = vmul.f32 %v372_v54, %v2439_v55  ;;  %v659_v59 = vstv %s2089_s26  ;;  %v448_v0 = vstv %s2078_s28  ;;  %v2461_v5 = vld [vmem:[#allocation2 + $0x16] ss:$4 sm:$0x3]  ;;  %v2463_v10 = vld [vmem:[#allocation2 + $0x6] ss:$4 sm:$0x3] }
  0x45   :  { %920 = vrot.lane.b32.xlu1 %v917_v34, %s2297_s2  ;;  %v661_v61 = vmul.f32 %v659_v59, %v2445_v58  ;;  %v660_v62 = vmul.f32 %v659_v59, %v2447_v60  ;;  %v450_v2 = vmul.f32 %v448_v0, %v2453_v63  ;;  %v449_v4 = vmul.f32 %v448_v0, %v2455_v1  ;;  %v2469_v13 = vld [vmem:[#allocation2 + $0x13] ss:$4 sm:$0x7]  ;;  %v2471_v15 = vld [vmem:[#allocation2 + $0x3] ss:$4 sm:$0x7] }
  0x46   :  { %1273 = vrot.lane.b32.xlu0 %v1265_v35, %s2291_s5  ;;  %v735_v8 = vstv %s2093_s29  ;;  %v524_v14 = vstv %s2082_s30  ;;  %v2477_v18 = vld [vmem:[#allocation2 + $0x17] ss:$4 sm:$0x3]  ;;  %v811_v19 = vstv %s2097_s0  ;;  %v2479_v20 = vld [vmem:[#allocation2 + $0x7] ss:$4 sm:$0x3] }
  0x47   :  { %v737_v11 = vmul.f32 %v735_v8, %v2461_v5  ;;  %v736_v12 = vmul.f32 %v735_v8, %v2463_v10  ;;  %v526_v16 = vmul.f32 %v524_v14, %v2469_v13  ;;  %v525_v17 = vmul.f32 %v524_v14, %v2471_v15  ;;  %s2098_s9 = sld [smem:[#allocation5 + $0x46]]  ;;  %s3994_s10 = smov 96   ;;  %v2527_v8 = vld [vmem:[#allocation2 + $0x5] ss:$4 sm:$0x7] }
  0x48   :  { %v813_v21 = vmul.f32 %v811_v19, %v2477_v18  ;;  %v812_v22 = vmul.f32 %v811_v19, %v2479_v20  ;;  %v600_v27 = vstv %s2086_s6  ;;  %v677_v30 = vstv %s2090_s7  ;;  %s2072_s11 = sld [smem:[#allocation5 + $0x4a]]  ;;  %s2087_s12 = sld [smem:[#allocation5 + $0x16]]  ;;  %v2690_v6 = vld [vmem:[#allocation2 + $0x6] ss:$4 sm:$0x7] }
  0x49   :  { %1275 = vrot.lane.b32.xlu1 %v1272_v38, %s2291_s5  ;;  %v602_v28 = vmul.f32 %v600_v27, %v2429_v48  ;;  %v601_v29 = vmul.f32 %v600_v27, %v2431_v50  ;;  %v679_v31 = vmul.f32 %v677_v30, %v2445_v58  ;;  %v678_v32 = vmul.f32 %v677_v30, %v2447_v60  ;;  %s2102_s13 = sld [smem:[#allocation5 + $0x38]]  ;;  %s2076_s14 = sld [smem:[#allocation5 + $0x4f]]  ;;  %v2708_v26 = vld [vmem:[#allocation2 + $0x13] ss:$4 sm:$0x7] }
  0x4a   :  { %102 = vrot.lane.b32.xlu0 %v94_v39, %s2299_s24  ;;  %v753_v33 = vstv %s2094_s8  ;;  %s2091_s15 = sld [smem:[#allocation5 + $0x1b]]  ;;  %s2106_s16 = sld [smem:[#allocation5 + $0x3d]]  ;;  %4027 = vst [vmem:[#allocation33_spill] sm:$0xff] %v2708_v26  ;;  %vm962_vm8 = vcmask 654336   ;;  %vm1317_vm9 = vcmask 523264   ;;  %vm1668_vm10 = vcmask 261120  }
  0x4b   :  { %v755_v34 = vmul.f32 %v753_v33, %v2461_v5  ;;  %v754_v35 = vmul.f32 %v753_v33, %v2463_v10  ;;  %s2302_s17 = smov 80   ;;  %s2535_s19 = sld [smem:[#allocation5 + $0x1]]  ;;  %vm1919_vm11 = vcmask 1043456   ;;  %vm1909_vm12 = vcmask 801792  }
  0x4c   :  { %s2537_s20 = sld [smem:[#allocation5 + $0x6]]  ;;  %s2541_s22 = sld [smem:[#allocation5 + $0xb]] }
  0x4d   :  { %104 = vrot.lane.b32.xlu1 %v101_v42, %s2299_s24  ;;  %v829_v36 = vstv %s2098_s9  ;;  %s2550_s23 = sld [smem:[#allocation5 + $0x10]]  ;;  %s2558_s25 = sld [smem:[#allocation5 + $0x15]] }
  0x4e   :  { %265 = vrot.lane.b32.xlu0 %v262_v41, %s2298_s21  ;;  %v831_v37 = vmul.f32 %v829_v36, %v2477_v18  ;;  %v830_v38 = vmul.f32 %v829_v36, %v2479_v20  ;;  %v332_v39 = vstv %s2072_s11  ;;  %v619_v42 = vstv %s2087_s12  ;;  %s2563_s26 = sld [smem:[#allocation5 + $0x3]]  ;;  %s2583_s28 = sld [smem:[#allocation5 + $0x1a]] }
  0x4f   :  { %v334_v40 = vmul.f32 %v332_v39, %v2421_v43  ;;  %v333_v41 = vmul.f32 %v332_v39, %v2423_v45  ;;  %v621_v44 = vmul.f32 %v619_v42, %v2429_v48  ;;  %v951_v49 = vstv %s2102_s13  ;;  %s2585_s29 = sld [smem:[#allocation5 + $0x14]]  ;;  %s2604_s30 = sld [smem:[#allocation5 + $0x8]] }
  0x50   :  { %s2606_s0 = sld [smem:[#allocation5 + $0x29]]  ;;  %s2626_s7 = sld [smem:[#allocation5 + $0x1f]] }
  0x51   :  { %302 = vrot.lane.b32.xlu1 %v297_v46, %s2300_s27  ;;  %v620_v46 = vmul.f32 %v619_v42, %v2431_v50  ;;  %v277_v19 = vstv %s2535_s19  ;;  %s2616_s6 = sld [smem:[#allocation5 + $0x19]]  ;;  %s2629_s8 = sld [smem:[#allocation5 + $0x1e]] }
  0x52   :  { %300 = vrot.lane.b32.xlu0 %v296_v47, %s2300_s27  ;;  %v2509_v47 = vld [vmem:[#allocation2 + $0x14] ss:$4 sm:$0x7]  ;;  %v354_v30 = vstv %s2537_s20  ;;  %s3996_s9 = smov 125   ;;  %s2638_s11 = sld [smem:[#allocation5 + $0xd]] }
  0x53   :  { %v506_v39 = vstv %s2550_s23  ;;  %s2649_s12 = sld [smem:[#allocation5 + $0x23]]  ;;  %s2692_s13 = sld [smem:[#allocation5 + $0x24]] }
  0x54   :  { %s2791_s19 = sld [smem:[#allocation5 + $0x54]]  ;;  %s2812_s20 = sld [smem:[#allocation5 + $0x20]] }
  0x55   :  { %589 = vrot.lane.b32.xlu1 %v584_v51, %s2299_s24  ;;  %v2511_v51 = vld [vmem:[#allocation2 + $0x4] ss:$4 sm:$0x7]  ;;  %s2832_s23 = sld [smem:[#allocation5 + $0x42]]  ;;  %s3157_s1 = sld [smem:[#allocation5 + $0x44]] }
  0x56   :  { %587 = vrot.lane.b32.xlu0 %v583_v52, %s2299_s24  ;;  %v953_v52 = vmul.f32 %v951_v49, %v2509_v47  ;;  %v952_v54 = vmul.f32 %v951_v49, %v2511_v51  ;;  %v3943_v49 = vstv %s2558_s25  ;;  %s3164_s18 = sld [smem:[#allocation5 + $0x53]] }
  0x59   :  { %379 = vrot.lane.b32.xlu1 %v374_v56, %s2300_s27  ;;  %v408_v56 = vstv %s2076_s14  ;;  %s2733_s14 = sld [smem:[#allocation5 + $0x12]] }
  0x5a   :  { %377 = vrot.lane.b32.xlu0 %v373_v57, %s2300_s27  ;;  %v410_v57 = vmul.f32 %v408_v56, %v2437_v53  ;;  %v409_v59 = vmul.f32 %v408_v56, %v2439_v55 }
  0x5d   :  { %666 = vrot.lane.b32.xlu1 %v661_v61, %s2299_s24  ;;  %v695_v61 = vstv %s2091_s15  ;;  %s2755_s15 = sld [smem:[#allocation5 + $0x4]] }
  0x5e   :  { %664 = vrot.lane.b32.xlu0 %v660_v62, %s2299_s24  ;;  %v697_v62 = vmul.f32 %v695_v61, %v2445_v58  ;;  %v696_v0 = vmul.f32 %v695_v61, %v2447_v60 }
  0x61   :  { %455 = vrot.lane.b32.xlu1 %v450_v2, %s2300_s27  ;;  %v2525_v2 = vld [vmem:[#allocation2 + $0x15] ss:$4 sm:$0x7] }
  0x62   :  { %453 = vrot.lane.b32.xlu0 %v449_v4, %s2300_s27  ;;  %v1030_v4 = vstv %s2106_s16  ;;  %s2785_s16 = sld [smem:[#allocation5 + $0x9]] }
  0x65   :  { %742 = vrot.lane.b32.xlu1 %v737_v11, %s2299_s24  ;;  %v1032_v11 = vmul.f32 %v1030_v4, %v2525_v2 }
  0x66   :  { %740 = vrot.lane.b32.xlu0 %v736_v12, %s2299_s24  ;;  %v1031_v12 = vmul.f32 %v1030_v4, %v2527_v8  ;;  %v2608_v4 = vld [vmem:[#allocation2] ss:$4 sm:$0x7] }
  0x69   :  { %531 = vrot.lane.b32.xlu1 %v526_v16, %s2300_s27 }
  0x6a   :  { %529 = vrot.lane.b32.xlu0 %v525_v17, %s2300_s27 }
  0x6d   :  { %818 = vrot.lane.b32.xlu1 %v813_v21, %s2299_s24 }
  0x6e   :  { %816 = vrot.lane.b32.xlu0 %v812_v22, %s2299_s24 }
  0x71   :  { %607 = vrot.lane.b32.xlu1 %v602_v28, %s3994_s10 }
  0x72   :  { %605 = vrot.lane.b32.xlu0 %v601_v29, %s3994_s10 }
  0x75   :  { %684 = vrot.lane.b32.xlu1 %v679_v31, %s3994_s10 }
  0x76   :  { %682 = vrot.lane.b32.xlu0 %v678_v32, %s3994_s10 }
  0x79   :  { %760 = vrot.lane.b32.xlu1 %v755_v34, %s3994_s10  ;;  %v430_v34 = vstv %s2541_s22  ;;  %s2304_s22 = smov 124  }
  0x7a   :  { %758 = vrot.lane.b32.xlu0 %v754_v35, %s3994_s10 }
  0x7d   :  { %836 = vrot.lane.b32.xlu1 %v831_v37, %s3994_s10 }
  0x7e   :  { %834 = vrot.lane.b32.xlu0 %v830_v38, %s3994_s10 }
  0x81   :  { %339 = vrot.lane.b32.xlu1 %v334_v40, %s2300_s27 }
  0x82   :  { %337 = vrot.lane.b32.xlu0 %v333_v41, %s2300_s27 }
  0x85   :  { %626 = vrot.lane.b32.xlu1 %v621_v44, %s2299_s24 }
  0x86   :  { %624 = vrot.lane.b32.xlu0 %v620_v46, %s2299_s24 }
  0x89   :  { %958 = vrot.lane.b32.xlu1 %v953_v52, %s2302_s17 }
  0x8a   :  { %956 = vrot.lane.b32.xlu0 %v952_v54, %s2302_s17 }
  0x8d   :  { %415 = vrot.lane.b32.xlu1 %v410_v57, %s2300_s27  ;;  %v3942_v57 = vstv %s2563_s26 }
  0x8e   :  { %413 = vrot.lane.b32.xlu0 %v409_v59, %s2300_s27 }
  0x91   :  { %702 = vrot.lane.b32.xlu1 %v697_v62, %s2299_s24 }
  0x92   :  { %700 = vrot.lane.b32.xlu0 %v696_v0, %s2299_s24 }
  0x95   :  { %1037 = vrot.lane.b32.xlu1 %v1032_v11, %s2302_s17 }
  0x96   :  { %1035 = vrot.lane.b32.xlu0 %v1031_v12, %s2302_s17 }
  0xb3   :  { %v919_v27 = vpop.permute.xlu1 %918 }
  0xb4   :  { %v264_v14 = vpop.permute.xlu0 %263  ;;  %v922_v35 = vrot.slane %v919_v27, 7 }
  0xb5   :  { %v267_v16 = vrot.slane %v264_v14, 7 }
  0xb6   :  { %v2574_v41 = vsel %vm924_vm1, %v922_v35, %v919_v27 }
  0xb7   :  { %v270_v17 = vsel %vm269_vm0, %v267_v16, %v264_v14  ;;  %v2590_v54 = vmul.f32 %v2574_v41, %v2511_v51  ;;  %v2720_v24 = vmul.f32 %v2690_v6, %v2574_v41 }
  0xb8   :  { %v2543_v21 = vpop.permute.xlu0 %1273  ;;  %v274_v22 = vmul.f32 %v270_v17, %v2423_v45  ;;  %v2547_v29 = vmul.f32 %v2439_v55, %v270_v17  ;;  %v2555_v33 = vmul.f32 %v2455_v1, %v270_v17  ;;  %v2560_v45 = vpop.permute.xlu1 %920  ;;  %v2567_v38 = vmul.f32 %v2471_v15, %v270_v17 }
  0xb9   :  { %v933_v12 = vmul.f32 %v3942_v57, %v2590_v54 }
  0xba   :  { %v278_v28 = vmul.f32 %v277_v19, %v274_v22  ;;  %v355_v32 = vmul.f32 %v354_v30, %v2547_v29  ;;  %v431_v37 = vmul.f32 %v430_v34, %v2555_v33  ;;  %v507_v46 = vmul.f32 %v506_v39, %v2567_v38 }
  0xbb   :  { %v315_v61 = vmul.f32 %v3943_v49, %v274_v22  ;;  %v128_v22 = vstv %s2585_s29  ;;  %s2901_s29 = sld [smem:[#allocation5 + $0x47]] }
  0xbc   :  { %v103_v31 = vpop.permute.xlu0 %102  ;;  %282 = vrot.lane.b32.xlu0 %v278_v28, %s2298_s21  ;;  %v2576_v42 = vpop.permute.xlu1 %1275  ;;  %v2634_v28 = vld [vmem:[#allocation2 + $0x10] ss:$4 sm:$0x7] }
  0xbd   :  { %v106_v52 = vrot.slane %v103_v31, 7 }
  0xc0   :  { %v266_v55 = vpop.permute.xlu0 %265  ;;  %359 = vrot.lane.b32.xlu0 %v355_v32, %s2298_s21  ;;  %v105_v11 = vpop.permute.xlu1 %104 }
  0xc1   :  { %v268_v36 = vrot.slane %v266_v55, 7  ;;  %v107_v14 = vrot.slane %v105_v11, 7 }
  0xc3   :  { %v271_v44 = vsel %vm269_vm0, %v268_v36, %v266_v55  ;;  %v2647_v55 = vmul.f32 %v2527_v8, %v2574_v41 }
  0xc4   :  { %v2570_v40 = vpop.permute.xlu0 %300  ;;  %435 = vrot.lane.b32.xlu0 %v431_v37, %s2298_s21  ;;  %v2593_v56 = vmul.f32 %v271_v44, %v2421_v43  ;;  %v2602_v0 = vmul.f32 %v2437_v53, %v271_v44  ;;  %v109_v43 = vsel %vm108_vm2, %v106_v52, %v103_v31  ;;  %v2623_v17 = vmul.f32 %v2453_v63, %v271_v44  ;;  %v2640_v31 = vld [vmem:[#allocation2 + $0x1] ss:$4 sm:$0x7] }
  0xc5   :  { %4018 = vst [vmem:[#allocation24_spill] sm:$0xff] %v2570_v40  ;;  %v2619_v53 = vmul.f32 %v109_v43, %v2608_v4  ;;  %v2654_v37 = vmul.f32 %v2469_v13, %v271_v44  ;;  %v923_v52 = vrot.slane %v2560_v45, 7  ;;  %v2670_v44 = vpop.permute.xlu1 %302 }
  0xc6   :  { %v279_v62 = vmul.f32 %v277_v19, %v2593_v56  ;;  %v356_v16 = vmul.f32 %v354_v30, %v2602_v0  ;;  %v3941_v19 = vstv %s2583_s28  ;;  %v110_v30 = vsel %vm108_vm2, %v107_v14, %v105_v11  ;;  %4021 = vst [vmem:[#allocation27_spill] sm:$0xff] %v2670_v44  ;;  %v2674_v14 = vld [vmem:[#allocation2 + $0x3] ss:$4 sm:$0x7] }
  0xc7   :  { %v391_v32 = vmul.f32 %v3941_v19, %v2547_v29  ;;  %v129_v35 = vmul.f32 %v128_v22, %v2619_v53  ;;  %v432_v36 = vmul.f32 %v430_v34, %v2623_v17  ;;  %v62_v29 = vstv %s2606_s0  ;;  %v2668_v34 = vld [vmem:[#allocation2 + $0x11] ss:$4 sm:$0x7]  ;;  %4022 = vst [vmem:[#allocation28_spill] sm:$0xff] %v2674_v14  ;;  %s2923_s0 = sld [smem:[#allocation5 + $0x4b]] }
  0xc8   :  { %511 = vrot.lane.b32.xlu0 %v507_v46, %s2298_s21  ;;  %v2596_v59 = vpop.permute.xlu0 %587  ;;  %284 = vrot.lane.b32.xlu1 %v279_v62, %s2298_s21  ;;  %v3949_v46 = vstv %s2604_s30  ;;  %v2662_v62 = vmul.f32 %v110_v30, %v2634_v28  ;;  %v2666_v11 = vmul.f32 %v2640_v31, %v109_v43  ;;  %v508_v7 = vmul.f32 %v506_v39, %v2654_v37 }
  0xc9   :  { %4019 = vst [vmem:[#allocation25_spill] sm:$0xff] %v2596_v59  ;;  %v131_v57 = vadd.f32 %v129_v35, %v62_v29  ;;  %v2696_v9 = vsel %vm924_vm1, %v923_v52, %v2560_v45  ;;  %v2701_v25 = vmul.f32 %v2668_v34, %v110_v30  ;;  %v2724_v3 = vpop.permute.xlu1 %589  ;;  %v2737_v44 = vmul.f32 %v2708_v26, %v110_v30 }
  0xca   :  { %v130_v35 = vmul.f32 %v128_v22, %v2662_v62  ;;  %v4028_v22 = vstv %s2626_s7  ;;  %4029 = vst [vmem:[#allocation34_spill] sm:$0xff] %v2724_v3  ;;  %v2731_v45 = vmul.f32 %v2696_v9, %v2509_v47  ;;  %v4033_v3 = vstv %s2638_s11 }
  0xcb   :  { %v467_v23 = vmul.f32 %v4028_v22, %v2555_v33  ;;  %4031 = vst [vmem:[#allocation35_spill] sm:$0xff] %v2737_v44  ;;  %v1278_v26 = vrot.slane %v2576_v42, 7 }
  0xcc   :  { %319 = vrot.lane.b32.xlu0 %v315_v61, %s2298_s21  ;;  %v2631_v27 = vpop.permute.xlu0 %377  ;;  %361 = vrot.lane.b32.xlu1 %v356_v16, %s2298_s21  ;;  %v2659_v61 = vld [vmem:[#allocation2 + $0x2] ss:$4 sm:$0x7]  ;;  %v2676_v16 = vld [vmem:[#allocation2 + $0x12] ss:$4 sm:$0x7]  ;;  %v132_v22 = vadd.f32 %v130_v35, %v62_v29  ;;  %v542_v35 = vstv %s2692_s13 }
  0xcd   :  { %4020 = vst [vmem:[#allocation26_spill] sm:$0xff] %v2631_v27  ;;  %4023 = vst [vmem:[#allocation29_spill] sm:$0xff] %v2676_v16  ;;  %v2684_v49 = vmul.f32 %v2659_v61, %v109_v43  ;;  %v2713_v52 = vmul.f32 %v2676_v16, %v110_v30  ;;  %v4030_v27 = vstv %s2558_s25  ;;  %v1277_v29 = vrot.slane %v2543_v21, 7  ;;  %s2854_s25 = sld [smem:[#allocation5 + $0xe]]  ;;  %s2305_s13 = smov 64  }
  0xcf   :  { %4025 = vst [vmem:[#allocation31_spill] sm:$0xff] %v2684_v49 }
  0xd0   :  { %937 = vrot.lane.b32.xlu0 %v933_v12, %s3996_s9  ;;  %437 = vrot.lane.b32.xlu1 %v432_v36, %s2298_s21  ;;  %v158_v12 = vstv %s2616_s6  ;;  %v2678_v19 = vpop.permute.xlu0 %664  ;;  %v2706_v36 = vmul.f32 %v2674_v14, %v109_v43  ;;  %s2946_s6 = sld [smem:[#allocation5 + $0x17]] }
  0xd1   :  { %4024 = vst [vmem:[#allocation30_spill] sm:$0xff] %v2678_v19  ;;  %v159_v39 = vmul.f32 %v158_v12, %v2666_v11  ;;  %v160_v40 = vmul.f32 %v158_v12, %v2701_v25  ;;  %v4034_v12 = vstv %s2563_s26  ;;  %s2868_s26 = sld [smem:[#allocation5 + $0x59]] }
  0xd2   :  { %4026 = vst [vmem:[#allocation32_spill] sm:$0xff] %v2706_v36  ;;  %v934_v30 = vmul.f32 %v4034_v12, %v2731_v45 }
  0xd3   :  { %v161_v33 = vadd.f32 %v159_v39, %v131_v57  ;;  %v1091_v57 = vmul.f32 %v4033_v3, %v2720_v24  ;;  %v2753_v39 = vld [vmem:[#allocation2 + $0x7] ss:$4 sm:$0x7]  ;;  %v1441_v16 = vstv %s2854_s25  ;;  %s3058_s25 = sld [smem:[#allocation5 + $0x4c]] }
  0xd4   :  { %395 = vrot.lane.b32.xlu0 %v391_v32, %s2298_s21  ;;  %v1013_v32 = vmul.f32 %v3949_v46, %v2647_v55  ;;  %v188_v46 = vstv %s2629_s8  ;;  %513 = vrot.lane.b32.xlu1 %v508_v7, %s2298_s21  ;;  %v316_v7 = vmul.f32 %v4030_v27, %v2593_v56  ;;  %v2739_v19 = vpop.permute.xlu0 %453  ;;  %v2769_v12 = vmul.f32 %v2753_v39, %v2574_v41  ;;  %s2963_s8 = sld [smem:[#allocation5 + $0x50]] }
  0xd5   :  { %v189_v43 = vmul.f32 %v188_v46, %v2684_v49  ;;  %4032 = vst [vmem:[#allocation36_spill] sm:$0xff] %v2739_v19  ;;  %v190_v59 = vmul.f32 %v188_v46, %v2713_v52  ;;  %v162_v46 = vadd.f32 %v160_v40, %v132_v22  ;;  %v2773_v40 = vsel %vm1279_vm3, %v1277_v29, %v2543_v21 }
  0xd6   :  { %v4040_v29 = vstv %s2604_s30  ;;  %s2914_s30 = sld [smem:[#allocation5 + $0x13]] }
  0xd7   :  { %v191_v56 = vadd.f32 %v189_v43, %v161_v33  ;;  %v2761_v43 = vpop.permute.xlu1 %379  ;;  %v543_v33 = vmul.f32 %v542_v35, %v2567_v38  ;;  %v2783_v38 = vld [vmem:[#allocation2 + $0x4] ss:$4 sm:$0x7] }
  0xd8   :  { %1017 = vrot.lane.b32.xlu0 %v1013_v32, %s3996_s9  ;;  %v218_v32 = vstv %s2649_s12  ;;  %321 = vrot.lane.b32.xlu1 %v316_v7, %s2298_s21  ;;  %4035 = vst [vmem:[#allocation37_spill] sm:$0xff] %v2761_v43  ;;  %v2764_v7 = vpop.permute.xlu0 %740  ;;  %v484_v43 = vstv %s2791_s19  ;;  %s2986_s12 = sld [smem:[#allocation5 + $0x3e]]  ;;  %s3027_s19 = sld [smem:[#allocation5 + $0x5a]] }
  0xd9   :  { %v219_v27 = vmul.f32 %v218_v32, %v2706_v36  ;;  %v220_v3 = vmul.f32 %v218_v32, %v2737_v44  ;;  %4036 = vst [vmem:[#allocation38_spill] sm:$0xff] %v2764_v7  ;;  %v4037_v32 = vstv %s2583_s28  ;;  %s2884_s28 = sld [smem:[#allocation5 + $0x25]] }
  0xda   :  { %v392_v22 = vmul.f32 %v4037_v32, %v2602_v0 }
  0xdb   :  { %v2798_v0 = vpop.permute.xlu1 %666 }
  0xdc   :  { %471 = vrot.lane.b32.xlu0 %v467_v23, %s2298_s21  ;;  %v2757_v23 = vadd.f32 %v219_v27, %v191_v56  ;;  %939 = vrot.lane.b32.xlu1 %v934_v30, %s3996_s9  ;;  %v192_v56 = vadd.f32 %v190_v59, %v162_v46  ;;  %v2780_v27 = vmul.f32 %v2525_v2, %v2696_v9  ;;  %v1287_v46 = vstv %s2755_s15  ;;  %s3010_s15 = sld [smem:[#allocation5 + $0x21]] }
  0xdd   :  { %v2796_v59 = vmul.f32 %v2773_v40, %v2783_v38  ;;  %4039 = vst [vmem:[#allocation40_spill] sm:$0xff] %v2798_v0 }
  0xde   :  { %v2788_v41 = vadd.f32 %v220_v3, %v192_v56  ;;  %v1014_v30 = vmul.f32 %v4040_v29, %v2780_v27  ;;  %v2804_v3 = vld [vmem:[#allocation2 + $0x5] ss:$4 sm:$0x7]  ;;  %v2809_v56 = vld [vmem:[#allocation2 + $0x16] ss:$4 sm:$0x7]  ;;  %v4042_v29 = vstv %s2626_s7 }
  0xdf   :  { %v1288_v32 = vmul.f32 %v1287_v46, %v2796_v59  ;;  %v468_v19 = vmul.f32 %v4042_v29, %v2623_v17  ;;  %v4045_v29 = vstv %s2638_s11  ;;  %s2953_s7 = sld [smem:[#allocation5 + $0x39]]  ;;  %s2975_s11 = sld [smem:[#allocation5 + $0x1c]] }
  0xe0   :  { %1095 = vrot.lane.b32.xlu0 %v1091_v57, %s3996_s9  ;;  %v1168_v57 = vstv %s2733_s14  ;;  %4038 = vst [vmem:[#allocation39_spill] sm:$0xff] %v2788_v41  ;;  %397 = vrot.lane.b32.xlu1 %v392_v22, %s2298_s21  ;;  %v2817_v22 = vmul.f32 %v2804_v3, %v2773_v40  ;;  %s2997_s14 = sld [smem:[#allocation5 + $0x55]] }
  0xe1   :  { %v1169_v21 = vmul.f32 %v1168_v57, %v2769_v12 }
  0xe4   :  { %547 = vrot.lane.b32.xlu0 %v543_v33, %s2298_s21  ;;  %v2806_v33 = vpop.permute.xlu0 %529  ;;  %1019 = vrot.lane.b32.xlu1 %v1014_v30, %s3996_s9  ;;  %v2828_v30 = vpop.permute.xlu1 %455 }
  0xe5   :  { %4041 = vst [vmem:[#allocation41_spill] sm:$0xff] %v2806_v33  ;;  %v2824_v33 = vmul.f32 %v2809_v56, %v2696_v9  ;;  %4043 = vst [vmem:[#allocation42_spill] sm:$0xff] %v2828_v30  ;;  %v485_v30 = vmul.f32 %v484_v43, %v2455_v1  ;;  %v2863_v1 = vld [vmem:[#allocation2 + $0x14] ss:$4 sm:$0x7] }
  0xe7   :  { %v1092_v0 = vmul.f32 %v4045_v29, %v2824_v33 }
  0xe8   :  { %1173 = vrot.lane.b32.xlu0 %v1169_v21, %s3996_s9  ;;  %v1365_v21 = vstv %s2785_s16  ;;  %473 = vrot.lane.b32.xlu1 %v468_v19, %s2298_s21  ;;  %v2834_v7 = vpop.permute.xlu0 %816  ;;  %v771_v19 = vstv %s2812_s20  ;;  %v2847_v41 = vpop.permute.xlu1 %742  ;;  %s3018_s16 = sld [smem:[#allocation5 + $0x43]]  ;;  %s3041_s20 = sld [smem:[#allocation5 + $0x26]] }
  0xe9   :  { %4044 = vst [vmem:[#allocation43_spill] sm:$0xff] %v2834_v7  ;;  %v1366_v17 = vmul.f32 %v1365_v21, %v2817_v22  ;;  %4046 = vst [vmem:[#allocation44_spill] sm:$0xff] %v2847_v41  ;;  %v544_v7 = vmul.f32 %v542_v35, %v2654_v37  ;;  %v1108_v37 = vstv %s2832_s23  ;;  %v2878_v35 = vld [vmem:[#allocation2 + $0x15] ss:$4 sm:$0x7]  ;;  %s3047_s23 = sld [smem:[#allocation5 + $0x48]] }
  0xec   :  { %1292 = vrot.lane.b32.xlu0 %v1288_v32, %s2304_s22  ;;  %v2842_v32 = vld [vmem:[#allocation2 + $0x17] ss:$4 sm:$0x7]  ;;  %1097 = vrot.lane.b32.xlu1 %v1092_v0, %s3996_s9  ;;  %v2860_v29 = vpop.permute.xlu0 %605  ;;  %v772_v0 = vmul.f32 %v771_v19, %v2463_v10 }
  0xed   :  { %v2852_v36 = vmul.f32 %v2842_v32, %v2696_v9  ;;  %4047 = vst [vmem:[#allocation45_spill] sm:$0xff] %v2860_v29 }
  0xef   :  { %v1170_v9 = vmul.f32 %v1168_v57, %v2852_v36 }
  0xf0   :  { %1370 = vrot.lane.b32.xlu0 %v1366_v17, %s2304_s22  ;;  %v2858_v17 = vsel %vm1279_vm3, %v1278_v26, %v2576_v42  ;;  %549 = vrot.lane.b32.xlu1 %v544_v7, %s2298_s21  ;;  %v2875_v42 = vld [vmem:[#allocation2 + $0x6] ss:$4 sm:$0x7]  ;;  %v2881_v7 = vpop.permute.xlu1 %531  ;;  %v2886_v57 = vpop.permute.xlu0 %682 }
  0xf1   :  { %v2873_v26 = vmul.f32 %v2858_v17, %v2863_v1  ;;  %4048 = vst [vmem:[#allocation46_spill] sm:$0xff] %v2881_v7  ;;  %4049 = vst [vmem:[#allocation47_spill] sm:$0xff] %v2886_v57  ;;  %v2890_v29 = vmul.f32 %v2875_v42, %v2773_v40 }
  0xf3   :  { %v1289_v41 = vmul.f32 %v1287_v46, %v2873_v26  ;;  %v1442_v57 = vmul.f32 %v1441_v16, %v2890_v29 }
  0xf4   :  { %489 = vrot.lane.b32.xlu0 %v485_v30, %s2300_s27  ;;  %v1109_v30 = vmul.f32 %v1108_v37, %v2690_v6  ;;  %1175 = vrot.lane.b32.xlu1 %v1170_v9, %s3996_s9  ;;  %v560_v9 = vstv %s2868_s26  ;;  %v2904_v7 = vpop.permute.xlu1 %818  ;;  %v2907_v46 = vpop.permute.xlu0 %758  ;;  %s3072_s26 = sld [smem:[#allocation5 + $0x18]] }
  0xf5   :  { %4050 = vst [vmem:[#allocation48_spill] sm:$0xff] %v2904_v7  ;;  %4051 = vst [vmem:[#allocation49_spill] sm:$0xff] %v2907_v46  ;;  %v561_v14 = vmul.f32 %v560_v9, %v2471_v15  ;;  %v1517_v46 = vstv %s2914_s30  ;;  %s3100_s30 = sld [smem:[#allocation5 + $0x56]] }
  0xf8   :  { %776 = vrot.lane.b32.xlu0 %v772_v0, %s2299_s24  ;;  %v2895_v0 = vmul.f32 %v2878_v35, %v2858_v17  ;;  %1294 = vrot.lane.b32.xlu1 %v1289_v41, %s2304_s22  ;;  %v486_v41 = vmul.f32 %v484_v43, %v2453_v63  ;;  %v2918_v7 = vpop.permute.xlu1 %607  ;;  %v2925_v15 = vpop.permute.xlu0 %834  ;;  %v2927_v63 = vld [vmem:[#allocation2 + $0x7] ss:$4 sm:$0x7]  ;;  %v1110_v43 = vmul.f32 %v1108_v37, %v2809_v56  ;;  %v637_v37 = vstv %s2923_s0  ;;  %s3113_s0 = sld [smem:[#allocation5 + $0x49]] }
  0xf9   :  { %4052 = vst [vmem:[#allocation50_spill] sm:$0xff] %v2918_v7  ;;  %4053 = vst [vmem:[#allocation51_spill] sm:$0xff] %v2925_v15 }
  0xfa   :  { %v1367_v44 = vmul.f32 %v1365_v21, %v2895_v0  ;;  %v773_v21 = vmul.f32 %v771_v19, %v2461_v5  ;;  %v2937_v19 = vmul.f32 %v2927_v63, %v2773_v40 }
  0xfc   :  { %1113 = vrot.lane.b32.xlu0 %v1109_v30, %s2302_s17  ;;  %1372 = vrot.lane.b32.xlu1 %v1367_v44, %s2304_s22  ;;  %v847_v30 = vstv %s2884_s28  ;;  %v2930_v44 = vld [vmem:[#allocation2 + $0x16] ss:$4 sm:$0x7]  ;;  %v1518_v40 = vmul.f32 %v1517_v46, %v2937_v19  ;;  %s3078_s28 = sld [smem:[#allocation5 + $0x51]] }
  0xfd   :  { %v848_v49 = vmul.f32 %v847_v30, %v2479_v20  ;;  %4054 = vst [vmem:[#allocation52_spill] sm:$0xff] %v2930_v44  ;;  %v2943_v15 = vmul.f32 %v2930_v44, %v2858_v17 }
 0x100   :  { %1446 = vrot.lane.b32.xlu0 %v1442_v57, %s2304_s22  ;;  %491 = vrot.lane.b32.xlu1 %v486_v41, %s2300_s27  ;;  %v1186_v57 = vstv %s2901_s29  ;;  %v2939_v41 = vpop.permute.xlu1 %684  ;;  %s3094_s29 = sld [smem:[#allocation5 + $0x1d]] }
 0x101   :  { %4055 = vst [vmem:[#allocation53_spill] sm:$0xff] %v2939_v41  ;;  %v638_v41 = vmul.f32 %v637_v37, %v2431_v50 }
 0x104   :  { %565 = vrot.lane.b32.xlu0 %v561_v14, %s2300_s27  ;;  %v1187_v14 = vmul.f32 %v1186_v57, %v2753_v39  ;;  %778 = vrot.lane.b32.xlu1 %v773_v21, %s2299_s24  ;;  %v1443_v21 = vmul.f32 %v1441_v16, %v2943_v15  ;;  %v2959_v7 = vpop.permute.xlu1 %760  ;;  %v849_v16 = vmul.f32 %v847_v30, %v2477_v18 }
 0x105   :  { %4057 = vst [vmem:[#allocation55_spill] sm:$0xff] %v2959_v7  ;;  %v1188_v30 = vmul.f32 %v1186_v57, %v2842_v32 }
 0x108   :  { %852 = vrot.lane.b32.xlu0 %v848_v49, %s2299_s24  ;;  %v2948_v49 = vpop.permute.xlu0 %337  ;;  %1115 = vrot.lane.b32.xlu1 %v1110_v43, %s2302_s17  ;;  %v2973_v7 = vpop.permute.xlu1 %836 }
 0x109   :  { %4056 = vst [vmem:[#allocation54_spill] sm:$0xff] %v2948_v49  ;;  %v970_v49 = vstv %s2946_s6  ;;  %4058 = vst [vmem:[#allocation56_spill] sm:$0xff] %v2973_v7  ;;  %s3116_s6 = sld [smem:[#allocation5 + $0x28]] }
 0x10a   :  { %v971_v50 = vmul.f32 %v970_v49, %v2590_v54 }
 0x10c   :  { %1191 = vrot.lane.b32.xlu0 %v1187_v14, %s2302_s17  ;;  %1448 = vrot.lane.b32.xlu1 %v1443_v21, %s2304_s22  ;;  %v562_v14 = vmul.f32 %v560_v9, %v2469_v13  ;;  %v2965_v43 = vpop.permute.xlu0 %624  ;;  %v2980_v9 = vld [vmem:[#allocation2 + $0x17] ss:$4 sm:$0x7]  ;;  %v713_v21 = vstv %s2963_s8  ;;  %s3122_s8 = sld [smem:[#allocation5 + $0x5]] }
 0x10d   :  { %4060 = vst [vmem:[#allocation58_spill] sm:$0xff] %v2980_v9  ;;  %v2990_v54 = vmul.f32 %v2980_v9, %v2858_v17  ;;  %v639_v17 = vmul.f32 %v637_v37, %v2429_v48  ;;  %v972_v48 = vmul.f32 %v970_v49, %v2731_v45  ;;  %v715_v45 = vmul.f32 %v713_v21, %v2445_v58 }
 0x10e   :  { %v1459_v49 = vstv %s3018_s16  ;;  %s3140_s16 = sld [smem:[#allocation5 + $0x5b]] }
 0x110   :  { %1522 = vrot.lane.b32.xlu0 %v1518_v40, %s2304_s22  ;;  %567 = vrot.lane.b32.xlu1 %v562_v14, %s2300_s27  ;;  %v1306_v40 = vstv %s2953_s7  ;;  %v2977_v13 = vpop.permute.xlu0 %956  ;;  %v714_v14 = vmul.f32 %v713_v21, %v2447_v60  ;;  %s3118_s7 = sld [smem:[#allocation5]] }
 0x111   :  { %4059 = vst [vmem:[#allocation57_spill] sm:$0xff] %v2977_v13  ;;  %v1048_v13 = vstv %s2975_s11  ;;  %s3128_s11 = sld [smem:[#allocation5 + $0x22]] }
 0x112   :  { %v1049_v60 = vmul.f32 %v1048_v13, %v2647_v55  ;;  %v1050_v21 = vmul.f32 %v1048_v13, %v2780_v27  ;;  %v1535_v13 = vstv %s3047_s23  ;;  %s3151_s23 = sld [smem:[#allocation5 + $0x3a]] }
 0x114   :  { %642 = vrot.lane.b32.xlu0 %v638_v41, %s3994_s10  ;;  %v1307_v41 = vmul.f32 %v1306_v40, %v2783_v38  ;;  %854 = vrot.lane.b32.xlu1 %v849_v16, %s2299_s24  ;;  %v2999_v57 = vpop.permute.xlu0 %413  ;;  %v1519_v16 = vmul.f32 %v1517_v46, %v2990_v54 }
 0x118   :  { %975 = vrot.lane.b32.xlu0 %v971_v50, %s3996_s9  ;;  %v2994_v50 = vpop.permute.xlu1 %339  ;;  %1193 = vrot.lane.b32.xlu1 %v1188_v30, %s2302_s17  ;;  %v3012_v30 = vpop.permute.xlu0 %700 }
 0x11c   :  { %1311 = vrot.lane.b32.xlu0 %v1307_v41, %s2305_s13  ;;  %1524 = vrot.lane.b32.xlu1 %v1519_v16, %s2304_s22  ;;  %v1383_v41 = vstv %s2986_s12  ;;  %v3008_v7 = vpop.permute.xlu1 %626  ;;  %v1308_v16 = vmul.f32 %v1306_v40, %v2863_v1  ;;  %v1460_v40 = vmul.f32 %v1459_v49, %v2875_v42  ;;  %s3130_s12 = sld [smem:[#allocation5 + $0xa]] }
 0x11d   :  { %v1384_v46 = vmul.f32 %v1383_v41, %v2804_v3 }
 0x120   :  { %718 = vrot.lane.b32.xlu0 %v714_v14, %s3994_s10  ;;  %644 = vrot.lane.b32.xlu1 %v639_v17, %s3994_s10  ;;  %v789_v14 = vstv %s2997_s14  ;;  %v3023_v37 = vpop.permute.xlu1 %958  ;;  %v3029_v17 = vpop.permute.xlu0 %1035  ;;  %s3132_s14 = sld [smem:[#allocation5 + $0x5e]] }
 0x121   :  { %v790_v55 = vmul.f32 %v789_v14, %v2463_v10  ;;  %4061 = vst [vmem:[#allocation59_spill] sm:$0xff] %v3023_v37  ;;  %4062 = vst [vmem:[#allocation60_spill] sm:$0xff] %v3029_v17  ;;  %v1204_v17 = vstv %s3041_s20  ;;  %v791_v27 = vmul.f32 %v789_v14, %v2461_v5  ;;  %v4001_v37 = vstv %s3072_s26  ;;  %s3144_s20 = sld [smem:[#allocation5 + $0x35]] }
 0x124   :  { %1053 = vrot.lane.b32.xlu0 %v1049_v60, %s3996_s9  ;;  %977 = vrot.lane.b32.xlu1 %v972_v48, %s3996_s9  ;;  %v1126_v60 = vstv %s3010_s15  ;;  %v3039_v48 = vpop.permute.xlu1 %415  ;;  %s3135_s15 = sld [smem:[#allocation5 + $0x4e]] }
 0x125   :  { %4063 = vst [vmem:[#allocation61_spill] sm:$0xff] %v3039_v48  ;;  %v194_v48 = vstv %s3164_s18  ;;  %s3240_s18 = sld [smem:[#allocation5 + $0x57]] }
 0x128   :  { %1388 = vrot.lane.b32.xlu0 %v1384_v46, %s2305_s13  ;;  %1313 = vrot.lane.b32.xlu1 %v1308_v16, %s2305_s13  ;;  %v1127_v46 = vmul.f32 %v1126_v60, %v2720_v24  ;;  %v3054_v16 = vpop.permute.xlu1 %702 }
 0x129   :  { %4064 = vst [vmem:[#allocation62_spill] sm:$0xff] %v3054_v16  ;;  %v4073_v16 = vstv %s3078_s28 }
 0x12c   :  { %794 = vrot.lane.b32.xlu0 %v790_v55, %s3994_s10  ;;  %720 = vrot.lane.b32.xlu1 %v715_v45, %s3994_s10  ;;  %v865_v55 = vstv %s3027_s19  ;;  %s3142_s19 = sld [smem:[#allocation5 + $0x5d]] }
 0x12d   :  { %v866_v24 = vmul.f32 %v865_v55, %v2479_v20 }
 0x12e   :  { %v3036_v10 = vpop.permute.xlu0 %282 }
 0x130   :  { %1131 = vrot.lane.b32.xlu0 %v1127_v46, %s3996_s9  ;;  %1055 = vrot.lane.b32.xlu1 %v1050_v21, %s3996_s9  ;;  %v1385_v46 = vmul.f32 %v1383_v41, %v2878_v35  ;;  %v3070_v21 = vpop.permute.xlu1 %1037  ;;  %v1536_v41 = vmul.f32 %v1535_v13, %v2927_v63 }
 0x131   :  { %4065 = vst [vmem:[#allocation63_spill] sm:$0xff] %v3070_v21 }
 0x132   :  { %v3049_v58 = vpop.permute.xlu0 %359 }
 0x134   :  { %1464 = vrot.lane.b32.xlu0 %v1460_v40, %s2305_s13  ;;  %1390 = vrot.lane.b32.xlu1 %v1385_v46, %s2305_s13  ;;  %v1205_v40 = vmul.f32 %v1204_v17, %v2769_v12  ;;  %v1128_v12 = vmul.f32 %v1126_v60, %v2824_v33  ;;  %v867_v33 = vmul.f32 %v865_v55, %v2477_v18 }
 0x135   :  { %v1206_v55 = vmul.f32 %v1204_v17, %v2852_v36 }
 0x136   :  { %v3060_v45 = vpop.permute.xlu0 %435 }
 0x138   :  { %870 = vrot.lane.b32.xlu0 %v866_v24, %s3994_s10  ;;  %796 = vrot.lane.b32.xlu1 %v791_v27, %s3994_s10  ;;  %v988_v24 = vstv %s3058_s25  ;;  %v1461_v27 = vmul.f32 %v1459_v49, %v2930_v44  ;;  %v1326_v49 = vmul.f32 %v4001_v37, %v2796_v59  ;;  %s3153_s25 = sld [smem:[#allocation5 + $0x3f]]  ;;  %v164_v37 = vstv %s3135_s15  ;;  %s2146_s15 = sld [smem:[#allocation5 + $0x30]] }
 0x139   :  { %v989_v46 = vmul.f32 %v988_v24, %v2511_v51  ;;  %v4000_v51 = vstv %s3078_s28  ;;  %s4137_s28 = smov 125  }
 0x13a   :  { %v3067_v20 = vpop.permute.xlu0 %511  ;;  %v3082_v14 = vpop.permute.xlu1 %284 }
 0x13c   :  { %1209 = vrot.lane.b32.xlu0 %v1205_v40, %s3996_s9  ;;  %1133 = vrot.lane.b32.xlu1 %v1128_v12, %s3996_s9  ;;  %v1067_v12 = vmul.f32 %v4000_v51, %v2527_v8  ;;  %v1537_v8 = vmul.f32 %v1535_v13, %v2980_v9  ;;  %v66_v51 = vstv %s3132_s14  ;;  %s2137_s14 = sld [smem:[#allocation5 + $0x2c]] }
 0x13e   :  { %v3080_v5 = vpop.permute.xlu0 %319  ;;  %v3091_v21 = vpop.permute.xlu1 %361 }
 0x13f   :  { %v323_v9 = vrot.slane %v3080_v5, 1 }
 0x140   :  { %1540 = vrot.lane.b32.xlu0 %v1536_v41, %s2305_s13  ;;  %1466 = vrot.lane.b32.xlu1 %v1461_v27, %s2305_s13  ;;  %v3998_v27 = vstv %s3100_s30 }
 0x142   :  { %v3089_v40 = vpop.permute.xlu0 %937  ;;  %v3107_v41 = vpop.permute.xlu1 %437 }
 0x143   :  { %4066 = vst [vmem:[#allocation64_spill] sm:$0xff] %v3089_v40 }
 0x144   :  { %993 = vrot.lane.b32.xlu0 %v989_v46, %s2302_s17  ;;  %872 = vrot.lane.b32.xlu1 %v867_v33, %s3994_s10  ;;  %v3999_v46 = vstv %s3094_s29  ;;  %v1145_v33 = vmul.f32 %v3998_v27, %v2690_v6  ;;  %s3169_s10 = sld [smem:[#allocation5 + $0xf]]  ;;  %v60_v27 = vstv %s3116_s6  ;;  %s3190_s6 = sld [smem:[#allocation5 + $0x4d]] }
 0x145   :  { %v1402_v17 = vmul.f32 %v3999_v46, %v2817_v22  ;;  %v990_v22 = vmul.f32 %v988_v24, %v2509_v47  ;;  %v146_v46 = vstv %s3122_s8  ;;  %v4071_v6 = vstv %s3072_s26  ;;  %s3218_s26 = sld [smem:[#allocation5 + $0x52]]  ;;  %s2154_s8 = sld [smem:[#allocation5 + $0x68]] }
 0x146   :  { %v3102_v60 = vpop.permute.xlu0 %395  ;;  %v3124_v59 = vpop.permute.xlu1 %513  ;;  %v1327_v44 = vmul.f32 %v4071_v6, %v2873_v26  ;;  %v1068_v26 = vmul.f32 %v4073_v16, %v2525_v2 }
 0x148   :  { %1330 = vrot.lane.b32.xlu0 %v1326_v49, %s2304_s22  ;;  %1211 = vrot.lane.b32.xlu1 %v1206_v55, %s3996_s9  ;;  %v134_v49 = vstv %s3113_s0  ;;  %s3173_s9 = sld [smem:[#allocation5 + $0x27]]  ;;  %s3181_s0 = sld [smem:[#allocation5 + $0x58]] }
 0x149   :  { %v135_v47 = vmul.f32 %v134_v49, %v2608_v4 }
 0x14a   :  { %v3120_v18 = vpop.permute.xlu0 %1017  ;;  %v3155_v13 = vpop.permute.xlu1 %321 }
 0x14b   :  { %4067 = vst [vmem:[#allocation65_spill] sm:$0xff] %v3120_v18  ;;  %v4072_v18 = vstv %s3140_s16 }
 0x14c   :  { %1071 = vrot.lane.b32.xlu0 %v1067_v12, %s2302_s17  ;;  %1542 = vrot.lane.b32.xlu1 %v1537_v8, %s2305_s13  ;;  %v116_v12 = vstv %s3118_s7  ;;  %v176_v8 = vstv %s3130_s12  ;;  %s2152_s7 = sld [smem:[#allocation5 + $0x66]]  ;;  %s2138_s12 = sld [smem:[#allocation5 + $0x2d]] }
 0x14d   :  { %v117_v24 = vmul.f32 %v116_v12, %v2619_v53  ;;  %v399_v53 = vrot.slane %v3102_v60, 1 }
 0x14e   :  { %v3146_v36 = vpop.permute.xlu0 %471  ;;  %v224_v16 = vstv %s3181_s0  ;;  %s2308_s0 = smov 98  }
 0x150   :  { %1406 = vrot.lane.b32.xlu0 %v1402_v17, %s2304_s22  ;;  %v3175_v17 = vpop.permute.xlu1 %939  ;;  %995 = vrot.lane.b32.xlu1 %v990_v22, %s2302_s17 }
 0x151   :  { %4069 = vst [vmem:[#allocation67_spill] sm:$0xff] %v3175_v17  ;;  %v118_v17 = vmul.f32 %v116_v12, %v2662_v62  ;;  %v137_v12 = vadd.f32 %v135_v47, %v66_v51  ;;  %v206_v47 = vstv %s3169_s10  ;;  %v475_v62 = vrot.slane %v3146_v36, 1  ;;  %s3257_s10 = sld [smem:[#allocation5 + $0x5c]] }
 0x152   :  { %v3171_v55 = vpop.permute.xlu0 %1095 }
 0x153   :  { %4068 = vst [vmem:[#allocation66_spill] sm:$0xff] %v3171_v55  ;;  %v165_v55 = vmul.f32 %v164_v37, %v2640_v31  ;;  %v120_v6 = vadd.f32 %v118_v17, %v60_v27  ;;  %v148_v31 = vmul.f32 %v146_v46, %v2701_v25  ;;  %v166_v25 = vmul.f32 %v164_v37, %v2668_v34 }
 0x154   :  { %1149 = vrot.lane.b32.xlu0 %v1145_v33, %s2302_s17  ;;  %v4070_v33 = vstv %s3128_s11  ;;  %v3201_v22 = vpop.permute.xlu1 %397  ;;  %1332 = vrot.lane.b32.xlu1 %v1327_v44, %s2304_s22  ;;  %v325_v44 = vsel %vm269_vm0, %v3080_v5, %v323_v9  ;;  %v195_v17 = vmul.f32 %v194_v48, %v2659_v61  ;;  %v1343_v9 = vstv %s3190_s6  ;;  %s2309_s6 = smov [#allocation11]  }
 0x155   :  { %v1478_v40 = vmul.f32 %v4070_v33, %v2890_v29  ;;  %v1223_v29 = vmul.f32 %v4072_v18, %v2753_v39  ;;  %v119_v33 = vadd.f32 %v117_v24, %v60_v27  ;;  %v1553_v39 = vstv %s3173_s9  ;;  %s2143_s9 = sld [smem:[#allocation5 + $0x62]] }
 0x156   :  { %v548_v4 = vpop.permute.xlu0 %547  ;;  %v147_v18 = vmul.f32 %v146_v46, %v2666_v11  ;;  %v136_v24 = vmul.f32 %v134_v49, %v2634_v28  ;;  %v167_v27 = vadd.f32 %v165_v55, %v137_v12  ;;  %v401_v46 = vsel %vm269_vm0, %v3102_v60, %v399_v53 }
 0x157   :  { %v551_v49 = vrot.slane %v548_v4, 1  ;;  %v178_v5 = vmul.f32 %v176_v8, %v2713_v52  ;;  %v150_v37 = vadd.f32 %v148_v31, %v120_v6  ;;  %v329_v61 = vadd.f32 %v325_v44, %v2757_v23  ;;  %v4076_v31 = vld [vmem:[#allocation28_spill] sm:$0xff] }
 0x158   :  { %1482 = vrot.lane.b32.xlu0 %v1478_v40, %s2304_s22  ;;  %v3230_v2 = vpop.permute.xlu1 %1019  ;;  %v149_v11 = vadd.f32 %v147_v18, %v119_v33  ;;  %1073 = vrot.lane.b32.xlu1 %v1068_v26, %s2302_s17  ;;  %v1554_v12 = vmul.f32 %v1553_v39, %v2937_v19  ;;  %v138_v53 = vadd.f32 %v136_v24, %v66_v51  ;;  %v4075_v52 = vstv %s3094_s29  ;;  %s2144_s29 = sld [smem:[#allocation5 + $0x63]] }
 0x159   :  { %v477_v33 = vsel %vm269_vm0, %v3146_v36, %v475_v62  ;;  %v1403_v6 = vmul.f32 %v4075_v52, %v2895_v0  ;;  %v197_v23 = vadd.f32 %v195_v17, %v167_v27  ;;  %v225_v19 = vmul.f32 %v224_v16, %v4076_v31 }
 0x15a   :  { %v3222_v40 = vpop.permute.xlu0 %1173  ;;  %v405_v18 = vadd.f32 %v401_v46, %v329_v61  ;;  %v1344_v51 = vmul.f32 %v1343_v9, %v2783_v38  ;;  %v553_v36 = vsel %vm269_vm0, %v548_v4, %v551_v49  ;;  %v4077_v0 = vstv %s3100_s30  ;;  %v4079_v46 = vld [vmem:[#allocation35_spill] sm:$0xff]  ;;  %v4080_v4 = vld [vmem:[#allocation29_spill] sm:$0xff]  ;;  %s2151_s30 = sld [smem:[#allocation5 + $0x65]] }
 0x15b   :  { %v1146_v62 = vmul.f32 %v4077_v0, %v2809_v56  ;;  %v1419_v24 = vstv %s3218_s26  ;;  %v4078_v44 = vstv %s3144_s20  ;;  %v180_v17 = vadd.f32 %v178_v5, %v150_v37  ;;  %s2037_s26 = sshll.u32 %s2309_s6, 4  ;;  %s2038_s26 = int_to_ptr.vmem [resolvable:$true] %s2037_s26 }
 0x15c   :  { %1227 = vrot.lane.b32.xlu0 %v1223_v29, %s2302_s17  ;;  %v4074_v29 = vld [vmem:[#allocation31_spill] sm:$0xff]  ;;  %v3252_v26 = vpop.permute.xlu1 %473  ;;  %1408 = vrot.lane.b32.xlu1 %v1403_v6, %s2304_s22  ;;  %v3275_v27 = vmul.f32 %v4078_v44, %v2634_v28  ;;  %v208_v61 = vmul.f32 %v206_v47, %v4079_v46  ;;  %v3283_v49 = vmul.f32 %v194_v48, %v4080_v4  ;;  %v628_v56 = vrot.slane %v2965_v43, 7  ;;  %p2263_p6 = scmp.lt.s32.totalorder %s2038_s26, %s2038_s26 }
 0x15d   :  { %v177_v60 = vmul.f32 %v176_v8, %v4074_v29  ;;  %v4081_v29 = vld [vmem:[#allocation32_spill] sm:$0xff]  ;;  %v3289_v28 = vadd.f32 %v225_v19, %v197_v23  ;;  %v286_v5 = vrot.slane %v3036_v10, 1  ;;  %v1420_v48 = vmul.f32 %v1419_v24, %v2804_v3 }
 0x15e   :  { %v3244_v55 = vpop.permute.xlu0 %1292  ;;  %v704_v23 = vrot.slane %v3012_v30, 7  ;;  %v363_v19 = vrot.slane %v3049_v58, 1  ;;  %v630_v3 = vsel %vm108_vm2, %v628_v56, %v2965_v43  ;;  %v1571_v46 = vstv %s3257_s10 }
 0x15f   :  { %v179_v8 = vadd.f32 %v177_v60, %v149_v11  ;;  %v3280_v11 = vadd.f32 %v166_v25, %v138_v53  ;;  %v207_v60 = vmul.f32 %v206_v47, %v4081_v29  ;;  %v4082_v25 = vld [vmem:[#allocation34_spill] sm:$0xff]  ;;  %v1495_v47 = vstv %s3240_s18 }
 0x160   :  { %1558 = vrot.lane.b32.xlu0 %v1554_v12, %s2304_s22  ;;  %v481_v12 = vadd.f32 %v477_v33, %v405_v18  ;;  %v3287_v52 = vpop.permute.xlu1 %1097  ;;  %v592_v53 = vrot.slane %v4082_v25, 7  ;;  %v4083_v33 = vld [vmem:[#allocation54_spill] sm:$0xff]  ;;  %1151 = vrot.lane.b32.xlu1 %v1146_v62, %s2302_s17  ;;  %v210_v18 = vadd.f32 %v208_v61, %v180_v17  ;;  %v1555_v62 = vmul.f32 %v1553_v39, %v2990_v54 }
 0x161   :  { %v341_v6 = vrot.slane %v4083_v33, 1  ;;  %v209_v31 = vadd.f32 %v207_v60, %v179_v8  ;;  %v287_v8 = vrot.slane %v3082_v14, 1  ;;  %v288_v17 = vsel %vm269_vm0, %v3036_v10, %v286_v5 }
 0x162   :  { %v3278_v38 = vpop.permute.xlu0 %1370  ;;  %v557_v37 = vadd.f32 %v553_v36, %v481_v12  ;;  %v324_v61 = vrot.slane %v3155_v13, 1  ;;  %v1496_v12 = vmul.f32 %v1495_v47, %v2875_v42  ;;  %v439_v56 = vrot.slane %v3060_v45, 1 }
 0x163   :  { %v343_v43 = vsel %vm306_vm4, %v4083_v33, %v341_v6  ;;  %v364_v54 = vrot.slane %v3091_v21, 1  ;;  %v4085_v39 = vstv %s3140_s16  ;;  %v706_v29 = vsel %vm108_vm2, %v704_v23, %v3012_v30  ;;  %s2139_s16 = sld [smem:[#allocation5 + $0x2e]] }
 0x164   :  { %1348 = vrot.lane.b32.xlu0 %v1344_v51, %s2305_s13  ;;  %v4084_v51 = vstv %s3128_s11  ;;  %v550_v44 = vpop.permute.xlu1 %549  ;;  %v1224_v10 = vmul.f32 %v4085_v39, %v2842_v32  ;;  %v365_v60 = vsel %vm269_vm0, %v3049_v58, %v363_v19  ;;  %v400_v42 = vrot.slane %v3201_v22, 1  ;;  %v4087_v39 = vld [vmem:[#allocation25_spill] sm:$0xff]  ;;  %s2153_s11 = sld [smem:[#allocation5 + $0x67]] }
 0x165   :  { %v1479_v36 = vmul.f32 %v4084_v51, %v2943_v15  ;;  %v634_v15 = vadd.f32 %v630_v3, %v557_v37  ;;  %v1572_v37 = vmul.f32 %v1571_v46, %v2927_v63  ;;  %v289_v33 = vsel %vm269_vm0, %v3082_v14, %v287_v8 }
 0x166   :  { %v3305_v0 = vpop.permute.xlu0 %489  ;;  %v515_v6 = vrot.slane %v3067_v20, 1  ;;  %v440_v30 = vrot.slane %v3107_v41, 1  ;;  %v326_v58 = vsel %vm269_vm0, %v3155_v13, %v324_v61  ;;  %v476_v23 = vrot.slane %v3252_v26, 1 }
 0x167   :  { %1484 = vrot.lane.b32.xlu1 %v1479_v36, %s2304_s22  ;;  %v710_v19 = vadd.f32 %v706_v29, %v634_v15  ;;  %v366_v14 = vsel %vm269_vm0, %v3091_v21, %v364_v54  ;;  %v516_v3 = vrot.slane %v3124_v59, 1  ;;  %v402_v13 = vsel %vm269_vm0, %v3201_v22, %v400_v42 }
 0x168   :  { %1424 = vrot.lane.b32.xlu0 %v1420_v48, %s2305_s13  ;;  %v292_v48 = vadd.f32 %v288_v17, %v209_v31  ;;  %v3340_v51 = vpop.permute.xlu1 %1175  ;;  %v441_v31 = vsel %vm269_vm0, %v3060_v45, %v439_v56  ;;  %v552_v8 = vrot.slane %v550_v44, 1  ;;  %v417_v45 = vrot.slane %v2999_v57, 1 }
 0x169   :  { %v293_v15 = vadd.f32 %v289_v33, %v210_v18  ;;  %v517_v21 = vsel %vm269_vm0, %v3067_v20, %v515_v6  ;;  %v442_v22 = vsel %vm269_vm0, %v3107_v41, %v440_v30  ;;  %v493_v20 = vrot.slane %v3305_v0, 1  ;;  %v4088_v6 = vld [vmem:[#allocation30_spill] sm:$0xff] }
 0x16a   :  { %v777_v5 = vpop.permute.xlu0 %776  ;;  %v369_v63 = vadd.f32 %v365_v60, %v292_v48  ;;  %v478_v60 = vsel %vm269_vm0, %v3252_v26, %v476_v23  ;;  %v347_v48 = vadd.f32 %v343_v43, %v3289_v28  ;;  %v518_v41 = vsel %vm269_vm0, %v3124_v59, %v516_v3  ;;  %v4090_v28 = vld [vmem:[#allocation33_spill] sm:$0xff] }
 0x16b   :  { %v780_v32 = vrot.slane %v777_v5, 7  ;;  %1229 = vrot.lane.b32.xlu1 %v1224_v10, %s2302_s17  ;;  %v591_v10 = vrot.slane %v4087_v39, 7  ;;  %v370_v18 = vadd.f32 %v366_v14, %v293_v15  ;;  %v554_v26 = vsel %vm269_vm0, %v550_v44, %v552_v8 }
 0x16c   :  { %1500 = vrot.lane.b32.xlu0 %v1496_v12, %s2305_s13  ;;  %v4086_v12 = vld [vmem:[#allocation39_spill] sm:$0xff]  ;;  %v3364_v54 = vpop.permute.xlu1 %1294  ;;  %v445_v29 = vadd.f32 %v441_v31, %v369_v63  ;;  %v419_v30 = vsel %vm306_vm4, %v2999_v57, %v417_v45  ;;  %v226_v44 = vmul.f32 %v224_v16, %v4090_v28  ;;  %v629_v43 = vrot.slane %v3008_v7, 7  ;;  %v4092_v45 = vld [vmem:[#allocation38_spill] sm:$0xff] }
 0x16d   :  { %v782_v36 = vsel %vm108_vm2, %v780_v32, %v777_v5  ;;  %v330_v56 = vadd.f32 %v326_v58, %v4086_v12  ;;  %v1345_v5 = vmul.f32 %v1343_v9, %v2863_v1  ;;  %v668_v32 = vrot.slane %v4088_v6, 7  ;;  %v4098_v28 = vld [vmem:[#allocation58_spill] sm:$0xff] }
 0x16e   :  { %v3356_v17 = vadd.f32 %v782_v36, %v710_v19  ;;  %v3358_v61 = vpop.permute.xlu0 %1113  ;;  %v521_v33 = vadd.f32 %v517_v21, %v445_v29  ;;  %v4089_v1 = vstv %s3151_s23  ;;  %v593_v59 = vsel %vm108_vm2, %v591_v10, %v4087_v39  ;;  %v4094_v10 = vld [vmem:[#allocation52_spill] sm:$0xff] }
 0x16f   :  { %v406_v42 = vadd.f32 %v402_v13, %v330_v56  ;;  %1560 = vrot.lane.b32.xlu1 %v1555_v62, %s2304_s22  ;;  %v446_v62 = vadd.f32 %v442_v22, %v370_v18  ;;  %v3391_v9 = vmul.f32 %v4089_v1, %v2668_v34  ;;  %v495_v57 = vsel %vm306_vm4, %v3305_v0, %v493_v20  ;;  %v4091_v13 = vld [vmem:[#allocation40_spill] sm:$0xff] }
 0x170   :  { %1576 = vrot.lane.b32.xlu0 %v1572_v37, %s2305_s13  ;;  %v3386_v23 = vpop.permute.xlu1 %1372  ;;  %v1421_v31 = vmul.f32 %v1419_v24, %v2878_v35  ;;  %v594_v34 = vsel %vm108_vm2, %v592_v53, %v4082_v25  ;;  %v198_v16 = vadd.f32 %v3283_v49, %v3280_v11  ;;  %v423_v14 = vadd.f32 %v419_v30, %v347_v48  ;;  %v4093_v49 = vld [vmem:[#allocation62_spill] sm:$0xff]  ;;  %v4096_v48 = vld [vmem:[#allocation44_spill] sm:$0xff] }
 0x171   :  { %v482_v58 = vadd.f32 %v478_v60, %v406_v42  ;;  %v522_v19 = vadd.f32 %v518_v41, %v446_v62  ;;  %v597_v36 = vadd.f32 %v593_v59, %v521_v33  ;;  %v669_v0 = vrot.slane %v4091_v13, 7 }
 0x172   :  { %v3381_v37 = vpop.permute.xlu0 %1446  ;;  %v670_v8 = vsel %vm108_vm2, %v668_v32, %v4088_v6  ;;  %v744_v35 = vrot.slane %v4092_v45, 7  ;;  %v342_v25 = vrot.slane %v2994_v50, 1  ;;  %v631_v11 = vsel %vm108_vm2, %v629_v43, %v3008_v7  ;;  %v4097_v6 = vld [vmem:[#allocation43_spill] sm:$0xff]  ;;  %v4099_v43 = vld [vmem:[#allocation61_spill] sm:$0xff] }
 0x173   :  { %v558_v63 = vadd.f32 %v554_v26, %v482_v58  ;;  %1350 = vrot.lane.b32.xlu1 %v1345_v5, %s2305_s13  ;;  %v705_v53 = vrot.slane %v4093_v49, 7  ;;  %v499_v21 = vadd.f32 %v495_v57, %v423_v14  ;;  %v598_v12 = vadd.f32 %v594_v34, %v522_v19  ;;  %v2197_v34 = vld [vmem:[#allocation2 + $0x13] ss:$4 sm:$0x7] }
 0x174   :  { %v3415_v24 = vpop.permute.xlu1 %491  ;;  %v1497_v29 = vmul.f32 %v1495_v47, %v4094_v10  ;;  %v4095_v22 = vstv %s3153_s25  ;;  %v228_v18 = vadd.f32 %v226_v44, %v198_v16  ;;  %v674_v42 = vadd.f32 %v670_v8, %v597_v36  ;;  %v2198_v36 = vld [vmem:[#allocation2] ss:$4 sm:$0x7]  ;;  %v2200_v10 = vld [vmem:[#allocation2 + $0x2] ss:$4 sm:$0x7] }
 0x175   :  { %v635_v56 = vadd.f32 %v631_v11, %v558_v63  ;;  %v3429_v60 = vmul.f32 %v4095_v22, %v4080_v4  ;;  %v671_v5 = vsel %vm108_vm2, %v669_v0, %v4091_v13  ;;  %v745_v33 = vrot.slane %v4096_v48, 7  ;;  %s2145_s25 = sld [smem:[#allocation5 + $0x2f]] }
 0x176   :  { %v566_v3 = vpop.permute.xlu0 %565  ;;  %v746_v41 = vsel %vm108_vm2, %v744_v35, %v4092_v45  ;;  %v820_v4 = vrot.slane %v4097_v6, 7  ;;  %v344_v32 = vsel %vm306_vm4, %v2994_v50, %v342_v25  ;;  %v707_v30 = vsel %vm108_vm2, %v705_v53, %v4093_v49  ;;  %v4104_v25 = vld [vmem:[#allocation48_spill] sm:$0xff]  ;;  %v2199_v49 = vld [vmem:[#allocation2 + $0x1] ss:$4 sm:$0x7] }
 0x177   :  { %v569_v15 = vrot.slane %v566_v3, 1  ;;  %1426 = vrot.lane.b32.xlu1 %v1421_v31, %s2305_s13  ;;  %v675_v58 = vadd.f32 %v671_v5, %v598_v12  ;;  %v711_v1 = vadd.f32 %v707_v30, %v635_v56  ;;  %v1573_v44 = vmul.f32 %v1571_v46, %v4098_v28  ;;  %v4102_v46 = vld [vmem:[#allocation64_spill] sm:$0xff] }
 0x178   :  { %v779_v26 = vpop.permute.xlu1 %778  ;;  %v418_v19 = vrot.slane %v4099_v43, 1  ;;  %v750_v63 = vadd.f32 %v746_v41, %v674_v42  ;;  %v4100_v16 = vstv %s3157_s1  ;;  %v941_v0 = vrot.slane %v4102_v46, 7  ;;  %v4108_v41 = vld [vmem:[#allocation65_spill] sm:$0xff] }
 0x179   :  { %v571_v39 = vsel %vm306_vm4, %v566_v3, %v569_v15  ;;  %v781_v62 = vrot.slane %v779_v26, 7  ;;  %v3457_v14 = vmul.f32 %v2197_v34, %v4100_v16  ;;  %v4101_v3 = vstv %s3144_s20  ;;  %s2147_s20 = sld [smem:[#allocation5 + $0x31]] }
 0x17a   :  { %v3431_v7 = vadd.f32 %v571_v39, %v499_v21  ;;  %v853_v20 = vpop.permute.xlu0 %852  ;;  %v123_v13 = vmul.f32 %v2198_v36, %v4101_v3  ;;  %v4103_v35 = vstv %s3142_s19  ;;  %v747_v15 = vsel %vm108_vm2, %v745_v33, %v4096_v48  ;;  %s2148_s19 = sld [smem:[#allocation5 + $0x32]] }
 0x17b   :  { %v856_v47 = vrot.slane %v853_v20, 7  ;;  %1502 = vrot.lane.b32.xlu1 %v1497_v29, %s2305_s13  ;;  %v783_v50 = vsel %vm108_vm2, %v781_v62, %v779_v26  ;;  %v821_v11 = vrot.slane %v4104_v25, 7  ;;  %v4105_v53 = vstv %s3151_s23  ;;  %v4110_v62 = vld [vmem:[#allocation67_spill] sm:$0xff]  ;;  %s2133_s23 = sld [smem:[#allocation5 + $0x34]] }
 0x17c   :  { %v3462_v8 = vadd.f32 %v783_v50, %v711_v1  ;;  %v3464_v45 = vpop.permute.xlu1 %1115  ;;  %v153_v21 = vmul.f32 %v2199_v49, %v4105_v53  ;;  %v822_v12 = vsel %vm108_vm2, %v820_v4, %v4097_v6  ;;  %v348_v56 = vadd.f32 %v344_v32, %v228_v18 }
 0x17d   :  { %v858_v59 = vsel %vm108_vm2, %v856_v47, %v853_v20  ;;  %v751_v39 = vadd.f32 %v747_v15, %v675_v58  ;;  %v4106_v29 = vmov %v4095_v22  ;;  %v420_v22 = vsel %vm306_vm4, %v4099_v43, %v418_v19  ;;  %v4109_v47 = vld [vmem:[#allocation66_spill] sm:$0xff] }
 0x17e   :  { %v3451_v57 = vadd.f32 %v858_v59, %v3356_v17  ;;  %v3453_v31 = vpop.permute.xlu0 %1191  ;;  %v126_v17 = vadd.f32 %v3275_v27, %v4103_v35  ;;  %v3479_v27 = vmul.f32 %v2200_v10, %v4106_v29  ;;  %v826_v42 = vadd.f32 %v822_v12, %v750_v63 }
 0x17f   :  { %1578 = vrot.lane.b32.xlu1 %v1573_v44, %s2305_s13  ;;  %v494_v20 = vrot.slane %v3415_v24, 1  ;;  %v4107_v48 = vmov %v4103_v35  ;;  %v944_v18 = vsel %vm943_vm5, %v941_v0, %v4102_v46  ;;  %v1021_v26 = vrot.slane %v4108_v41, 7 }
 0x180   :  { %v125_v33 = vadd.f32 %v123_v13, %v4107_v48  ;;  %v1099_v6 = vrot.slane %v4109_v47, 7  ;;  %v3492_v4 = vpop.permute.xlu1 %1448  ;;  %v156_v32 = vadd.f32 %v3391_v9, %v126_v17  ;;  %v823_v30 = vsel %vm108_vm2, %v821_v11, %v4104_v25 }
 0x181   :  { %v942_v58 = vrot.slane %v4110_v62, 7  ;;  %v1022_v1 = vrot.slane %v3230_v2, 7  ;;  %v424_v59 = vadd.f32 %v420_v22, %v348_v56  ;;  %v827_v28 = vadd.f32 %v823_v30, %v751_v39 }
 0x182   :  { %v3484_v5 = vpop.permute.xlu0 %1522  ;;  %v948_v44 = vadd.f32 %v944_v18, %v826_v42  ;;  %v1100_v43 = vrot.slane %v3287_v52, 7  ;;  %v496_v19 = vsel %vm306_vm4, %v3415_v24, %v494_v20  ;;  %v1023_v9 = vsel %vm943_vm5, %v1021_v26, %v4108_v41 }
 0x183   :  { %v1101_v50 = vsel %vm943_vm5, %v1099_v6, %v4109_v47  ;;  %v1177_v34 = vrot.slane %v3222_v40, 7  ;;  %v945_v3 = vsel %vm943_vm5, %v942_v58, %v4110_v62  ;;  %v1024_v13 = vsel %vm943_vm5, %v1022_v1, %v3230_v2 }
 0x184   :  { %v568_v16 = vpop.permute.xlu1 %567  ;;  %v1178_v46 = vrot.slane %v3340_v51, 7  ;;  %v949_v0 = vadd.f32 %v945_v3, %v827_v28  ;;  %v1296_v35 = vrot.slane %v3244_v55, 7  ;;  %v500_v17 = vadd.f32 %v496_v19, %v424_v59 }
 0x185   :  { %v570_v24 = vrot.slane %v568_v16, 1  ;;  %v1102_v25 = vsel %vm943_vm5, %v1100_v43, %v3287_v52  ;;  %v1297_v11 = vrot.slane %v3364_v54, 7  ;;  %v1027_v12 = vadd.f32 %v1023_v9, %v948_v44  ;;  %v2201_v43 = vld [vmem:[#allocation2 + $0x3] ss:$4 sm:$0x7] }
 0x186   :  { %v643_v63 = vpop.permute.xlu0 %642  ;;  %v1028_v56 = vadd.f32 %v1024_v13, %v949_v0  ;;  %v1179_v39 = vsel %vm943_vm5, %v1177_v34, %v3222_v40  ;;  %v1374_v22 = vrot.slane %v3278_v38, 7  ;;  %v1180_v52 = vsel %vm943_vm5, %v1178_v46, %v3340_v51 }
 0x187   :  { %v646_v36 = vrot.slane %v643_v63, 7  ;;  %v572_v49 = vsel %vm306_vm4, %v568_v16, %v570_v24  ;;  %v1375_v42 = vrot.slane %v3386_v23, 7  ;;  %v1105_v48 = vadd.f32 %v1101_v50, %v1027_v12  ;;  %v4112_v50 = vld [vmem:[#allocation27_spill] sm:$0xff]  ;;  %v4113_v16 = vld [vmem:[#allocation24_spill] sm:$0xff] }
 0x188   :  { %v3525_v10 = vadd.f32 %v572_v49, %v500_v17  ;;  %v855_v29 = vpop.permute.xlu1 %854  ;;  %v1106_v18 = vadd.f32 %v1102_v25, %v1028_v56  ;;  %v1299_v41 = vsel %vm1298_vm7, %v1296_v35, %v3244_v55  ;;  %v1300_v40 = vsel %vm1298_vm7, %v1297_v11, %v3364_v54  ;;  %v4114_v17 = vld [vmem:[#allocation37_spill] sm:$0xff]  ;;  %v4115_v49 = vld [vmem:[#allocation26_spill] sm:$0xff] }
 0x189   :  { %v648_v15 = vsel %vm611_vm6, %v646_v36, %v643_v63  ;;  %v857_v20 = vrot.slane %v855_v29, 7  ;;  %v1450_v26 = vrot.slane %v3381_v37, 7  ;;  %v1451_v47 = vrot.slane %v3492_v4, 7 }
 0x18a   :  { %v3519_v53 = vadd.f32 %v648_v15, %v3431_v7  ;;  %v3521_v2 = vpop.permute.xlu0 %975  ;;  %v155_v7 = vadd.f32 %v153_v21, %v125_v33  ;;  %v1183_v30 = vadd.f32 %v1179_v39, %v1105_v48  ;;  %v1184_v62 = vadd.f32 %v1180_v52, %v1106_v18 }
 0x18b   :  { %v859_v6 = vsel %vm108_vm2, %v857_v20, %v855_v29  ;;  %v2306_v55 = vmov 1935823168   ;;  %v186_v54 = vadd.f32 %v3429_v60, %v156_v32  ;;  %v1376_v1 = vsel %vm1298_vm7, %v1374_v22, %v3278_v38  ;;  %v4116_v22 = vld [vmem:[#allocation16_spill] sm:$0xff] }
 0x18c   :  { %v3541_v21 = vadd.f32 %v859_v6, %v3462_v8  ;;  %v3543_v33 = vpop.permute.xlu1 %1193  ;;  %v1596_v58 = vunpack.c.l.s4 %v2306_v55  ;;  %v1377_v59 = vsel %vm1298_vm7, %v1375_v42, %v3386_v23  ;;  %v1526_v28 = vrot.slane %v3484_v5, 7 }
 0x18d   :  { %v185_v44 = vadd.f32 %v3479_v27, %v155_v7  ;;  %v4111_v19 = vstv %s3157_s1  ;;  %v1303_v63 = vadd.f32 %v1299_v41, %v1183_v30  ;;  %v1304_v9 = vadd.f32 %v1300_v40, %v1184_v62  ;;  %v4117_v40 = vld [vmem:[#allocation42_spill] sm:$0xff]  ;;  %s2136_s1 = sld [smem:[#allocation5 + $0x2b]] }
 0x18e   :  { %v3538_v51 = vpop.permute.xlu0 %1311  ;;  %v213_v8 = vmul.f32 %v2201_v43, %v4111_v19  ;;  %v305_v34 = vrot.slane %v4112_v50, 1  ;;  %v304_v36 = vrot.slane %v4113_v16, 1  ;;  %v1452_v60 = vsel %vm1298_vm7, %v1450_v26, %v3381_v37  ;;  %v4119_v43 = vld [vmem:[#allocation46_spill] sm:$0xff] }
 0x18f   :  { %v1453_v38 = vsel %vm1298_vm7, %v1451_v47, %v3492_v4  ;;  %v1380_v32 = vadd.f32 %v1376_v1, %v1303_v63  ;;  %v1381_v3 = vadd.f32 %v1377_v59, %v1304_v9  ;;  %v1597_v13 = vunpack.c.0.s8 %v1596_v58  ;;  %v4118_v47 = vld [vmem:[#allocation36_spill] sm:$0xff] }
 0x190   :  { %v1525_v27 = vpop.permute.xlu1 %1524  ;;  %v216_v46 = vadd.f32 %v3457_v14, %v186_v54  ;;  %v1528_v24 = vsel %vm1298_vm7, %v1526_v28, %v3484_v5  ;;  %v215_v35 = vadd.f32 %v213_v8, %v185_v44  ;;  %v382_v15 = vrot.slane %v4114_v17, 1  ;;  %v4120_v8 = vld [vmem:[#allocation41_spill] sm:$0xff] }
 0x191   :  { %v1527_v0 = vrot.slane %v1525_v27, 7  ;;  %v1456_v25 = vadd.f32 %v1452_v60, %v1380_v32  ;;  %v1457_v37 = vadd.f32 %v1453_v38, %v1381_v3  ;;  %v308_v4 = vsel %vm306_vm4, %v4112_v50, %v305_v34  ;;  %v4121_v60 = vld [vmem:[#allocation50_spill] sm:$0xff]  ;;  %v4122_v32 = vld [vmem:[#allocation45_spill] sm:$0xff] }
 0x192   :  { %v3560_v23 = vpop.permute.xlu0 %718  ;;  %v307_v11 = vsel %vm306_vm4, %v4113_v16, %v304_v36  ;;  %v381_v12 = vrot.slane %v4115_v49, 1  ;;  %v3575_v52 = vsub.s32 %v1597_v13, %v4116_v22  ;;  %v312_v20 = vadd.f32 %v308_v4, %v216_v46 }
 0x193   :  { %v1529_v56 = vsel %vm1298_vm7, %v1527_v0, %v1525_v27  ;;  %v1532_v39 = vadd.f32 %v1528_v24, %v1456_v25  ;;  %v311_v7 = vadd.f32 %v307_v11, %v215_v35  ;;  %v384_v48 = vsel %vm306_vm4, %v4114_v17, %v382_v15  ;;  %v4123_v17 = vld [vmem:[#allocation53_spill] sm:$0xff]  ;;  %v4124_v25 = vld [vmem:[#allocation47_spill] sm:$0xff] }
 0x194   :  { %v1533_v5 = vadd.f32 %v1529_v56, %v1457_v37  ;;  %v645_v29 = vpop.permute.xlu1 %644  ;;  %v383_v41 = vsel %vm306_vm4, %v4115_v49, %v381_v12  ;;  %v458_v26 = vrot.slane %v4117_v40, 1  ;;  %v457_v6 = vrot.slane %v4118_v47, 1 }
 0x195   :  { %v647_v42 = vrot.slane %v645_v29, 7  ;;  %v388_v1 = vadd.f32 %v384_v48, %v312_v20  ;;  %v387_v59 = vadd.f32 %v383_v41, %v311_v7  ;;  %v534_v19 = vrot.slane %v4119_v43, 1 }
 0x196   :  { %v3572_v14 = vpop.permute.xlu0 %1053  ;;  %v1594_v18 = vcombine.low %v1532_v39, %v1533_v5  ;;  %v460_v28 = vsel %vm306_vm4, %v4117_v40, %v458_v26  ;;  %v459_v44 = vsel %vm306_vm4, %v4118_v47, %v457_v6  ;;  %v533_v63 = vrot.slane %v4120_v8, 1  ;;  %v4125_v5 = vld [vmem:[#allocation55_spill] sm:$0xff]  ;;  %v4127_v47 = vld [vmem:[#allocation56_spill] sm:$0xff] }
 0x197   :  { %v649_v30 = vsel %vm611_vm6, %v647_v42, %v645_v29  ;;  %v464_v50 = vadd.f32 %v460_v28, %v388_v1  ;;  %v463_v34 = vadd.f32 %v459_v44, %v387_v59  ;;  %v536_v16 = vsel %vm306_vm4, %v4119_v43, %v534_v19  ;;  %v4126_v42 = vld [vmem:[#allocation49_spill] sm:$0xff] }
 0x198   :  { %v3587_v55 = vadd.f32 %v649_v30, %v3525_v10  ;;  %v3589_v58 = vpop.permute.xlu1 %977  ;;  %v1601_v54 = vrot.slane %v1594_v18, %v3575_v52  ;;  %v535_v36 = vsel %vm306_vm4, %v4120_v8, %v533_v63  ;;  %v610_v38 = vrot.slane %v4121_v60, 7  ;;  %v4128_v30 = vld [vmem:[#allocation51_spill] sm:$0xff] }
 0x199   :  { %v609_v3 = vrot.slane %v4122_v32, 7  ;;  %v540_v46 = vadd.f32 %v536_v16, %v464_v50  ;;  %v539_v24 = vadd.f32 %v535_v36, %v463_v34  ;;  %v687_v15 = vrot.slane %v4123_v17, 7  ;;  %v4129_v8 = vld [vmem:[#allocation59_spill] sm:$0xff]  ;;  %v4130_v50 = vld [vmem:[#allocation57_spill] sm:$0xff] }
 0x19a   :  { %v3584_v62 = vpop.permute.xlu0 %1388  ;;  %1602 = vrot.lane.b32.xlu0 %v1601_v54, %s2291_s5  ;;  %v613_v0 = vsel %vm611_vm6, %v610_v38, %v4121_v60  ;;  %v686_v37 = vrot.slane %v4124_v25, 7  ;;  %v763_v29 = vrot.slane %v4125_v5, 7  ;;  %v762_v20 = vrot.slane %v4126_v42, 7  ;;  %v4131_v60 = vld [vmem:[#allocation63_spill] sm:$0xff] }
 0x19b   :  { %v612_v35 = vsel %vm611_vm6, %v609_v3, %v4122_v32  ;;  %v617_v49 = vadd.f32 %v613_v0, %v540_v46  ;;  %v689_v56 = vsel %vm611_vm6, %v687_v15, %v4123_v17  ;;  %v839_v6 = vrot.slane %v4127_v47, 7  ;;  %v4132_v32 = vld [vmem:[#allocation60_spill] sm:$0xff] }
 0x19c   :  { %v3601_v9 = vpop.permute.xlu1 %1313  ;;  %v616_v12 = vadd.f32 %v612_v35, %v539_v24  ;;  %v688_v39 = vsel %vm611_vm6, %v686_v37, %v4124_v25  ;;  %v765_v40 = vsel %vm611_vm6, %v763_v29, %v4125_v5  ;;  %v764_v26 = vsel %vm611_vm6, %v762_v20, %v4126_v42 }
 0x19d   :  { %v693_v18 = vadd.f32 %v689_v56, %v617_v49  ;;  %v838_v54 = vrot.slane %v4128_v30, 7  ;;  %v841_v43 = vsel %vm611_vm6, %v839_v6, %v4127_v47  ;;  %v961_v63 = vrot.slane %v4129_v8, 7 }
 0x19e   :  { %v3599_v10 = vpop.permute.xlu0 %794  ;;  %v692_v41 = vadd.f32 %v688_v39, %v616_v12  ;;  %v960_v34 = vrot.slane %v4130_v50, 7  ;;  %v1040_v38 = vrot.slane %v4131_v60, 7  ;;  %v1039_v3 = vrot.slane %v4132_v32, 7 }
 0x19f   :  { %v769_v28 = vadd.f32 %v765_v40, %v693_v18  ;;  %v840_v19 = vsel %vm611_vm6, %v838_v54, %v4128_v30  ;;  %v964_v0 = vsel %vm962_vm8, %v961_v63, %v4129_v8  ;;  %v1117_v17 = vrot.slane %v3358_v61, 7 }
 0x1a0   :  { %v3611_v13 = vpop.permute.xlu1 %720  ;;  %v768_v44 = vadd.f32 %v764_v26, %v692_v41  ;;  %v963_v35 = vsel %vm962_vm8, %v960_v34, %v4130_v50  ;;  %v1118_v15 = vrot.slane %v3464_v45, 7  ;;  %v1042_v49 = vsel %vm962_vm8, %v1040_v38, %v4131_v60 }
 0x1a1   :  { %v845_v46 = vadd.f32 %v841_v43, %v769_v28  ;;  %v1041_v12 = vsel %vm962_vm8, %v1039_v3, %v4132_v32  ;;  %v1195_v56 = vrot.slane %v3453_v31, 7  ;;  %v1196_v39 = vrot.slane %v3543_v33, 7 }
 0x1a2   :  { %v3609_v27 = vpop.permute.xlu0 %1131  ;;  %v844_v24 = vadd.f32 %v840_v19, %v768_v44  ;;  %v1119_v42 = vsel %vm962_vm8, %v1117_v17, %v3358_v61  ;;  %v1120_v20 = vsel %vm962_vm8, %v1118_v15, %v3464_v45  ;;  %v1315_v18 = vrot.slane %v3538_v51, 7 }
 0x1a3   :  { %v968_v5 = vadd.f32 %v964_v0, %v845_v46  ;;  %v1316_v41 = vrot.slane %v3601_v9, 7  ;;  %v1197_v30 = vsel %vm962_vm8, %v1195_v56, %v3453_v31  ;;  %v1198_v61 = vsel %vm962_vm8, %v1196_v39, %v3543_v33 }
 0x1a4   :  { %v3621_v11 = vpop.permute.xlu1 %1055  ;;  %v967_v29 = vadd.f32 %v963_v35, %v844_v24  ;;  %v1392_v54 = vrot.slane %v3584_v62, 7  ;;  %v1318_v43 = vsel %vm1317_vm9, %v1315_v18, %v3538_v51  ;;  %v2307_v46 = vmov 1983009808  }
 0x1a5   :  { %v1046_v26 = vadd.f32 %v1042_v49, %v968_v5  ;;  %v1319_v19 = vsel %vm1317_vm9, %v1316_v41, %v3601_v9  ;;  %v1674_v24 = vunpack.c.l.s4 %v2307_v46 }
 0x1a6   :  { %v3619_v4 = vpop.permute.xlu0 %1464  ;;  %v1045_v47 = vadd.f32 %v1041_v12, %v967_v29  ;;  %v1394_v33 = vsel %vm1317_vm9, %v1392_v54, %v3584_v62 }
 0x1a7   :  { %v1124_v44 = vadd.f32 %v1120_v20, %v1046_v26  ;;  %v1468_v8 = vrot.slane %v3619_v4, 7  ;;  %v1675_v39 = vunpack.c.0.s8 %v1674_v24 }
 0x1a8   :  { %v1391_v48 = vpop.permute.xlu1 %1390  ;;  %v1123_v28 = vadd.f32 %v1119_v42, %v1045_v47  ;;  %v4133_v47 = vld [vmem:[#allocation21_spill] sm:$0xff] }
 0x1a9   :  { %v1393_v45 = vrot.slane %v1391_v48, 7  ;;  %v1202_v34 = vadd.f32 %v1198_v61, %v1124_v44  ;;  %v1470_v9 = vsel %vm1317_vm9, %v1468_v8, %v3619_v4  ;;  %v3704_v18 = vsub.s32 %v1675_v39, %v4116_v22 }
 0x1aa   :  { %v3629_v7 = vpop.permute.xlu0 %870  ;;  %v1201_v31 = vadd.f32 %v1197_v30, %v1123_v28  ;;  %v979_v44 = vrot.slane %v3521_v2, 7 }
 0x1ab   :  { %v1395_v38 = vsel %vm1317_vm9, %v1393_v45, %v1391_v48  ;;  %v1323_v51 = vadd.f32 %v1319_v19, %v1202_v34  ;;  %v1697_v30 = vrot.slane %v4133_v47, %v3704_v18  ;;  %v4134_v45 = vld [vmem:[#allocation20_spill] sm:$0xff]  ;;  %v722_v19 = vrot.slane %v3560_v23, 7 }
 0x1ac   :  { %v3639_v59 = vpop.permute.xlu1 %796  ;;  %v1322_v3 = vadd.f32 %v1318_v43, %v1201_v31  ;;  %v1732_v28 = vrot.slane %v4134_v45, %v3704_v18  ;;  %v980_v43 = vrot.slane %v3589_v58, 7  ;;  %v1058_v31 = vrot.slane %v3621_v11, 7 }
 0x1ad   :  { %v1399_v15 = vadd.f32 %v1395_v38, %v1323_v51  ;;  %v1135_v51 = vrot.slane %v3609_v27, 7  ;;  %v724_v24 = vsel %vm611_vm6, %v722_v19, %v3560_v23  ;;  %v723_v23 = vrot.slane %v3611_v13, 7 }
 0x1ae   :  { %v3637_v1 = vpop.permute.xlu0 %1209  ;;  %v1398_v17 = vadd.f32 %v1394_v33, %v1322_v3  ;;  %v4135_v33 = vld [vmem:[#allocation23_spill] sm:$0xff]  ;;  %v982_v3 = vsel %vm943_vm5, %v980_v43, %v3589_v58  ;;  %v799_v47 = vrot.slane %v3639_v59, 7 }
 0x1af   :  { %v1679_v38 = vrot.slane %v4135_v33, %v3704_v18 }
 0x1b0   :  { %v3647_v36 = vpop.permute.xlu1 %1133  ;;  %v1474_v56 = vadd.f32 %v1470_v9, %v1398_v17  ;;  %v798_v9 = vrot.slane %v3599_v10, 7 }
 0x1b1   :  { %v1136_v46 = vrot.slane %v3647_v36, 7 }
 0x1b2   :  { %v1541_v16 = vpop.permute.xlu0 %1540 }
 0x1b3   :  { %v1544_v32 = vrot.slane %v1541_v16, 7 }
 0x1b4   :  { %v1467_v37 = vpop.permute.xlu1 %1466 }
 0x1b5   :  { %v1469_v63 = vrot.slane %v1467_v37, 7  ;;  %v1546_v12 = vsel %vm1317_vm9, %v1544_v32, %v1541_v16  ;;  %v981_v32 = vsel %vm943_vm5, %v979_v44, %v3521_v2  ;;  %v1060_v2 = vsel %vm943_vm5, %v1058_v31, %v3621_v11 }
 0x1b6   :  { %v3657_v25 = vpop.permute.xlu0 %993  ;;  %v1550_v42 = vadd.f32 %v1546_v12, %v1474_v56  ;;  %v986_v12 = vadd.f32 %v982_v3, %v3541_v21 }
 0x1b7   :  { %v1471_v0 = vsel %vm1317_vm9, %v1469_v63, %v1467_v37  ;;  %v1057_v63 = vrot.slane %v3572_v14, 7 }
 0x1b8   :  { %v3673_v6 = vpop.permute.xlu1 %872  ;;  %v1475_v48 = vadd.f32 %v1471_v0, %v1399_v15  ;;  %v1213_v15 = vrot.slane %v3637_v1, 7  ;;  %v1064_v21 = vadd.f32 %v1060_v2, %v986_v12 }
 0x1b9   :  { %v1059_v17 = vsel %vm943_vm5, %v1057_v63, %v3572_v14  ;;  %v1138_v14 = vsel %vm943_vm5, %v1136_v46, %v3647_v36  ;;  %v875_v43 = vrot.slane %v3673_v6, 7  ;;  %v801_v46 = vsel %vm611_vm6, %v799_v47, %v3639_v59 }
 0x1ba   :  { %v3671_v40 = vpop.permute.xlu0 %1330 }
 0x1bb   :  { %v1334_v11 = vrot.slane %v3671_v40, 7 }
 0x1bc   :  { %v3687_v60 = vpop.permute.xlu1 %1211 }
 0x1bd   :  { %v1214_v58 = vrot.slane %v3687_v60, 7 }
 0x1be   :  { %v3685_v50 = vpop.permute.xlu0 %1071 }
 0x1c0   :  { %v1543_v49 = vpop.permute.xlu1 %1542 }
 0x1c1   :  { %v1545_v62 = vrot.slane %v1543_v49, 7 }
 0x1c2   :  { %v3695_v35 = vpop.permute.xlu0 %1406 }
 0x1c3   :  { %v1547_v5 = vsel %vm1317_vm9, %v1545_v62, %v1543_v49  ;;  %v985_v49 = vadd.f32 %v981_v32, %v3451_v57  ;;  %v1137_v62 = vsel %vm943_vm5, %v1135_v51, %v3609_v27  ;;  %v800_v57 = vsel %vm611_vm6, %v798_v9, %v3599_v10 }
 0x1c4   :  { %v1551_v20 = vadd.f32 %v1547_v5, %v1475_v48  ;;  %v3701_v4 = vpop.permute.xlu1 %995  ;;  %v728_v48 = vadd.f32 %v724_v24, %v3519_v53  ;;  %v1216_v27 = vsel %vm943_vm5, %v1214_v58, %v3687_v60  ;;  %v1410_v36 = vrot.slane %v3695_v35, 7 }
 0x1c5   :  { %v1063_v39 = vadd.f32 %v1059_v17, %v985_v49  ;;  %v725_v53 = vsel %vm611_vm6, %v723_v23, %v3611_v13  ;;  %v1142_v10 = vadd.f32 %v1138_v14, %v1064_v21  ;;  %v874_v60 = vrot.slane %v3629_v7, 7 }
 0x1c6   :  { %v3699_v29 = vpop.permute.xlu0 %1149  ;;  %v1657_v37 = vcombine.low %v1550_v42, %v1551_v20  ;;  %v1215_v20 = vsel %vm943_vm5, %v1213_v15, %v3637_v1  ;;  %v804_v13 = vadd.f32 %v800_v57, %v728_v48  ;;  %v1412_v31 = vsel %vm1298_vm7, %v1410_v36, %v3695_v35 }
 0x1c7   :  { %v1220_v19 = vadd.f32 %v1216_v27, %v1142_v10  ;;  %v998_v24 = vrot.slane %v3701_v4, 7  ;;  %v1075_v58 = vrot.slane %v3685_v50, 7  ;;  %v1153_v14 = vrot.slane %v3699_v29, 7 }
 0x1c8   :  { %v1333_v26 = vpop.permute.xlu1 %1332  ;;  %v1664_v16 = vrot.slane %v1657_v37, %v3575_v52 }
 0x1c9   :  { %v1335_v56 = vrot.slane %v1333_v26, 7 }
 0x1ca   :  { %v3706_v41 = vpop.permute.xlu0 %1482  ;;  %1665 = vrot.lane.b32.xlu1 %v1664_v16, %s2290_s4  ;;  %v1141_v16 = vadd.f32 %v1137_v62, %v1063_v39 }
 0x1cb   :  { %v1337_v45 = vsel %vm1298_vm7, %v1335_v56, %v1333_v26  ;;  %v1486_v1 = vrot.slane %v3706_v41, 7  ;;  %v729_v26 = vadd.f32 %v725_v53, %v3587_v55  ;;  %v877_v55 = vsel %vm611_vm6, %v875_v43, %v3673_v6 }
 0x1cc   :  { %v3712_v61 = vpop.permute.xlu1 %1073  ;;  %v1219_v44 = vadd.f32 %v1215_v20, %v1141_v16  ;;  %v1341_v3 = vadd.f32 %v1337_v45, %v1220_v19  ;;  %v1000_v6 = vsel %vm962_vm8, %v998_v24, %v3701_v4  ;;  %v1155_v16 = vsel %vm962_vm8, %v1153_v14, %v3699_v29 }
 0x1cd   :  { %v1488_v9 = vsel %vm1298_vm7, %v1486_v1, %v3706_v41  ;;  %v1076_v59 = vrot.slane %v3712_v61, 7  ;;  %v805_v41 = vadd.f32 %v801_v46, %v729_v26 }
 0x1ce   :  { %v3714_v54 = vpop.permute.xlu0 %1227  ;;  %1698 = vrot.lane.b32.xlu1 %v1697_v30, %s2298_s21  ;;  %v1336_v30 = vsel %vm1298_vm7, %v1334_v11, %v3671_v40 }
 0x1cf   :  { %v1340_v32 = vadd.f32 %v1336_v30, %v1219_v44  ;;  %v881_v39 = vadd.f32 %v877_v55, %v805_v41  ;;  %v1078_v20 = vsel %vm962_vm8, %v1076_v59, %v3712_v61  ;;  %v1231_v4 = vrot.slane %v3714_v54, 7 }
 0x1d0   :  { %v1409_v8 = vpop.permute.xlu1 %1408 }
 0x1d1   :  { %v1411_v37 = vrot.slane %v1409_v8, 7  ;;  %v1416_v17 = vadd.f32 %v1412_v31, %v1340_v32 }
 0x1d2   :  { %1733 = vrot.lane.b32.xlu1 %v1732_v28, %s2297_s2  ;;  %v3725_v34 = vpop.permute.xlu0 %1558  ;;  %s2142_s2 = sld [smem:[#allocation5 + $0x61]] }
 0x1d3   :  { %v1413_v33 = vsel %vm1298_vm7, %v1411_v37, %v1409_v8  ;;  %v1562_v40 = vrot.slane %v3725_v34, 7  ;;  %v876_v8 = vsel %vm611_vm6, %v874_v60, %v3629_v7  ;;  %v1492_v62 = vadd.f32 %v1488_v9, %v1416_v17 }
 0x1d4   :  { %v3738_v0 = vpop.permute.xlu1 %1151  ;;  %v1417_v2 = vadd.f32 %v1413_v33, %v1341_v3  ;;  %v880_v48 = vadd.f32 %v876_v8, %v804_v13  ;;  %v1004_v37 = vadd.f32 %v1000_v6, %v881_v39 }
 0x1d5   :  { %v1564_v49 = vsel %vm1298_vm7, %v1562_v40, %v3725_v34  ;;  %v1154_v11 = vrot.slane %v3738_v0, 7 }
 0x1d6   :  { %1680 = vrot.lane.b32.xlu1 %v1679_v38, %s2299_s24  ;;  %v3758_v42 = vpop.permute.xlu0 %1348  ;;  %v997_v38 = vrot.slane %v3657_v25, 7  ;;  %v1568_v57 = vadd.f32 %v1564_v49, %v1492_v62 }
 0x1d7   :  { %v1156_v47 = vsel %vm962_vm8, %v1154_v11, %v3738_v0  ;;  %v1352_v10 = vrot.slane %v3758_v42, 7  ;;  %v1614_v11 = vstv %s2136_s1 }
 0x1d8   :  { %v999_v23 = vsel %vm962_vm8, %v997_v38, %v3657_v25  ;;  %v1077_v25 = vsel %vm962_vm8, %v1075_v58, %v3685_v50  ;;  %v1082_v50 = vadd.f32 %v1078_v20, %v1004_v37 }
 0x1d9   :  { %v1485_v5 = vpop.permute.xlu1 %1484  ;;  %v1003_v36 = vadd.f32 %v999_v23, %v880_v48  ;;  %v1354_v0 = vsel %vm1317_vm9, %v1352_v10, %v3758_v42  ;;  %v4136_v23 = vld [vmem:[#allocation22_spill] sm:$0xff] }
 0x1da   :  { %v1487_v28 = vrot.slane %v1485_v5, 7  ;;  %v1425_v51 = vpop.permute.xlu0 %1424  ;;  %v1160_v29 = vadd.f32 %v1156_v47, %v1082_v50  ;;  %v1756_v62 = vrot.slane %v4136_v23, %v3704_v18  ;;  %v1625_v23 = vstv %s2137_s14 }
 0x1db   :  { %v1081_v45 = vadd.f32 %v1077_v25, %v1003_v36  ;;  %v1428_v44 = vrot.slane %v1425_v51, 7 }
 0x1dc   :  { %v1489_v35 = vsel %vm1298_vm7, %v1487_v28, %v1485_v5  ;;  %v1233_v28 = vsel %vm962_vm8, %v1231_v4, %v3714_v54 }
 0x1dd   :  { %v1230_v63 = vpop.permute.xlu1 %1229  ;;  %v1493_v7 = vadd.f32 %v1489_v35, %v1417_v2  ;;  %v1159_v19 = vadd.f32 %v1155_v16, %v1081_v45  ;;  %v1430_v54 = vsel %vm1317_vm9, %v1428_v44, %v1425_v51 }
 0x1de   :  { %v1501_v21 = vpop.permute.xlu0 %1500  ;;  %v1232_v27 = vrot.slane %v1230_v63, 7 }
 0x1df   :  { %v1504_v31 = vrot.slane %v1501_v21, 7  ;;  %v1237_v40 = vadd.f32 %v1233_v28, %v1159_v19 }
 0x1e0   :  { %v1234_v60 = vsel %vm962_vm8, %v1232_v27, %v1230_v63  ;;  %v1716_v27 = vstv %s2142_s2 }
 0x1e1   :  { %v1561_v15 = vpop.permute.xlu1 %1560  ;;  %v1238_v26 = vadd.f32 %v1234_v60, %v1160_v29  ;;  %v1358_v46 = vadd.f32 %v1354_v0, %v1237_v40  ;;  %v1506_v9 = vsel %vm1317_vm9, %v1504_v31, %v1501_v21 }
 0x1e2   :  { %v1563_v12 = vrot.slane %v1561_v15, 7  ;;  %v1577_v13 = vpop.permute.xlu0 %1576 }
 0x1e3   :  { %v1580_v32 = vrot.slane %v1577_v13, 7  ;;  %v1434_v8 = vadd.f32 %v1430_v54, %v1358_v46  ;;  %v1764_v54 = vstv %s2144_s29 }
 0x1e4   :  { %v1565_v56 = vsel %vm1298_vm7, %v1563_v12, %v1561_v15 }
 0x1e5   :  { %v1569_v34 = vadd.f32 %v1565_v56, %v1493_v7  ;;  %v1351_v5 = vpop.permute.xlu1 %1350  ;;  %v1582_v17 = vsel %vm1317_vm9, %v1580_v32, %v1577_v13  ;;  %v1510_v15 = vadd.f32 %v1506_v9, %v1434_v8  ;;  %v1861_v9 = vstv %s2151_s30 }
 0x1e6   :  { %v1353_v30 = vrot.slane %v1351_v5, 7  ;;  %v1872_v8 = vstv %s2152_s7 }
 0x1e7   :  { %v1775_v53 = vcombine.low %v1568_v57, %v1569_v34  ;;  %v1586_v59 = vadd.f32 %v1582_v17, %v1510_v15 }
 0x1e8   :  { %v1355_v33 = vsel %vm1317_vm9, %v1353_v30, %v1351_v5 }
 0x1e9   :  { %v1427_v1 = vpop.permute.xlu1 %1426  ;;  %v1782_v61 = vrot.slane %v1775_v53, %v3575_v52  ;;  %v1359_v24 = vadd.f32 %v1355_v33, %v1238_v26 }
 0x1ea   :  { %v1429_v43 = vrot.slane %v1427_v1, 7 }
 0x1eb   :  { %1783 = vrot.lane.b32.xlu0 %v1782_v61, %s2291_s5 }
 0x1ec   :  { %v1431_v63 = vsel %vm1317_vm9, %v1429_v43, %v1427_v1  ;;  %v1740_v1 = vstv %s2143_s9 }
 0x1ed   :  { %v1503_v38 = vpop.permute.xlu1 %1502  ;;  %v1435_v42 = vadd.f32 %v1431_v63, %v1359_v24 }
 0x1ee   :  { %v1505_v3 = vrot.slane %v1503_v38, 7 }
 0x1f0   :  { %v1507_v35 = vsel %vm1317_vm9, %v1505_v3, %v1503_v38 }
 0x1f1   :  { %v1579_v55 = vpop.permute.xlu1 %1578  ;;  %v1511_v58 = vadd.f32 %v1507_v35, %v1435_v42 }
 0x1f2   :  { %v1581_v2 = vrot.slane %v1579_v55, 7 }
 0x1f4   :  { %v1583_v51 = vsel %vm1317_vm9, %v1581_v2, %v1579_v55 }
 0x1f5   :  { %v1587_v49 = vadd.f32 %v1583_v51, %v1511_v58  ;;  %v1896_v51 = vstv %s2154_s8 }
 0x1f7   :  { %v1838_v12 = vcombine.low %v1586_v59, %v1587_v49  ;;  %v1884_v59 = vstv %s2153_s11 }
 0x1f9   :  { %v1845_v41 = vrot.slane %v1838_v12, %v3575_v52 }
 0x1fb   :  { %1846 = vrot.lane.b32.xlu0 %v1845_v41, %s2290_s4  ;;  %v1636_v41 = vstv %s2138_s12 }
 0x1ff   :  { %1757 = vrot.lane.b32.xlu0 %v1756_v62, %s2291_s5  ;;  %s2141_s5 = sld [smem:[#allocation5 + $0x60]] }
 0x205   :  { %v1705_v36 = vstv %s2141_s5 }
 0x20c   :  { %v1603_v7 = vpop.permute.xlu0 %1602 }
 0x20d   :  { %v1604_v6 = vrot.slane %v1603_v7, 2 }
 0x20f   :  { %v1605_v14 = vsel %vm1279_vm3, %v1603_v7, %v1604_v6  ;;  %v1795_v6 = vstv %s2146_s15 }
 0x210   :  { %1607 = vst [vmem:[#allocation3 + $0x2] sm:$0xf] %v1605_v14  ;;  %v1646_v14 = vstv %s2139_s16 }
 0x217   :  { %v3831_v56 = vld [vmem:[#allocation3] sm:$0x3f] }
 0x218   :  { %v1615_v48 = vmul.f32 %v1614_v11, %v3831_v56  ;;  %v3835_v18 = vld [vmem:[#allocation3 + $0x2] sm:$0xf] }
 0x219   :  { %v3837_v57 = vld [vmem:[#allocation3 + $0x2] sm:$0x3f]  ;;  %v1626_v7 = vmul.f32 %v1625_v23, %v3835_v18  ;;  %v3870_v18 = vld [vmem:[#allocation2 + $0x14] sm:$0xff] }
 0x21a   :  { %1617 = vrot.lane.b32.xlu0 %v1615_v48, %s2300_s27  ;;  %v1637_v62 = vmul.f32 %v1636_v41, %v3837_v57  ;;  %v1647_v48 = vmul.f32 %v1646_v14, %v3837_v57  ;;  %v1925_v57 = vsel %vm1919_vm11, %v3870_v18, -inf }
 0x23c   :  { %v1666_v52 = vpop.permute.xlu1 %1665 }
 0x23d   :  { %v1667_v39 = vrot.slane %v1666_v52, 2 }
 0x23f   :  { %v1669_v34 = vsel %vm1668_vm10, %v1666_v52, %v1667_v39  ;;  %v1817_v52 = vstv %s2148_s19  ;;  %v1806_v39 = vstv %s2147_s20 }
 0x240   :  { %1671 = vst [vmem:[#allocation3 + $0x2] sm:$0xf] %v1669_v34  ;;  %v1699_v21 = vpop.permute.xlu1 %1698 }
 0x241   :  { %v1700_v5 = vrot.slane %v1699_v21, 6 }
 0x243   :  { %v1701_v20 = vsel %vm269_vm0, %v1700_v5, %v1699_v21  ;;  %v1916_v5 = vcombine.high %v3870_v18, %v3870_v18 }
 0x244   :  { %v1734_v25 = vpop.permute.xlu1 %1733 }
 0x245   :  { %v1735_v4 = vrot.slane %v1734_v25, 6 }
 0x247   :  { %v1690_v37 = vld [vmem:[#allocation3] sm:$0x3f]  ;;  %v1736_v16 = vsel %vm924_vm1, %v1735_v4, %v1734_v25  ;;  %v1926_v25 = vsel %vm1919_vm11, %v1916_v5, -inf }
 0x248   :  { %v1725_v53 = vld [vmem:[#allocation3 + $0x2] sm:$0x3f]  ;;  %v1703_v47 = vmul.f32 %v1701_v20, %v1690_v37 }
 0x249   :  { %v1714_v10 = vld [vmem:[#allocation3 + $0x2] sm:$0xf]  ;;  %v1738_v50 = vmul.f32 %v1736_v16, %v1725_v53 }
 0x24a   :  { %v1717_v30 = vmul.f32 %v1716_v27, %v1714_v10  ;;  %v1706_v45 = vmul.f32 %v1705_v36, %v1703_v47  ;;  %v3845_v44 = vld [vmem:[#allocation3] sm:$0x3f]  ;;  %v1927_v27 = vmax.f32 %v1925_v57, %v1926_v25  ;;  %v1681_v10 = vpop.permute.xlu1 %1680 }
 0x24b   :  { %v1741_v61 = vmul.f32 %v1740_v1, %v1738_v50  ;;  %v1749_v19 = vld [vmem:[#allocation3 + $0x2] sm:$0x3f] }
 0x24c   :  { %1719 = vrot.lane.b32.xlu1 %v1717_v30, %s2299_s24  ;;  %1708 = vrot.lane.b32.xlu0 %v1706_v45, %s2298_s21  ;;  %v1682_v30 = vrot.slane %v1681_v10, 6 }
 0x24e   :  { %v1683_v50 = vsel %vm108_vm2, %v1682_v30, %v1681_v10 }
 0x24f   :  { %v1685_v1 = vmul.f32 %v1683_v50, %v3845_v44 }
 0x250   :  { %1743 = vrot.lane.b32.xlu0 %v1741_v61, %s4137_s28 }
 0x25d   :  { %v1784_v28 = vpop.permute.xlu0 %1783 }
 0x25e   :  { %v1785_v60 = vrot.slane %v1784_v28, 2 }
 0x260   :  { %v1786_v43 = vsel %vm1279_vm3, %v1784_v28, %v1785_v60 }
 0x261   :  { %1788 = vst [vmem:[#allocation3 + $0x2] sm:$0xf] %v1786_v43 }
 0x268   :  { %v3849_v31 = vld [vmem:[#allocation3] sm:$0x3f] }
 0x269   :  { %v1805_v33 = vld [vmem:[#allocation3 + $0x2] sm:$0xf]  ;;  %v1796_v11 = vmul.f32 %v1795_v6, %v3849_v31  ;;  %v1589_v6 = vstv %s2133_s23 }
 0x26a   :  { %v3851_v40 = vld [vmem:[#allocation3 + $0x2] sm:$0x3f]  ;;  %v1807_v21 = vmul.f32 %v1806_v39, %v1805_v33 }
 0x26b   :  { %v1818_v34 = vmul.f32 %v1817_v52, %v3851_v40 }
 0x26d   :  { %v1847_v29 = vpop.permute.xlu0 %1846 }
 0x26e   :  { %v1848_v13 = vrot.slane %v1847_v29, 2 }
 0x270   :  { %v1849_v0 = vsel %vm1668_vm10, %v1847_v29, %v1848_v13 }
 0x271   :  { %1851 = vst [vmem:[#allocation3 + $0x2] sm:$0xf] %v1849_v0  ;;  %v1758_v26 = vpop.permute.xlu0 %1757 }
 0x272   :  { %v1759_v38 = vrot.slane %v1758_v26, 6 }
 0x274   :  { %v1760_v32 = vsel %vm1279_vm3, %v1759_v38, %v1758_v26 }
 0x275   :  { %v1762_v63 = vmul.f32 %v1760_v32, %v1749_v19 }
 0x277   :  { %v1765_v3 = vmul.f32 %v1764_v54, %v1762_v63 }
 0x278   :  { %v1893_v46 = vld [vmem:[#allocation3 + $0x2] sm:$0x3f] }
 0x279   :  { %v1858_v24 = vld [vmem:[#allocation3] sm:$0x3f]  ;;  %1767 = vrot.lane.b32.xlu1 %v1765_v3, %s2304_s22  ;;  %v1894_v17 = vmul.f32 %v1893_v46, %v1760_v32 }
 0x27a   :  { %v1870_v35 = vld [vmem:[#allocation3 + $0x2] sm:$0xf]  ;;  %v1859_v42 = vmul.f32 %v1858_v24, %v1701_v20 }
 0x27b   :  { %v1881_v55 = vld [vmem:[#allocation3 + $0x2] sm:$0x3f]  ;;  %v1873_v15 = vmul.f32 %v1872_v8, %v1870_v35  ;;  %v1897_v49 = vmul.f32 %v1896_v51, %v1894_v17 }
 0x27c   :  { %v1862_v2 = vmul.f32 %v1861_v9, %v1859_v42  ;;  %v1882_v58 = vmul.f32 %v1881_v55, %v1736_v16  ;;  %v3877_v20 = vld [vmem:[#allocation2 + $0x4] sm:$0xff] }
 0x27d   :  { %1875 = vrot.lane.b32.xlu1 %v1873_v15, %s2299_s24  ;;  %v1915_v4 = vcombine.high %v3877_v20, %v3877_v20  ;;  %v1920_v36 = vsel %vm1919_vm11, %v3877_v20, -inf  ;;  %s2149_s24 = sld [smem:[#allocation5 + $0x33]]  ;;  %v1852_v32 = vld [vmem:[#allocation3] sm:$0x3f] }
 0x27e   :  { %1864 = vrot.lane.b32.xlu0 %v1862_v2, %s2298_s21  ;;  %v1885_v12 = vmul.f32 %v1884_v59, %v1882_v58  ;;  %s4138_s21 = smov 96   ;;  %v1853_v46 = vmul.f32 %v1852_v32, %v1683_v50 }
 0x27f   :  { %v1921_v37 = vsel %vm1919_vm11, %v1915_v4, -inf }
 0x280   :  { %v1922_v53 = vmax.f32 %v1920_v36, %v1921_v37 }
 0x281   :  { %1899 = vrot.lane.b32.xlu1 %v1897_v49, %s2304_s22  ;;  %s2150_s22 = sld [smem:[#allocation5 + $0x64]] }
 0x282   :  { %1887 = vrot.lane.b32.xlu0 %v1885_v12, %s4137_s28 }
 0x283   :  { %v1827_v16 = vstv %s2149_s24 }
 0x284   :  { %v1828_v47 = vmul.f32 %v1827_v16, %v3851_v40 }
 0x285   :  { %1628 = vrot.lane.b32.xlu1 %v1626_v7, %s4138_s21 }
 0x286   :  { %1639 = vrot.lane.b32.xlu0 %v1637_v62, %s2302_s17 }
 0x287   :  { %v1855_v9 = vstv %s2150_s22 }
 0x288   :  { %v1856_v17 = vmul.f32 %v1855_v9, %v1853_v46 }
 0x289   :  { %1649 = vrot.lane.b32.xlu1 %v1647_v48, %s2305_s13 }
 0x28a   :  { %1798 = vrot.lane.b32.xlu0 %v1796_v11, %s2300_s27  ;;  %s2140_s27 = sld [smem:[#allocation5 + $0x5f]] }
 0x28c   :  { %v1618_v45 = vpop.permute.xlu0 %1617 }
 0x28d   :  { %1809 = vrot.lane.b32.xlu1 %v1807_v21, %s4138_s21  ;;  %v1619_v49 = vrot.slane %v1618_v45, 2 }
 0x28e   :  { %1820 = vrot.lane.b32.xlu0 %v1818_v34, %s2302_s17  ;;  %s2134_s17 = sld [smem:[#allocation5 + $0x69]] }
 0x28f   :  { %v1620_v39 = vsel %vm306_vm4, %v1618_v45, %v1619_v49  ;;  %v1791_v45 = vstv %s2145_s25  ;;  %v1958_v49 = vsub.s32 2, %v4116_v22 }
 0x290   :  { %v1687_v28 = vstv %s2140_s27 }
 0x291   :  { %v1688_v43 = vmul.f32 %v1687_v28, %v1685_v1  ;;  %v1792_v28 = vmul.f32 %v1791_v45, %v3849_v31 }
 0x294   :  { %v1591_v19 = vstv %s2134_s17 }
 0x295   :  { %v1689_v0 = vadd.f32 %v1688_v43, %v1591_v19 }
 0x2ad   :  { %1928 = vmax.xlane.f32.xlu0 %v1927_v27 }
 0x2b1   :  { %1923 = vmax.xlane.f32.xlu1 %v1922_v53 }
 0x2be   :  { %v1709_v61 = vpop.permute.xlu0 %1708  ;;  %v1720_v29 = vpop.permute.xlu1 %1719 }
 0x2bf   :  { %v1710_v60 = vrot.slane %v1709_v61, 2  ;;  %v1721_v40 = vrot.slane %v1720_v29, 6 }
 0x2c1   :  { %v1711_v13 = vsel %vm269_vm0, %v1709_v61, %v1710_v60  ;;  %v1722_v54 = vsel %vm108_vm2, %v1721_v40, %v1720_v29 }
 0x2c2   :  { %v1744_v33 = vpop.permute.xlu0 %1743  ;;  %v1713_v26 = vadd.f32 %v1711_v13, %v1689_v0 }
 0x2c3   :  { %1830 = vrot.lane.b32.xlu0 %v1828_v47, %s2305_s13  ;;  %v1745_v38 = vrot.slane %v1744_v33, 6  ;;  %s2135_s13 = sld [smem:[#allocation5 + $0x2a]] }
 0x2c4   :  { %v1724_v63 = vadd.f32 %v1722_v54, %v1713_v26 }
 0x2c5   :  { %v1746_v44 = vsel %vm943_vm5, %v1745_v38, %v1744_v33 }
 0x2c6   :  { %v1748_v35 = vadd.f32 %v1746_v44, %v1724_v63 }
 0x2c9   :  { %v1610_v15 = vstv %s2135_s13 }
 0x2ca   :  { %v1611_v41 = vmul.f32 %v1610_v15, %v3831_v56 }
 0x2cc   :  { %v1612_v21 = vadd.f32 %v1611_v41, %v1589_v6  ;;  %v4139_v41 = vld [vmem:[#allocation19_spill] sm:$0xff]  ;;  %v4140_v6 = vld [vmem:[#allocation17_spill] sm:$0xff] }
 0x2ce   :  { %v1622_v36 = vadd.f32 %v1620_v39, %v1612_v21 }
 0x2eb   :  { %v1768_v3 = vpop.permute.xlu1 %1767 }
 0x2ec   :  { %v1769_v24 = vrot.slane %v1768_v3, 6 }
 0x2ee   :  { %v1770_v8 = vsel %vm1298_vm7, %v1769_v24, %v1768_v3 }
 0x2ef   :  { %v1772_v42 = vadd.f32 %v1770_v8, %v1748_v35  ;;  %v1876_v55 = vpop.permute.xlu1 %1875 }
 0x2f0   :  { %v1865_v2 = vpop.permute.xlu0 %1864  ;;  %v1877_v58 = vrot.slane %v1876_v55, 6 }
 0x2f1   :  { %v1866_v51 = vrot.slane %v1865_v2, 2  ;;  %v1857_v59 = vadd.f32 %v1856_v17, %v1772_v42 }
 0x2f2   :  { %v1878_v14 = vsel %vm108_vm2, %v1877_v58, %v1876_v55 }
 0x2f3   :  { %v1867_v12 = vsel %vm269_vm0, %v1865_v2, %v1866_v51  ;;  %v1900_v62 = vpop.permute.xlu1 %1899 }
 0x2f4   :  { %v1869_v23 = vadd.f32 %v1867_v12, %v1857_v59  ;;  %v1888_v7 = vpop.permute.xlu0 %1887  ;;  %v1901_v11 = vrot.slane %v1900_v62, 6 }
 0x2f5   :  { %v1889_v48 = vrot.slane %v1888_v7, 6 }
 0x2f6   :  { %v1880_v52 = vadd.f32 %v1878_v14, %v1869_v23  ;;  %v1902_v56 = vsel %vm1298_vm7, %v1901_v11, %v1900_v62  ;;  %v4141_v11 = vld [vmem:[#allocation18_spill] sm:$0xff] }
 0x2f7   :  { %v1890_v34 = vsel %vm943_vm5, %v1889_v48, %v1888_v7  ;;  %v1629_v57 = vpop.permute.xlu1 %1628 }
 0x2f8   :  { %v1892_v5 = vadd.f32 %v1890_v34, %v1880_v52  ;;  %v1640_v25 = vpop.permute.xlu0 %1639  ;;  %v1630_v4 = vrot.slane %v1629_v57, 6 }
 0x2f9   :  { %v1641_v27 = vrot.slane %v1640_v25, 6 }
 0x2fa   :  { %v1904_v37 = vadd.f32 %v1902_v56, %v1892_v5  ;;  %v1631_v53 = vsel %vm611_vm6, %v1630_v4, %v1629_v57 }
 0x2fb   :  { %v1633_v16 = vadd.f32 %v1631_v53, %v1622_v36  ;;  %v1650_v47 = vpop.permute.xlu1 %1649  ;;  %v1642_v10 = vsel %vm962_vm8, %v1641_v27, %v1640_v25 }
 0x2fc   :  { %1906 = vrot.lane.b32.xlu1 %v1904_v37, %s2308_s0  ;;  %v1651_v30 = vrot.slane %v1650_v47, 6  ;;  %v1799_v43 = vpop.permute.xlu0 %1798 }
 0x2fd   :  { %v1644_v50 = vadd.f32 %v1642_v10, %v1633_v16  ;;  %v1800_v13 = vrot.slane %v1799_v43, 2 }
 0x2fe   :  { %v1652_v1 = vsel %vm1317_vm9, %v1651_v30, %v1650_v47 }
 0x2ff   :  { %v1654_v61 = vadd.f32 %v1652_v1, %v1644_v50  ;;  %v1810_v0 = vpop.permute.xlu1 %1809  ;;  %v1801_v33 = vsel %vm306_vm4, %v1799_v43, %v1800_v13 }
 0x300   :  { %v1821_v19 = vpop.permute.xlu0 %1820  ;;  %v1811_v40 = vrot.slane %v1810_v0, 6 }
 0x301   :  { %v1793_v60 = vadd.f32 %v1792_v28, %v1654_v61  ;;  %v1822_v63 = vrot.slane %v1821_v19, 6 }
 0x302   :  { %v1812_v32 = vsel %vm611_vm6, %v1811_v40, %v1810_v0 }
 0x303   :  { %v1803_v26 = vadd.f32 %v1801_v33, %v1793_v60  ;;  %v1823_v46 = vsel %vm962_vm8, %v1822_v63, %v1821_v19 }
 0x305   :  { %v1814_v3 = vadd.f32 %v1812_v32, %v1803_v26 }
 0x307   :  { %v1825_v24 = vadd.f32 %v1823_v46, %v1814_v3 }
 0x33a   :  { %v1929_v29 = vpop.xlane.xlu0 %1928 }
 0x33b   :  { %v1943_v15 = vsub.f32 0.0, %v1929_v29 }
 0x33d   :  { %v1946_v59 = vmul.f32 1.442695, %v1943_v15 }
 0x33e   :  { %v1831_v38 = vpop.permute.xlu0 %1830  ;;  %v1924_v54 = vpop.xlane.xlu1 %1923 }
 0x33f   :  { %v1832_v44 = vrot.slane %v1831_v38, 6  ;;  %v1942_v17 = vsub.f32 0.0, %v1924_v54 }
 0x341   :  { %v1833_v31 = vsel %vm1317_vm9, %v1832_v44, %v1831_v38  ;;  %v1944_v51 = vmul.f32 1.442695, %v1942_v17 }
 0x342   :  { %v1835_v8 = vadd.f32 %v1833_v31, %v1825_v24 }
 0x36e   :  { %v1907_v9 = vpop.permute.xlu1 %1906 }
 0x36f   :  { %v1908_v35 = vrot.slane %v1907_v9, 2 }
 0x371   :  { %v1910_v42 = vsel %vm1909_vm12, %v1907_v9, %v1908_v35 }
 0x372   :  { %v1912_v55 = vadd.f32 %v1910_v42, %v1835_v8 }
 0x374   :  { %v1930_v2 = vsub.f32 0.0, %v1912_v55 }
 0x376   :  { %v1931_v58 = vmul.f32 1.442695, %v1930_v2 }
 0x378   :  { %2179 = vpow2.f32 %v1931_v58 }
 0x379   :  { %2181 = vpow2.f32 %v1944_v51 }
 0x37a   :  { %2183 = vpow2.f32 %v1946_v59 }
 0x382   :  { %v2180_v12 = vpop.eup %2179 }
 0x383   :  { %v1940_v23 = vrot.slane %v2180_v12, %v4139_v41  ;;  %v2182_v52 = vpop.eup %2181 }
 0x384   :  { %v2184_v57 = vpop.eup %2183 }
 0x385   :  { %v1941_v62 = vcombine.high %v1940_v23, %v1940_v23  ;;  %v1959_v7 = vrot.slane %v1940_v23, %v1958_v49  ;;  %v1951_v14 = vrot.slane %v1940_v23, %v4140_v6  ;;  %v1955_v48 = vrot.slane %v1940_v23, %v4141_v11 }
 0x387   :  { %v1980_v39 = vmul.f32 %v2182_v52, %v1959_v7  ;;  %v1978_v34 = vmul.f32 %v2182_v52, %v1951_v14  ;;  %v1979_v21 = vmul.f32 %v2182_v52, %v1955_v48  ;;  %v1971_v5 = vrot.slane %v1941_v62, %v1958_v49 }
 0x388   :  { %v1963_v25 = vrot.slane %v1941_v62, %v4140_v6  ;;  %v1967_v56 = vrot.slane %v1941_v62, %v4141_v11 }
 0x389   :  { %v1986_v22 = vadd.f32 1.0, %v1980_v39  ;;  %v1984_v4 = vadd.f32 1.0, %v1978_v34  ;;  %v1985_v27 = vadd.f32 1.0, %v1979_v21  ;;  %v1983_v36 = vmul.f32 %v2184_v57, %v1971_v5 }
 0x38a   :  { %v1981_v37 = vmul.f32 %v2184_v57, %v1963_v25  ;;  %v1982_v53 = vmul.f32 %v2184_v57, %v1967_v56 }
 0x38b   :  { %2185 = vrcp.f32 %v1986_v22  ;;  %v1989_v16 = vadd.f32 1.0, %v1983_v36 }
 0x38c   :  { %2187 = vrcp.f32 %v1984_v4  ;;  %v1987_v47 = vadd.f32 1.0, %v1981_v37  ;;  %v1988_v10 = vadd.f32 1.0, %v1982_v53 }
 0x38d   :  { %2189 = vrcp.f32 %v1985_v27 }
 0x38e   :  { %2191 = vrcp.f32 %v1989_v16 }
 0x38f   :  { %2193 = vrcp.f32 %v1987_v47 }
 0x390   :  { %2195 = vrcp.f32 %v1988_v10 }
 0x395   :  { %v2186_v30 = vpop.eup %2185 }
 0x396   :  { %v2188_v45 = vpop.eup %2187  ;;  %2012 = vrot.lane.b32.xlu0 %v2186_v30, %s2290_s4 }
 0x397   :  { %v2190_v50 = vpop.eup %2189 }
 0x398   :  { %v2192_v1 = vpop.eup %2191  ;;  %v2008_v61 = vcombine.low %v2188_v45, %v2190_v50 }
 0x399   :  { %v2194_v28 = vpop.eup %2193 }
 0x39a   :  { %v2196_v60 = vpop.eup %2195  ;;  %2010 = vrot.lane.b32.xlu1 %v2008_v61, %s2290_s4  ;;  %2016 = vrot.lane.b32.xlu0 %v2192_v1, %s2290_s4 }
 0x39b   :  { %v2009_v43 = vcombine.low %v2194_v28, %v2196_v60 }
 0x39e   :  { %2014 = vrot.lane.b32.xlu1 %v2009_v43, %s2290_s4  ;;  %s2258_s4 = scalar_lea.vmem %s2038_s26, 256 }
 0x39f   :  { %p2259_p5 = scmp.ne.s32.totalorder %s2038_s26, %s2258_s4  ;;  %p2264_p7 = scmp.lt.s32.totalorder %s2258_s4, %s2258_s4 }
 0x3a1   :  { %p2265_p8 = por %p2264_p7, %p2263_p6 }
 0x3a3   :  { %p2266_p9 = pnand %p2265_p8, %p2259_p5 }
 0x408   :  { %v2013_v19 = vpop.permute.xlu0 %2012 }
 0x409   :  { %v2019_v13 = vrot.slane %v2013_v19, 4 }
 0x40c   :  { %v2011_v29 = vpop.permute.xlu1 %2010  ;;  %v2017_v33 = vpop.permute.xlu0 %2016 }
 0x40d   :  { %v2018_v0 = vrot.slane %v2011_v29, 4  ;;  %v2021_v32 = vrot.slane %v2017_v33, 4 }
 0x40f   :  { %v2022_v40 = vsel %vm1919_vm11, %v2018_v0, %v2019_v13 }
 0x410   :  { %v2023_v26 = vsel %vm1668_vm10, %v2011_v29, %v2022_v40  ;;  %v2015_v38 = vpop.permute.xlu1 %2014 }
 0x411   :  { %v2028_v54 = vmul.f32 %v3877_v20, %v2023_v26  ;;  %v2020_v63 = vrot.slane %v2015_v38, 4 }
 0x413   :  { %2030 = vst [vmem:[#allocation11] sm:$0xff] %v2028_v54  ;;  %v2024_v44 = vsel %vm1919_vm11, %v2020_v63, %v2021_v32 }
 0x414   :  { %v2025_v3 = vsel %vm1668_vm10, %v2015_v38, %v2024_v44 }
 0x415   :  { %v2029_v46 = vmul.f32 %v3870_v18, %v2025_v3 }
 0x417   :  { %2031 = vst [vmem:[#allocation11 + $0x8] sm:$0xff] %v2029_v46 }
 0x418   :  { %2269 = shalt.err (!%p2266_p9)
}
 0x419   :  { %s2270_s1 = scalar_lea.hbm %s3940_s3, 256 }
 0x41a   :  { %p2271_p10 = scmp.ne.s32.totalorder %s3940_s3, %s2270_s1  ;;  %p2274_p11 = scmp.lt.u32.totalorder %s2270_s1, %s3940_s3 }
 0x41c   :  { %p2276_p12 = pnand %p2274_p11, %p2271_p10 }
 0x41e   :  { %2279 = shalt.err (!%p2276_p12)
}
 0x41f   :  { %s4142_s29 = smov 8   ;;  %s4143_s30 = smov 128  }
 0x420   :  { %2043 = dma.vmem_to_hbm [thread:$0]  %s2038_s26, 256, %s3940_s3, [#allocation8], %s4143_s30, %s4143_s30, %s4142_s29  }
 0x421   :  { %2286 = dma.done.wait [#allocation8], 256  }
 0x422   :  { %2287 = vsyncadd [#allocation8], 4294967040 }
 0x423   :  { %2047 = vsyncpa [#allocation7], 1 }
 0x424   :  { %2048 = vsyncpa [#allocation10], 1 }
 0x425   :  { %2049 = vsyncpa [#allocation8], 1 }

</bundles_post_ra>
